<compile_context>
chip_gen: v5e
topology: v5e:2x2
jax: 0.10.0
libtpu: 0.0.40
codegen_flags: <defaults>
</compile_context>

<pallas_src>
import functools

import jax
import jax.numpy as jnp
import numpy as np
from jax.experimental import pallas as pl
from jax.experimental.pallas import tpu as pltpu

# ----------------------- small synthetic configuration -----------------------
# (scaled-down versions of the module hyperparameters; the original globals
#  max_midi_pitch / min_midi_pitch are unset in the source, so n_classes is
#  chosen synthetically)
N_CLASSES = 16          # self.n_classes
LATENT_LENGTH = 16      # self.latent_length (256 in the module)
N_LAYERS = 2            # self.n_layers (16 in the module)
HIDDEN = 32             # self.hidden_size (380)
INNER = 64              # self.self_inner_dim (900)
CROSS_HEADS = 1         # self.cross_attn_heads
SELF_HEADS = 4          # self.self_attn_heads (10)
FRACTION_TO_ROTATE = 0.25
MAX_POS = 64

CROSS_ATTEND_KEEP = 0.5     # train_mode cross_attend_dropout_keep_prob
INNER_KEEP = 0.8            # train_mode inner_dropout_keep_prob
# input_dropout_keep_prob = autoregression = final = 1.0  -> no-ops

SELF_HEAD_DIM = HIDDEN // SELF_HEADS                              # 8
ROT_DIMS = 2 * (int(FRACTION_TO_ROTATE * SELF_HEAD_DIM) // 2)     # 2
ROT_HALF = max(ROT_DIMS // 2, 1)                                  # 1
C_PAD = 128             # lane-dense logits output (sliced back in wrapper)
SLAB_W = 128            # lane width of the packed parameter slabs


# ------------------------- packed-parameter layout ----------------------------
def _layout(entries):
    offs, cur = {}, 0
    for name, rows in entries:
        offs[name] = cur
        cur += ((rows + 7) // 8) * 8        # 8-row (sublane) aligned blocks
    return offs, cur


_P_ENTRIES = [
    ("lat", LATENT_LENGTH),     # latents (L, D)
    ("cos", LATENT_LENGTH),     # full-width rotary cos (L, D)
    ("sin", LATENT_LENGTH),     # full-width rotary sin (L, D)
    ("rotp", HIDDEN),           # rotary pair-swap mixer (D, D)
    ("ln", 8),                  # rows: cross q g/b, kv g/b, mlp g/b, final g/b
    ("cb", 8),                  # rows: bq*s, bo, b2, bkv, b1, blog(padded)
    ("cwq", HIDDEN),            # cross Wq * 1/sqrt(D)   (D, D)
    ("cwkv", HIDDEN),           # cross Wk|Wv            (D, 2D)
    ("cwo", HIDDEN),            # cross Wo               (D, D)
    ("cw1", HIDDEN),            # cross W1               (D, I)
    ("cw2", INNER),             # cross W2               (I, D)
    ("wlog", HIDDEN),           # tied-embedding logits  (D, C_PAD)
]
P_OFF, P_ROWS = _layout(_P_ENTRIES)

_L_ENTRIES = [
    ("ln", 8),                  # rows: ln1 g/b, ln2 g/b, bqkv*s, bo, b1, b2
    ("wqkv", HIDDEN),           # Wq*s|Wk|Wv  (D, 3D)
    ("wo", HIDDEN),             # Wo          (D, D)
    ("w1", HIDDEN),             # W1          (D, I)
    ("w2", INNER),              # W2          (I, D)
]
L_OFF, L_ROWS = _layout(_L_ENTRIES)


def _rotary_tables():
    """Full-width rotary tables: q_rot = q*COS + (q @ P)*SIN (identity on the
    non-rotated dims).  Built once with numpy (static constants)."""
    D, L, dh, H, half = HIDDEN, LATENT_LENGTH, SELF_HEAD_DIM, SELF_HEADS, ROT_HALF
    cosf = np.ones((L, D), np.float32)
    sinf = np.zeros((L, D), np.float32)
    rotp = np.zeros((D, D), np.float32)
    if ROT_DIMS >= 2:
        pos = np.arange(L, dtype=np.float32)
        inv_freq = 1.0 / (10000.0 ** (np.arange(half, dtype=np.float32) / float(half)))
        ang = pos[:, None] * inv_freq[None, :]            # (L, half)
        for hd in range(H):
            b = hd * dh
            for j in range(half):
                c, s = np.cos(ang[:, j]), np.sin(ang[:, j])
                cosf[:, b + j] = c
                cosf[:, b + half + j] = c
                sinf[:, b + j] = s
                sinf[:, b + half + j] = s
                rotp[b + half + j, b + j] = -1.0          # out_j   += -q_{half+j}
                rotp[b + j, b + half + j] = 1.0           # out_{half+j} += +q_j
    return cosf, sinf, rotp


_COS_FULL, _SIN_FULL, _ROT_P = _rotary_tables()


# ------------------------------ fused Pallas kernel ---------------------------
def _fused_forward_kernel(x_ref, bias_ref, dmask_ref, pslab_ref, lslab_ref,
                          logits_ref, ctx_ref):
    D, L, H, dh, I = HIDDEN, LATENT_LENGTH, SELF_HEADS, SELF_HEAD_DIM, INNER

    dot = functools.partial(jnp.dot, preferred_element_type=jnp.float32)

    def dot_nt(a, c):   # a @ c.T (contract last dims; MXU NT form, flash-style)
        return jax.lax.dot_general(a, c, (((1,), (1,)), ((), ())),
                                   preferred_element_type=jnp.float32)

    def layer_norm(v, gamma, beta):
        mu = jnp.mean(v, axis=-1, keepdims=True)
        var = jnp.mean(jnp.square(v - mu), axis=-1, keepdims=True)
        return (v - mu) * jax.lax.rsqrt(var + 1e-5) * gamma + beta

    def softmax_rows(s):
        m = jnp.max(s, axis=-1, keepdims=True)
        p = jnp.exp(s - m)
        return p / jnp.sum(p, axis=-1, keepdims=True)

    x = x_ref[0]                                              # (T, D)
    z = pslab_ref[P_OFF["lat"]:P_OFF["lat"] + L, 0:D]         # (L, D) latents

    # ------------------------- cross-attention block -------------------------
    ln = pslab_ref[P_OFF["ln"]:P_OFF["ln"] + 8, 0:D]          # LN rows (cross+final)
    cb = P_OFF["cb"]
    zq = layer_norm(z, ln[0:1], ln[1:2])
    xk = layer_norm(x, ln[2:3], ln[3:4])
    # TODO(synk): 1/sqrt(D) cross scaling (folded into wq/bq wrapper-side);
    # verify against the exact PerceiverSeq single-head convention.
    q = dot(zq, pslab_ref[P_OFF["cwq"]:P_OFF["cwq"] + D, 0:D]) \
        + pslab_ref[cb:cb + 1, 0:D]                           # (L, D)
    kv = dot(xk, pslab_ref[P_OFF["cwkv"]:P_OFF["cwkv"] + D, 0:2 * D]) \
        + pslab_ref[cb + 3:cb + 4, 0:2 * D]                   # (T, 2D) fused K|V
    k, v = kv[:, 0:D], kv[:, D:2 * D]
    s = dot_nt(q, k) + bias_ref[0]                            # (L, T) + keep-bias
    attn = dot(softmax_rows(s), v)                            # (L, D)
    z = z + dot(attn, pslab_ref[P_OFF["cwo"]:P_OFF["cwo"] + D, 0:D]) \
        + pslab_ref[cb + 1:cb + 2, 0:D]
    h = layer_norm(z, ln[4:5], ln[5:6])
    # TODO(synk): tanh-approx GELU (PyTorch nn.GELU default is exact erf).
    h = jax.nn.gelu(dot(h, pslab_ref[P_OFF["cw1"]:P_OFF["cw1"] + D, 0:I])
                    + pslab_ref[cb + 4:cb + 5, 0:I], approximate=True)
    z = z + dot(h, pslab_ref[P_OFF["cw2"]:P_OFF["cw2"] + I, 0:D]) \
        + pslab_ref[cb + 2:cb + 3, 0:D]

    # ----------------------- self-attention processor ------------------------
    cosf = pslab_ref[P_OFF["cos"]:P_OFF["cos"] + L, 0:D]
    sinf = pslab_ref[P_OFF["sin"]:P_OFF["sin"] + L, 0:D]
    rotp = pslab_ref[P_OFF["rotp"]:P_OFF["rotp"] + D, 0:D]

    # Static unroll is fine at N_LAYERS=2; switch to lax.fori_loop with dynamic
    # lslab_ref indexing when N_LAYERS grows (vreg pressure / code size).
    for layer in range(N_LAYERS):
        lns = lslab_ref[layer, L_OFF["ln"]:L_OFF["ln"] + 8, :]          # (8, 128)
        hpre = layer_norm(z, lns[0:1, 0:D], lns[1:2, 0:D])
        qkv = dot(hpre,
                  lslab_ref[layer, L_OFF["wqkv"]:L_OFF["wqkv"] + D, 0:3 * D]) \
            + lns[4:5, 0:3 * D]                                         # (L, 3D)
        q_s, k_s, v_s = qkv[:, 0:D], qkv[:, D:2 * D], qkv[:, 2 * D:3 * D]
        if ROT_DIMS >= 2:
            # full-width rotary: pair-swap via one tiny matmul, no lane slicing
            q_s = q_s * cosf + dot(q_s, rotp) * sinf
            k_s = k_s * cosf + dot(k_s, rotp) * sinf
        kt = jnp.transpose(k_s)                         # (D, L), once per layer
        for hd in range(H):          # static heads; K slices = free sublane rows
            qh = q_s[:, hd * dh:(hd + 1) * dh]
            vh = v_s[:, hd * dh:(hd + 1) * dh]
            p = softmax_rows(dot(qh, kt[hd * dh:(hd + 1) * dh, :]))     # (L, L)
            ctx_ref[:, hd * dh:(hd + 1) * dh] = dot(p, vh)              # context
        # single output projection over the assembled (L, D) context
        z = z + dot(ctx_ref[...],
                    lslab_ref[layer, L_OFF["wo"]:L_OFF["wo"] + D, 0:D]) \
            + lns[5:6, 0:D]

        hpre = layer_norm(z, lns[2:3, 0:D], lns[3:4, 0:D])
        hmid = jax.nn.gelu(
            dot(hpre, lslab_ref[layer, L_OFF["w1"]:L_OFF["w1"] + D, 0:I])
            + lns[6:7, 0:I], approximate=True)
        hmid = hmid * dmask_ref[0, layer]       # pre-scaled inner-dropout mask
        z = z + dot(hmid, lslab_ref[layer, L_OFF["w2"]:L_OFF["w2"] + I, 0:D]) \
            + lns[7:8, 0:D]

    # ------------- final LayerNorm + (padded) tied-embedding logits ----------
    zf = layer_norm(z, ln[6:7], ln[7:8])
    logits_ref[0] = dot(zf, pslab_ref[P_OFF["wlog"]:P_OFF["wlog"] + D, :]) \
        + pslab_ref[cb + 5:cb + 6, :]                          # (L, C_PAD)


# ------------------------------ parameter packing ------------------------------
def _rowpad(v):
    v = jnp.asarray(v, jnp.float32).reshape(1, -1)
    return jnp.pad(v, ((0, 0), (0, SLAB_W - v.shape[1])))


def _pack_slab(entries, blocks):
    pieces = []
    for name, rows in entries:
        r8 = ((rows + 7) // 8) * 8
        m = jnp.asarray(blocks[name], jnp.float32)
        if m.ndim == 1:
            m = m.reshape(1, -1)
        pieces.append(jnp.pad(m, ((0, r8 - m.shape[0]), (0, SLAB_W - m.shape[1]))))
    return jnp.concatenate(pieces, axis=0)


def _pack_params(params):
    D, I, L, C = HIDDEN, INNER, LATENT_LENGTH, N_CLASSES
    cp = params["cross"]
    cross_scale = 1.0 / float(D) ** 0.5            # folded 1/sqrt(D)
    self_scale = 1.0 / float(SELF_HEAD_DIM) ** 0.5  # folded 1/sqrt(dh)

    cb_rows = jnp.concatenate([
        _rowpad(cp["bq"] * cross_scale), _rowpad(cp["bo"]), _rowpad(cp["b2"]),
        _rowpad(jnp.concatenate([cp["bk"], cp["bv"]])),
        _rowpad(cp["b1"]),
        _rowpad(jnp.pad(params["logit_b"], (0, C_PAD - C))),
    ], axis=0)
    pslab = _pack_slab(_P_ENTRIES, {
        "lat": params["latents"], "cos": _COS_FULL, "sin": _SIN_FULL, "rotp": _ROT_P,
        "ln": jnp.stack([cp["ln_q_g"], cp["ln_q_b"], cp["ln_kv_g"], cp["ln_kv_b"],
                         cp["ln_m_g"], cp["ln_m_b"],
                         params["ln_f_g"], params["ln_f_b"]]),
        "cb": cb_rows,
        "cwq": cp["wq"] * cross_scale,
        "cwkv": jnp.concatenate([cp["wk"], cp["wv"]], axis=1),
        "cwo": cp["wo"], "cw1": cp["w1"], "cw2": cp["w2"],
        "wlog": jnp.pad(params["embed"].T, ((0, 0), (0, C_PAD - C))),
    })

    per_layer = []
    for lp in params["layers"]:
        ln_rows = jnp.concatenate([
            _rowpad(lp["ln1_g"]), _rowpad(lp["ln1_b"]),
            _rowpad(lp["ln2_g"]), _rowpad(lp["ln2_b"]),
            _rowpad(jnp.concatenate([lp["bq"] * self_scale, lp["bk"], lp["bv"]])),
            _rowpad(lp["bo"]), _rowpad(lp["b1"]), _rowpad(lp["b2"]),
        ], axis=0)
        per_layer.append(_pack_slab(_L_ENTRIES, {
            "ln": ln_rows,
            "wqkv": jnp.concatenate([lp["wq"] * self_scale, lp["wk"], lp["wv"]],
                                    axis=1),
            "wo": lp["wo"], "w1": lp["w1"], "w2": lp["w2"],
        }))
    lslab = jnp.stack(per_layer)                   # (N_LAYERS, L_ROWS, 128)
    return pslab, lslab


# --------------------------------- JAX glue -----------------------------------
def init_params(key):
    keys = iter(jax.random.split(key, 256))

    def dense(kin, kout):
        return (jax.random.normal(next(keys), (kin, kout), jnp.float32)
                / jnp.sqrt(float(kin)))

    D, L, C, I = HIDDEN, LATENT_LENGTH, N_CLASSES, INNER
    params = {
        "embed": jax.random.normal(next(keys), (C, D), jnp.float32) * 0.02,
        "pos_emb": jax.random.normal(next(keys), (MAX_POS, D), jnp.float32) * 0.02,
        "latents": jax.random.normal(next(keys), (L, D), jnp.float32) * 0.02,
        "logit_b": jnp.zeros((C,), jnp.float32),
        "ln_f_g": jnp.ones((D,), jnp.float32),
        "ln_f_b": jnp.zeros((D,), jnp.float32),
        "cross": {
            "ln_q_g": jnp.ones((D,)), "ln_q_b": jnp.zeros((D,)),
            "ln_kv_g": jnp.ones((D,)), "ln_kv_b": jnp.zeros((D,)),
            "wq": dense(D, D), "bq": jnp.zeros((D,)),
            "wk": dense(D, D), "bk": jnp.zeros((D,)),
            "wv": dense(D, D), "bv": jnp.zeros((D,)),
            "wo": dense(D, D), "bo": jnp.zeros((D,)),
            "ln_m_g": jnp.ones((D,)), "ln_m_b": jnp.zeros((D,)),
            "w1": dense(D, I), "b1": jnp.zeros((I,)),
            "w2": dense(I, D), "b2": jnp.zeros((D,)),
        },
        "layers": [],
    }
    for _ in range(N_LAYERS):
        params["layers"].append({
            "ln1_g": jnp.ones((D,)), "ln1_b": jnp.zeros((D,)),
            "wq": dense(D, D), "bq": jnp.zeros((D,)),
            "wk": dense(D, D), "bk": jnp.zeros((D,)),
            "wv": dense(D, D), "bv": jnp.zeros((D,)),
            "wo": dense(D, D), "bo": jnp.zeros((D,)),
            "ln2_g": jnp.ones((D,)), "ln2_b": jnp.zeros((D,)),
            "w1": dense(D, I), "b1": jnp.zeros((I,)),
            "w2": dense(I, D), "b2": jnp.zeros((D,)),
        })
    return params


def net_forward(params, inputs, input_idxs, input_mask, dropout_rng):
    """Mirrors Net.forward (train_mode=True): returns (logits, drop_masks)."""
    B, T = inputs.shape
    D, L, I = HIDDEN, LATENT_LENGTH, INNER

    # token + learnable position embeddings (gather = wrapper glue)
    x = params["embed"][inputs] + params["pos_emb"][input_idxs]       # (B, T, D)
    # input_dropout_keep_prob = 1.0 -> no-op

    if input_mask is None:
        input_mask = jnp.ones((B, T), jnp.float32)

    k_cross, k_inner = jax.random.split(dropout_rng)
    # cross-attend dropout: 'uniform' over input positions, keep_prob = 0.5
    drop = jax.random.bernoulli(k_cross, p=CROSS_ATTEND_KEEP,
                                shape=(B, T)).astype(jnp.float32)
    drop = drop.at[:, 0].set(1.0)                 # never drop all keys
    # TODO(synk): if input_mask zeroes position 0 a row can still be fully
    # masked (uniform softmax); reference behaviour for all-masked rows unknown.
    keep = input_mask.astype(jnp.float32) * drop
    cross_bias = ((1.0 - keep) * (-1e9)).reshape(B, 1, T)     # additive score bias

    # inner dropout (keep_prob=0.8): pre-scaled multiplicative mask, generated
    # in the wrapper (the in-kernel HW PRNG has no interpret/CPU lowering).
    inner_mask = (jax.random.bernoulli(
        k_inner, p=INNER_KEEP, shape=(B, N_LAYERS, L, I)).astype(jnp.float32)
        * (1.0 / INNER_KEEP))

    pslab, lslab = _pack_params(params)

    logits_pad = pl.pallas_call(
        _fused_forward_kernel,
        out_shape=jax.ShapeDtypeStruct((B, L, C_PAD), jnp.float32),
        grid=(B,),
        in_specs=[
            pl.BlockSpec((1, T, D), lambda b: (b, 0, 0)),               # x
            pl.BlockSpec((1, 1, T), lambda b: (b, 0, 0)),               # cross bias
            pl.BlockSpec((1, N_LAYERS, L, I), lambda b: (b, 0, 0, 0)),  # dropout
            pl.BlockSpec((P_ROWS, SLAB_W), lambda b: (0, 0)),           # shared slab
            pl.BlockSpec((N_LAYERS, L_ROWS, SLAB_W), lambda b: (0, 0, 0)),  # layers
        ],
        out_specs=pl.BlockSpec((1, L, C_PAD), lambda b: (b, 0, 0)),
        scratch_shapes=[pltpu.VMEM((L, D), jnp.float32)],               # ctx
        compiler_params=pltpu.CompilerParams(
            dimension_semantics=("parallel",)),   # v7x: 2 TCs split the batch
    )(x, cross_bias, inner_mask, pslab, lslab)

    logits = logits_pad[..., :N_CLASSES]
    # final_dropout_keep_prob = 1.0, autoregressive_mode=False -> no-ops
    # TODO(synk): exact PerceiverSeq internals (input_masks / base_drop_masks
    # bookkeeping) are not in the provided source; drop_masks here is the
    # cross-attend keep mask, matching Net.forward's second return value role.
    return logits, keep


if __name__ == "__main__":
    key = jax.random.PRNGKey(0)
    pkey, ikey, dkey = jax.random.split(key, 3)

    params = init_params(pkey)

    B, T = 2, 8
    inputs = jax.random.randint(ikey, (B, T), 0, N_CLASSES, dtype=jnp.int32)
    input_idxs = jnp.broadcast_to(jnp.arange(T, dtype=jnp.int32), (B, T))
    input_mask = jnp.ones((B, T), jnp.float32)

    fwd = jax.jit(net_forward)
    logits, drop_masks = fwd(params, inputs, input_idxs, input_mask, dkey)
    jax.block_until_ready((logits, drop_masks))

    assert logits.shape == (B, LATENT_LENGTH, N_CLASSES)
    assert drop_masks.shape == (B, T)
    assert bool(jnp.all(jnp.isfinite(logits)))
    print("KERNEL_OK")
</pallas_src>

<mosaic_0001>
module attributes {stable_mosaic.version = 11 : i64} {
  func.func @_fused_forward_kernel(%arg0: i32, %arg1: memref<1x8x32xf32, #tpu.memory_space<vmem>>, %arg2: memref<1x1x8xf32, #tpu.memory_space<vmem>>, %arg3: memref<1x2x16x64xf32, #tpu.memory_space<vmem>>, %arg4: memref<320x128xf32, #tpu.memory_space<vmem>>, %arg5: memref<2x168x128xf32, #tpu.memory_space<vmem>>, %arg6: memref<1x16x128xf32, #tpu.memory_space<vmem>>, %arg7: memref<16x32xf32, #tpu.memory_space<vmem>>) attributes {dimension_semantics = [#tpu.dimension_semantics<parallel>], iteration_bounds = array<i64: 2>, scalar_prefetch = 0 : i64, scratch_operands = 1 : i64, tpu.core_type = #tpu.core_type<tc>, window_params = [{transform_indices = @transform_0, window_bounds = array<i64: 1, 8, 32>}, {transform_indices = @transform_1, window_bounds = array<i64: 1, 1, 8>}, {transform_indices = @transform_2, window_bounds = array<i64: 1, 2, 16, 64>}, {pipeline_mode = #tpu.pipeline_mode<synchronous>, transform_indices = @transform_3, window_bounds = array<i64: 320, 128>}, {pipeline_mode = #tpu.pipeline_mode<synchronous>, transform_indices = @transform_4, window_bounds = array<i64: 2, 168, 128>}, {transform_indices = @transform_5, window_bounds = array<i64: 1, 16, 128>}]} {
    %c0 = arith.constant 0 : index
    %c0_0 = arith.constant 0 : index
    %c0_1 = arith.constant 0 : index
    %0 = vector.load %arg1[%c0, %c0_0, %c0_1] : memref<1x8x32xf32, #tpu.memory_space<vmem>>, vector<1x8x32xf32>
    %1 = vector.shape_cast %0 : vector<1x8x32xf32> to vector<8x32xf32>
    %c0_2 = arith.constant 0 : index
    %c0_3 = arith.constant 0 : index
    %2 = vector.load %arg4[%c0_2, %c0_3] : memref<320x128xf32, #tpu.memory_space<vmem>>, vector<16x32xf32>
    %c80 = arith.constant 80 : index
    %c0_4 = arith.constant 0 : index
    %3 = vector.load %arg4[%c80, %c0_4] : memref<320x128xf32, #tpu.memory_space<vmem>>, vector<8x32xf32>
    %4 = vector.extract_strided_slice %3 {offsets = [0, 0], sizes = [1, 32], strides = [1, 1]} : vector<8x32xf32> to vector<1x32xf32>
    %5 = vector.extract_strided_slice %3 {offsets = [1, 0], sizes = [1, 32], strides = [1, 1]} : vector<8x32xf32> to vector<1x32xf32>
    %cst = arith.constant dense<0.000000e+00> : vector<16xf32>
    %6 = vector.multi_reduction <add>, %2, %cst [1] : vector<16x32xf32> to vector<16xf32>
    %7 = vector.shape_cast %6 : vector<16xf32> to vector<16x1xf32>
    %cst_5 = arith.constant 3.200000e+01 : f32
    %8 = vector.broadcast %cst_5 : f32 to vector<16x1xf32>
    %9 = arith.divf %7, %8 : vector<16x1xf32>
    %10 = vector.broadcast %9 : vector<16x1xf32> to vector<16x32xf32>
    %11 = arith.subf %2, %10 : vector<16x32xf32>
    %12 = arith.mulf %11, %11 : vector<16x32xf32>
    %cst_6 = arith.constant dense<0.000000e+00> : vector<16xf32>
    %13 = vector.multi_reduction <add>, %12, %cst_6 [1] : vector<16x32xf32> to vector<16xf32>
    %14 = vector.shape_cast %13 : vector<16xf32> to vector<16x1xf32>
    %cst_7 = arith.constant 3.200000e+01 : f32
    %15 = vector.broadcast %cst_7 : f32 to vector<16x1xf32>
    %16 = arith.divf %14, %15 : vector<16x1xf32>
    %17 = vector.broadcast %9 : vector<16x1xf32> to vector<16x32xf32>
    %18 = arith.subf %2, %17 : vector<16x32xf32>
    %cst_8 = arith.constant 9.99999974E-6 : f32
    %19 = vector.broadcast %cst_8 : f32 to vector<16x1xf32>
    %20 = arith.addf %16, %19 : vector<16x1xf32>
    %21 = math.rsqrt %20 : vector<16x1xf32>
    %22 = vector.broadcast %21 : vector<16x1xf32> to vector<16x32xf32>
    %23 = arith.mulf %18, %22 : vector<16x32xf32>
    %24 = vector.broadcast %4 : vector<1x32xf32> to vector<16x32xf32>
    %25 = arith.mulf %23, %24 : vector<16x32xf32>
    %26 = vector.broadcast %5 : vector<1x32xf32> to vector<16x32xf32>
    %27 = arith.addf %25, %26 : vector<16x32xf32>
    %28 = vector.extract_strided_slice %3 {offsets = [2, 0], sizes = [1, 32], strides = [1, 1]} : vector<8x32xf32> to vector<1x32xf32>
    %29 = vector.extract_strided_slice %3 {offsets = [3, 0], sizes = [1, 32], strides = [1, 1]} : vector<8x32xf32> to vector<1x32xf32>
    %cst_9 = arith.constant dense<0.000000e+00> : vector<8xf32>
    %30 = vector.multi_reduction <add>, %1, %cst_9 [1] : vector<8x32xf32> to vector<8xf32>
    %31 = vector.shape_cast %30 : vector<8xf32> to vector<8x1xf32>
    %cst_10 = arith.constant 3.200000e+01 : f32
    %32 = vector.broadcast %cst_10 : f32 to vector<8x1xf32>
    %33 = arith.divf %31, %32 : vector<8x1xf32>
    %34 = vector.broadcast %33 : vector<8x1xf32> to vector<8x32xf32>
    %35 = arith.subf %1, %34 : vector<8x32xf32>
    %36 = arith.mulf %35, %35 : vector<8x32xf32>
    %cst_11 = arith.constant dense<0.000000e+00> : vector<8xf32>
    %37 = vector.multi_reduction <add>, %36, %cst_11 [1] : vector<8x32xf32> to vector<8xf32>
    %38 = vector.shape_cast %37 : vector<8xf32> to vector<8x1xf32>
    %cst_12 = arith.constant 3.200000e+01 : f32
    %39 = vector.broadcast %cst_12 : f32 to vector<8x1xf32>
    %40 = arith.divf %38, %39 : vector<8x1xf32>
    %41 = vector.broadcast %33 : vector<8x1xf32> to vector<8x32xf32>
    %42 = arith.subf %1, %41 : vector<8x32xf32>
    %cst_13 = arith.constant 9.99999974E-6 : f32
    %43 = vector.broadcast %cst_13 : f32 to vector<8x1xf32>
    %44 = arith.addf %40, %43 : vector<8x1xf32>
    %45 = math.rsqrt %44 : vector<8x1xf32>
    %46 = vector.broadcast %45 : vector<8x1xf32> to vector<8x32xf32>
    %47 = arith.mulf %42, %46 : vector<8x32xf32>
    %48 = vector.broadcast %28 : vector<1x32xf32> to vector<8x32xf32>
    %49 = arith.mulf %47, %48 : vector<8x32xf32>
    %50 = vector.broadcast %29 : vector<1x32xf32> to vector<8x32xf32>
    %51 = arith.addf %49, %50 : vector<8x32xf32>
    %c96 = arith.constant 96 : index
    %c0_14 = arith.constant 0 : index
    %52 = vector.load %arg4[%c96, %c0_14] : memref<320x128xf32, #tpu.memory_space<vmem>>, vector<32x32xf32>
    %cst_15 = arith.constant dense<0.000000e+00> : vector<16x32xf32>
    %53 = tpu.matmul %27, %52, %cst_15 {dimension_numbers = #tpu.dot_dimension_numbers<[1], [0], [0], [1], [0, 0, 1, 1], [], []>} : vector<16x32xf32>, vector<32x32xf32>, vector<16x32xf32> -> vector<16x32xf32>
    %c88 = arith.constant 88 : index
    %c0_16 = arith.constant 0 : index
    %54 = vector.load %arg4[%c88, %c0_16] : memref<320x128xf32, #tpu.memory_space<vmem>>, vector<1x32xf32>
    %55 = vector.broadcast %54 : vector<1x32xf32> to vector<16x32xf32>
    %56 = arith.addf %53, %55 : vector<16x32xf32>
    %c128 = arith.constant 128 : index
    %c0_17 = arith.constant 0 : index
    %57 = vector.load %arg4[%c128, %c0_17] : memref<320x128xf32, #tpu.memory_space<vmem>>, vector<32x64xf32>
    %cst_18 = arith.constant dense<0.000000e+00> : vector<8x64xf32>
    %58 = tpu.matmul %51, %57, %cst_18 {dimension_numbers = #tpu.dot_dimension_numbers<[1], [0], [0], [1], [0, 0, 1, 1], [], []>} : vector<8x32xf32>, vector<32x64xf32>, vector<8x64xf32> -> vector<8x64xf32>
    %c91 = arith.constant 91 : index
    %c0_19 = arith.constant 0 : index
    %59 = vector.load %arg4[%c91, %c0_19] : memref<320x128xf32, #tpu.memory_space<vmem>>, vector<1x64xf32>
    %60 = vector.broadcast %59 : vector<1x64xf32> to vector<8x64xf32>
    %61 = arith.addf %58, %60 : vector<8x64xf32>
    %62 = vector.extract_strided_slice %61 {offsets = [0, 0], sizes = [8, 32], strides = [1, 1]} : vector<8x64xf32> to vector<8x32xf32>
    %63 = vector.extract_strided_slice %61 {offsets = [0, 32], sizes = [8, 32], strides = [1, 1]} : vector<8x64xf32> to vector<8x32xf32>
    %cst_20 = arith.constant dense<0.000000e+00> : vector<16x8xf32>
    %64 = tpu.matmul %56, %62, %cst_20 {dimension_numbers = #tpu.dot_dimension_numbers<[1], [1], [0], [0], [0, 0, 1, 0], [], []>} : vector<16x32xf32>, vector<8x32xf32>, vector<16x8xf32> -> vector<16x8xf32>
    %c0_21 = arith.constant 0 : index
    %c0_22 = arith.constant 0 : index
    %c0_23 = arith.constant 0 : index
    %65 = vector.load %arg2[%c0_21, %c0_22, %c0_23] : memref<1x1x8xf32, #tpu.memory_space<vmem>>, vector<1x1x8xf32>
    %66 = vector.shape_cast %65 : vector<1x1x8xf32> to vector<1x8xf32>
    %67 = vector.broadcast %66 : vector<1x8xf32> to vector<16x8xf32>
    %68 = arith.addf %64, %67 : vector<16x8xf32>
    %cst_24 = arith.constant dense<0xFF800000> : vector<16xf32>
    %69 = vector.multi_reduction <maximumf>, %68, %cst_24 [1] : vector<16x8xf32> to vector<16xf32>
    %70 = vector.shape_cast %69 : vector<16xf32> to vector<16x1xf32>
    %71 = vector.broadcast %70 : vector<16x1xf32> to vector<16x8xf32>
    %72 = arith.subf %68, %71 : vector<16x8xf32>
    %73 = math.exp %72 : vector<16x8xf32>
    %cst_25 = arith.constant dense<0.000000e+00> : vector<16xf32>
    %74 = vector.multi_reduction <add>, %73, %cst_25 [1] : vector<16x8xf32> to vector<16xf32>
    %75 = vector.shape_cast %74 : vector<16xf32> to vector<16x1xf32>
    %76 = vector.broadcast %75 : vector<16x1xf32> to vector<16x8xf32>
    %77 = arith.divf %73, %76 : vector<16x8xf32>
    %cst_26 = arith.constant dense<0.000000e+00> : vector<16x32xf32>
    %78 = tpu.matmul %77, %63, %cst_26 {dimension_numbers = #tpu.dot_dimension_numbers<[1], [0], [0], [1], [0, 0, 1, 1], [], []>} : vector<16x8xf32>, vector<8x32xf32>, vector<16x32xf32> -> vector<16x32xf32>
    %c160 = arith.constant 160 : index
    %c0_27 = arith.constant 0 : index
    %79 = vector.load %arg4[%c160, %c0_27] : memref<320x128xf32, #tpu.memory_space<vmem>>, vector<32x32xf32>
    %cst_28 = arith.constant dense<0.000000e+00> : vector<16x32xf32>
    %80 = tpu.matmul %78, %79, %cst_28 {dimension_numbers = #tpu.dot_dimension_numbers<[1], [0], [0], [1], [0, 0, 1, 1], [], []>} : vector<16x32xf32>, vector<32x32xf32>, vector<16x32xf32> -> vector<16x32xf32>
    %81 = arith.addf %2, %80 : vector<16x32xf32>
    %c89 = arith.constant 89 : index
    %c0_29 = arith.constant 0 : index
    %82 = vector.load %arg4[%c89, %c0_29] : memref<320x128xf32, #tpu.memory_space<vmem>>, vector<1x32xf32>
    %83 = vector.broadcast %82 : vector<1x32xf32> to vector<16x32xf32>
    %84 = arith.addf %81, %83 : vector<16x32xf32>
    %85 = vector.extract_strided_slice %3 {offsets = [4, 0], sizes = [1, 32], strides = [1, 1]} : vector<8x32xf32> to vector<1x32xf32>
    %86 = vector.extract_strided_slice %3 {offsets = [5, 0], sizes = [1, 32], strides = [1, 1]} : vector<8x32xf32> to vector<1x32xf32>
    %cst_30 = arith.constant dense<0.000000e+00> : vector<16xf32>
    %87 = vector.multi_reduction <add>, %84, %cst_30 [1] : vector<16x32xf32> to vector<16xf32>
    %88 = vector.shape_cast %87 : vector<16xf32> to vector<16x1xf32>
    %cst_31 = arith.constant 3.200000e+01 : f32
    %89 = vector.broadcast %cst_31 : f32 to vector<16x1xf32>
    %90 = arith.divf %88, %89 : vector<16x1xf32>
    %91 = vector.broadcast %90 : vector<16x1xf32> to vector<16x32xf32>
    %92 = arith.subf %84, %91 : vector<16x32xf32>
    %93 = arith.mulf %92, %92 : vector<16x32xf32>
    %cst_32 = arith.constant dense<0.000000e+00> : vector<16xf32>
    %94 = vector.multi_reduction <add>, %93, %cst_32 [1] : vector<16x32xf32> to vector<16xf32>
    %95 = vector.shape_cast %94 : vector<16xf32> to vector<16x1xf32>
    %cst_33 = arith.constant 3.200000e+01 : f32
    %96 = vector.broadcast %cst_33 : f32 to vector<16x1xf32>
    %97 = arith.divf %95, %96 : vector<16x1xf32>
    %98 = vector.broadcast %90 : vector<16x1xf32> to vector<16x32xf32>
    %99 = arith.subf %84, %98 : vector<16x32xf32>
    %cst_34 = arith.constant 9.99999974E-6 : f32
    %100 = vector.broadcast %cst_34 : f32 to vector<16x1xf32>
    %101 = arith.addf %97, %100 : vector<16x1xf32>
    %102 = math.rsqrt %101 : vector<16x1xf32>
    %103 = vector.broadcast %102 : vector<16x1xf32> to vector<16x32xf32>
    %104 = arith.mulf %99, %103 : vector<16x32xf32>
    %105 = vector.broadcast %85 : vector<1x32xf32> to vector<16x32xf32>
    %106 = arith.mulf %104, %105 : vector<16x32xf32>
    %107 = vector.broadcast %86 : vector<1x32xf32> to vector<16x32xf32>
    %108 = arith.addf %106, %107 : vector<16x32xf32>
    %c192 = arith.constant 192 : index
    %c0_35 = arith.constant 0 : index
    %109 = vector.load %arg4[%c192, %c0_35] : memref<320x128xf32, #tpu.memory_space<vmem>>, vector<32x64xf32>
    %cst_36 = arith.constant dense<0.000000e+00> : vector<16x64xf32>
    %110 = tpu.matmul %108, %109, %cst_36 {dimension_numbers = #tpu.dot_dimension_numbers<[1], [0], [0], [1], [0, 0, 1, 1], [], []>} : vector<16x32xf32>, vector<32x64xf32>, vector<16x64xf32> -> vector<16x64xf32>
    %c92 = arith.constant 92 : index
    %c0_37 = arith.constant 0 : index
    %111 = vector.load %arg4[%c92, %c0_37] : memref<320x128xf32, #tpu.memory_space<vmem>>, vector<1x64xf32>
    %112 = vector.broadcast %111 : vector<1x64xf32> to vector<16x64xf32>
    %113 = arith.addf %110, %112 : vector<16x64xf32>
    %114 = arith.mulf %113, %113 : vector<16x64xf32>
    %115 = arith.mulf %113, %114 : vector<16x64xf32>
    %cst_38 = arith.constant 4.471500e-02 : f32
    %116 = vector.broadcast %cst_38 : f32 to vector<16x64xf32>
    %117 = arith.mulf %116, %115 : vector<16x64xf32>
    %118 = arith.addf %113, %117 : vector<16x64xf32>
    %cst_39 = arith.constant 0.797884583 : f32
    %119 = vector.broadcast %cst_39 : f32 to vector<16x64xf32>
    %120 = arith.mulf %119, %118 : vector<16x64xf32>
    %121 = math.tanh %120 : vector<16x64xf32>
    %cst_40 = arith.constant 1.000000e+00 : f32
    %122 = vector.broadcast %cst_40 : f32 to vector<16x64xf32>
    %123 = arith.addf %122, %121 : vector<16x64xf32>
    %cst_41 = arith.constant 5.000000e-01 : f32
    %124 = vector.broadcast %cst_41 : f32 to vector<16x64xf32>
    %125 = arith.mulf %124, %123 : vector<16x64xf32>
    %126 = arith.mulf %113, %125 : vector<16x64xf32>
    %c224 = arith.constant 224 : index
    %c0_42 = arith.constant 0 : index
    %127 = vector.load %arg4[%c224, %c0_42] : memref<320x128xf32, #tpu.memory_space<vmem>>, vector<64x32xf32>
    %cst_43 = arith.constant dense<0.000000e+00> : vector<16x32xf32>
    %128 = tpu.matmul %126, %127, %cst_43 {dimension_numbers = #tpu.dot_dimension_numbers<[1], [0], [0], [1], [0, 0, 1, 1], [], []>} : vector<16x64xf32>, vector<64x32xf32>, vector<16x32xf32> -> vector<16x32xf32>
    %129 = arith.addf %84, %128 : vector<16x32xf32>
    %c90 = arith.constant 90 : index
    %c0_44 = arith.constant 0 : index
    %130 = vector.load %arg4[%c90, %c0_44] : memref<320x128xf32, #tpu.memory_space<vmem>>, vector<1x32xf32>
    %131 = vector.broadcast %130 : vector<1x32xf32> to vector<16x32xf32>
    %132 = arith.addf %129, %131 : vector<16x32xf32>
    %c16 = arith.constant 16 : index
    %c0_45 = arith.constant 0 : index
    %133 = vector.load %arg4[%c16, %c0_45] : memref<320x128xf32, #tpu.memory_space<vmem>>, vector<16x32xf32>
    %c32 = arith.constant 32 : index
    %c0_46 = arith.constant 0 : index
    %134 = vector.load %arg4[%c32, %c0_46] : memref<320x128xf32, #tpu.memory_space<vmem>>, vector<16x32xf32>
    %c48 = arith.constant 48 : index
    %c0_47 = arith.constant 0 : index
    %135 = vector.load %arg4[%c48, %c0_47] : memref<320x128xf32, #tpu.memory_space<vmem>>, vector<32x32xf32>
    %c0_48 = arith.constant 0 : index
    %c0_49 = arith.constant 0 : index
    %c0_50 = arith.constant 0 : index
    %136 = vector.load %arg5[%c0_48, %c0_49, %c0_50] : memref<2x168x128xf32, #tpu.memory_space<vmem>>, vector<1x8x128xf32>
    %137 = vector.shape_cast %136 : vector<1x8x128xf32> to vector<8x128xf32>
    %138 = vector.extract_strided_slice %137 {offsets = [0, 0], sizes = [1, 32], strides = [1, 1]} : vector<8x128xf32> to vector<1x32xf32>
    %139 = vector.extract_strided_slice %137 {offsets = [1, 0], sizes = [1, 32], strides = [1, 1]} : vector<8x128xf32> to vector<1x32xf32>
    %cst_51 = arith.constant dense<0.000000e+00> : vector<16xf32>
    %140 = vector.multi_reduction <add>, %132, %cst_51 [1] : vector<16x32xf32> to vector<16xf32>
    %141 = vector.shape_cast %140 : vector<16xf32> to vector<16x1xf32>
    %cst_52 = arith.constant 3.200000e+01 : f32
    %142 = vector.broadcast %cst_52 : f32 to vector<16x1xf32>
    %143 = arith.divf %141, %142 : vector<16x1xf32>
    %144 = vector.broadcast %143 : vector<16x1xf32> to vector<16x32xf32>
    %145 = arith.subf %132, %144 : vector<16x32xf32>
    %146 = arith.mulf %145, %145 : vector<16x32xf32>
    %cst_53 = arith.constant dense<0.000000e+00> : vector<16xf32>
    %147 = vector.multi_reduction <add>, %146, %cst_53 [1] : vector<16x32xf32> to vector<16xf32>
    %148 = vector.shape_cast %147 : vector<16xf32> to vector<16x1xf32>
    %cst_54 = arith.constant 3.200000e+01 : f32
    %149 = vector.broadcast %cst_54 : f32 to vector<16x1xf32>
    %150 = arith.divf %148, %149 : vector<16x1xf32>
    %151 = vector.broadcast %143 : vector<16x1xf32> to vector<16x32xf32>
    %152 = arith.subf %132, %151 : vector<16x32xf32>
    %cst_55 = arith.constant 9.99999974E-6 : f32
    %153 = vector.broadcast %cst_55 : f32 to vector<16x1xf32>
    %154 = arith.addf %150, %153 : vector<16x1xf32>
    %155 = math.rsqrt %154 : vector<16x1xf32>
    %156 = vector.broadcast %155 : vector<16x1xf32> to vector<16x32xf32>
    %157 = arith.mulf %152, %156 : vector<16x32xf32>
    %158 = vector.broadcast %138 : vector<1x32xf32> to vector<16x32xf32>
    %159 = arith.mulf %157, %158 : vector<16x32xf32>
    %160 = vector.broadcast %139 : vector<1x32xf32> to vector<16x32xf32>
    %161 = arith.addf %159, %160 : vector<16x32xf32>
    %c0_56 = arith.constant 0 : index
    %c8 = arith.constant 8 : index
    %c0_57 = arith.constant 0 : index
    %162 = vector.load %arg5[%c0_56, %c8, %c0_57] : memref<2x168x128xf32, #tpu.memory_space<vmem>>, vector<1x32x96xf32>
    %163 = vector.shape_cast %162 : vector<1x32x96xf32> to vector<32x96xf32>
    %cst_58 = arith.constant dense<0.000000e+00> : vector<16x96xf32>
    %164 = tpu.matmul %161, %163, %cst_58 {dimension_numbers = #tpu.dot_dimension_numbers<[1], [0], [0], [1], [0, 0, 1, 1], [], []>} : vector<16x32xf32>, vector<32x96xf32>, vector<16x96xf32> -> vector<16x96xf32>
    %165 = vector.extract_strided_slice %137 {offsets = [4, 0], sizes = [1, 96], strides = [1, 1]} : vector<8x128xf32> to vector<1x96xf32>
    %166 = vector.broadcast %165 : vector<1x96xf32> to vector<16x96xf32>
    %167 = arith.addf %164, %166 : vector<16x96xf32>
    %168 = vector.extract_strided_slice %167 {offsets = [0, 0], sizes = [16, 32], strides = [1, 1]} : vector<16x96xf32> to vector<16x32xf32>
    %169 = vector.extract_strided_slice %167 {offsets = [0, 32], sizes = [16, 32], strides = [1, 1]} : vector<16x96xf32> to vector<16x32xf32>
    %170 = vector.extract_strided_slice %167 {offsets = [0, 64], sizes = [16, 32], strides = [1, 1]} : vector<16x96xf32> to vector<16x32xf32>
    %171 = arith.mulf %168, %133 : vector<16x32xf32>
    %cst_59 = arith.constant dense<0.000000e+00> : vector<16x32xf32>
    %172 = tpu.matmul %168, %135, %cst_59 {dimension_numbers = #tpu.dot_dimension_numbers<[1], [0], [0], [1], [0, 0, 1, 1], [], []>} : vector<16x32xf32>, vector<32x32xf32>, vector<16x32xf32> -> vector<16x32xf32>
    %173 = arith.mulf %172, %134 : vector<16x32xf32>
    %174 = arith.addf %171, %173 : vector<16x32xf32>
    %175 = arith.mulf %169, %133 : vector<16x32xf32>
    %cst_60 = arith.constant dense<0.000000e+00> : vector<16x32xf32>
    %176 = tpu.matmul %169, %135, %cst_60 {dimension_numbers = #tpu.dot_dimension_numbers<[1], [0], [0], [1], [0, 0, 1, 1], [], []>} : vector<16x32xf32>, vector<32x32xf32>, vector<16x32xf32> -> vector<16x32xf32>
    %177 = arith.mulf %176, %134 : vector<16x32xf32>
    %178 = arith.addf %175, %177 : vector<16x32xf32>
    %179 = tpu.transpose %178, [1, 0] : vector<16x32xf32> -> vector<32x16xf32>
    %180 = vector.extract_strided_slice %174 {offsets = [0, 0], sizes = [16, 8], strides = [1, 1]} : vector<16x32xf32> to vector<16x8xf32>
    %181 = vector.extract_strided_slice %170 {offsets = [0, 0], sizes = [16, 8], strides = [1, 1]} : vector<16x32xf32> to vector<16x8xf32>
    %182 = vector.extract_strided_slice %179 {offsets = [0, 0], sizes = [8, 16], strides = [1, 1]} : vector<32x16xf32> to vector<8x16xf32>
    %cst_61 = arith.constant dense<0.000000e+00> : vector<16x16xf32>
    %183 = tpu.matmul %180, %182, %cst_61 {dimension_numbers = #tpu.dot_dimension_numbers<[1], [0], [0], [1], [0, 0, 1, 1], [], []>} : vector<16x8xf32>, vector<8x16xf32>, vector<16x16xf32> -> vector<16x16xf32>
    %cst_62 = arith.constant dense<0xFF800000> : vector<16xf32>
    %184 = vector.multi_reduction <maximumf>, %183, %cst_62 [1] : vector<16x16xf32> to vector<16xf32>
    %185 = vector.shape_cast %184 : vector<16xf32> to vector<16x1xf32>
    %186 = vector.broadcast %185 : vector<16x1xf32> to vector<16x16xf32>
    %187 = arith.subf %183, %186 : vector<16x16xf32>
    %188 = math.exp %187 : vector<16x16xf32>
    %cst_63 = arith.constant dense<0.000000e+00> : vector<16xf32>
    %189 = vector.multi_reduction <add>, %188, %cst_63 [1] : vector<16x16xf32> to vector<16xf32>
    %190 = vector.shape_cast %189 : vector<16xf32> to vector<16x1xf32>
    %191 = vector.broadcast %190 : vector<16x1xf32> to vector<16x16xf32>
    %192 = arith.divf %188, %191 : vector<16x16xf32>
    %cst_64 = arith.constant dense<0.000000e+00> : vector<16x8xf32>
    %193 = tpu.matmul %192, %181, %cst_64 {dimension_numbers = #tpu.dot_dimension_numbers<[1], [0], [0], [1], [0, 0, 1, 1], [], []>} : vector<16x16xf32>, vector<16x8xf32>, vector<16x8xf32> -> vector<16x8xf32>
    %c0_65 = arith.constant 0 : index
    %c0_66 = arith.constant 0 : index
    %194 = vector.load %arg7[%c0_65, %c0_66] : memref<16x32xf32, #tpu.memory_space<vmem>>, vector<16x8xf32>
    tpu.vector_store %arg7[%c0_65, %c0_66], %193 {strides = array<i32>} : memref<16x32xf32, #tpu.memory_space<vmem>>, vector<16x8xf32>,
    %195 = vector.extract_strided_slice %174 {offsets = [0, 8], sizes = [16, 8], strides = [1, 1]} : vector<16x32xf32> to vector<16x8xf32>
    %196 = vector.extract_strided_slice %170 {offsets = [0, 8], sizes = [16, 8], strides = [1, 1]} : vector<16x32xf32> to vector<16x8xf32>
    %197 = vector.extract_strided_slice %179 {offsets = [8, 0], sizes = [8, 16], strides = [1, 1]} : vector<32x16xf32> to vector<8x16xf32>
    %cst_67 = arith.constant dense<0.000000e+00> : vector<16x16xf32>
    %198 = tpu.matmul %195, %197, %cst_67 {dimension_numbers = #tpu.dot_dimension_numbers<[1], [0], [0], [1], [0, 0, 1, 1], [], []>} : vector<16x8xf32>, vector<8x16xf32>, vector<16x16xf32> -> vector<16x16xf32>
    %cst_68 = arith.constant dense<0xFF800000> : vector<16xf32>
    %199 = vector.multi_reduction <maximumf>, %198, %cst_68 [1] : vector<16x16xf32> to vector<16xf32>
    %200 = vector.shape_cast %199 : vector<16xf32> to vector<16x1xf32>
    %201 = vector.broadcast %200 : vector<16x1xf32> to vector<16x16xf32>
    %202 = arith.subf %198, %201 : vector<16x16xf32>
    %203 = math.exp %202 : vector<16x16xf32>
    %cst_69 = arith.constant dense<0.000000e+00> : vector<16xf32>
    %204 = vector.multi_reduction <add>, %203, %cst_69 [1] : vector<16x16xf32> to vector<16xf32>
    %205 = vector.shape_cast %204 : vector<16xf32> to vector<16x1xf32>
    %206 = vector.broadcast %205 : vector<16x1xf32> to vector<16x16xf32>
    %207 = arith.divf %203, %206 : vector<16x16xf32>
    %cst_70 = arith.constant dense<0.000000e+00> : vector<16x8xf32>
    %208 = tpu.matmul %207, %196, %cst_70 {dimension_numbers = #tpu.dot_dimension_numbers<[1], [0], [0], [1], [0, 0, 1, 1], [], []>} : vector<16x16xf32>, vector<16x8xf32>, vector<16x8xf32> -> vector<16x8xf32>
    %c0_71 = arith.constant 0 : index
    %c8_72 = arith.constant 8 : index
    %209 = vector.load %arg7[%c0_71, %c8_72] : memref<16x32xf32, #tpu.memory_space<vmem>>, vector<16x8xf32>
    tpu.vector_store %arg7[%c0_71, %c8_72], %208 {strides = array<i32>} : memref<16x32xf32, #tpu.memory_space<vmem>>, vector<16x8xf32>,
    %210 = vector.extract_strided_slice %174 {offsets = [0, 16], sizes = [16, 8], strides = [1, 1]} : vector<16x32xf32> to vector<16x8xf32>
    %211 = vector.extract_strided_slice %170 {offsets = [0, 16], sizes = [16, 8], strides = [1, 1]} : vector<16x32xf32> to vector<16x8xf32>
    %212 = vector.extract_strided_slice %179 {offsets = [16, 0], sizes = [8, 16], strides = [1, 1]} : vector<32x16xf32> to vector<8x16xf32>
    %cst_73 = arith.constant dense<0.000000e+00> : vector<16x16xf32>
    %213 = tpu.matmul %210, %212, %cst_73 {dimension_numbers = #tpu.dot_dimension_numbers<[1], [0], [0], [1], [0, 0, 1, 1], [], []>} : vector<16x8xf32>, vector<8x16xf32>, vector<16x16xf32> -> vector<16x16xf32>
    %cst_74 = arith.constant dense<0xFF800000> : vector<16xf32>
    %214 = vector.multi_reduction <maximumf>, %213, %cst_74 [1] : vector<16x16xf32> to vector<16xf32>
    %215 = vector.shape_cast %214 : vector<16xf32> to vector<16x1xf32>
    %216 = vector.broadcast %215 : vector<16x1xf32> to vector<16x16xf32>
    %217 = arith.subf %213, %216 : vector<16x16xf32>
    %218 = math.exp %217 : vector<16x16xf32>
    %cst_75 = arith.constant dense<0.000000e+00> : vector<16xf32>
    %219 = vector.multi_reduction <add>, %218, %cst_75 [1] : vector<16x16xf32> to vector<16xf32>
    %220 = vector.shape_cast %219 : vector<16xf32> to vector<16x1xf32>
    %221 = vector.broadcast %220 : vector<16x1xf32> to vector<16x16xf32>
    %222 = arith.divf %218, %221 : vector<16x16xf32>
    %cst_76 = arith.constant dense<0.000000e+00> : vector<16x8xf32>
    %223 = tpu.matmul %222, %211, %cst_76 {dimension_numbers = #tpu.dot_dimension_numbers<[1], [0], [0], [1], [0, 0, 1, 1], [], []>} : vector<16x16xf32>, vector<16x8xf32>, vector<16x8xf32> -> vector<16x8xf32>
    %c0_77 = arith.constant 0 : index
    %c16_78 = arith.constant 16 : index
    %224 = vector.load %arg7[%c0_77, %c16_78] : memref<16x32xf32, #tpu.memory_space<vmem>>, vector<16x8xf32>
    tpu.vector_store %arg7[%c0_77, %c16_78], %223 {strides = array<i32>} : memref<16x32xf32, #tpu.memory_space<vmem>>, vector<16x8xf32>,
    %225 = vector.extract_strided_slice %174 {offsets = [0, 24], sizes = [16, 8], strides = [1, 1]} : vector<16x32xf32> to vector<16x8xf32>
    %226 = vector.extract_strided_slice %170 {offsets = [0, 24], sizes = [16, 8], strides = [1, 1]} : vector<16x32xf32> to vector<16x8xf32>
    %227 = vector.extract_strided_slice %179 {offsets = [24, 0], sizes = [8, 16], strides = [1, 1]} : vector<32x16xf32> to vector<8x16xf32>
    %cst_79 = arith.constant dense<0.000000e+00> : vector<16x16xf32>
    %228 = tpu.matmul %225, %227, %cst_79 {dimension_numbers = #tpu.dot_dimension_numbers<[1], [0], [0], [1], [0, 0, 1, 1], [], []>} : vector<16x8xf32>, vector<8x16xf32>, vector<16x16xf32> -> vector<16x16xf32>
    %cst_80 = arith.constant dense<0xFF800000> : vector<16xf32>
    %229 = vector.multi_reduction <maximumf>, %228, %cst_80 [1] : vector<16x16xf32> to vector<16xf32>
    %230 = vector.shape_cast %229 : vector<16xf32> to vector<16x1xf32>
    %231 = vector.broadcast %230 : vector<16x1xf32> to vector<16x16xf32>
    %232 = arith.subf %228, %231 : vector<16x16xf32>
    %233 = math.exp %232 : vector<16x16xf32>
    %cst_81 = arith.constant dense<0.000000e+00> : vector<16xf32>
    %234 = vector.multi_reduction <add>, %233, %cst_81 [1] : vector<16x16xf32> to vector<16xf32>
    %235 = vector.shape_cast %234 : vector<16xf32> to vector<16x1xf32>
    %236 = vector.broadcast %235 : vector<16x1xf32> to vector<16x16xf32>
    %237 = arith.divf %233, %236 : vector<16x16xf32>
    %cst_82 = arith.constant dense<0.000000e+00> : vector<16x8xf32>
    %238 = tpu.matmul %237, %226, %cst_82 {dimension_numbers = #tpu.dot_dimension_numbers<[1], [0], [0], [1], [0, 0, 1, 1], [], []>} : vector<16x16xf32>, vector<16x8xf32>, vector<16x8xf32> -> vector<16x8xf32>
    %c0_83 = arith.constant 0 : index
    %c24 = arith.constant 24 : index
    %239 = vector.load %arg7[%c0_83, %c24] : memref<16x32xf32, #tpu.memory_space<vmem>>, vector<16x8xf32>
    tpu.vector_store %arg7[%c0_83, %c24], %238 {strides = array<i32>} : memref<16x32xf32, #tpu.memory_space<vmem>>, vector<16x8xf32>,
    %c0_84 = arith.constant 0 : index
    %c0_85 = arith.constant 0 : index
    %240 = vector.load %arg7[%c0_84, %c0_85] : memref<16x32xf32, #tpu.memory_space<vmem>>, vector<16x32xf32>
    %c0_86 = arith.constant 0 : index
    %c40 = arith.constant 40 : index
    %c0_87 = arith.constant 0 : index
    %241 = vector.load %arg5[%c0_86, %c40, %c0_87] : memref<2x168x128xf32, #tpu.memory_space<vmem>>, vector<1x32x32xf32>
    %242 = vector.shape_cast %241 : vector<1x32x32xf32> to vector<32x32xf32>
    %cst_88 = arith.constant dense<0.000000e+00> : vector<16x32xf32>
    %243 = tpu.matmul %240, %242, %cst_88 {dimension_numbers = #tpu.dot_dimension_numbers<[1], [0], [0], [1], [0, 0, 1, 1], [], []>} : vector<16x32xf32>, vector<32x32xf32>, vector<16x32xf32> -> vector<16x32xf32>
    %244 = arith.addf %132, %243 : vector<16x32xf32>
    %245 = vector.extract_strided_slice %137 {offsets = [5, 0], sizes = [1, 32], strides = [1, 1]} : vector<8x128xf32> to vector<1x32xf32>
    %246 = vector.broadcast %245 : vector<1x32xf32> to vector<16x32xf32>
    %247 = arith.addf %244, %246 : vector<16x32xf32>
    %248 = vector.extract_strided_slice %137 {offsets = [2, 0], sizes = [1, 32], strides = [1, 1]} : vector<8x128xf32> to vector<1x32xf32>
    %249 = vector.extract_strided_slice %137 {offsets = [3, 0], sizes = [1, 32], strides = [1, 1]} : vector<8x128xf32> to vector<1x32xf32>
    %cst_89 = arith.constant dense<0.000000e+00> : vector<16xf32>
    %250 = vector.multi_reduction <add>, %247, %cst_89 [1] : vector<16x32xf32> to vector<16xf32>
    %251 = vector.shape_cast %250 : vector<16xf32> to vector<16x1xf32>
    %cst_90 = arith.constant 3.200000e+01 : f32
    %252 = vector.broadcast %cst_90 : f32 to vector<16x1xf32>
    %253 = arith.divf %251, %252 : vector<16x1xf32>
    %254 = vector.broadcast %253 : vector<16x1xf32> to vector<16x32xf32>
    %255 = arith.subf %247, %254 : vector<16x32xf32>
    %256 = arith.mulf %255, %255 : vector<16x32xf32>
    %cst_91 = arith.constant dense<0.000000e+00> : vector<16xf32>
    %257 = vector.multi_reduction <add>, %256, %cst_91 [1] : vector<16x32xf32> to vector<16xf32>
    %258 = vector.shape_cast %257 : vector<16xf32> to vector<16x1xf32>
    %cst_92 = arith.constant 3.200000e+01 : f32
    %259 = vector.broadcast %cst_92 : f32 to vector<16x1xf32>
    %260 = arith.divf %258, %259 : vector<16x1xf32>
    %261 = vector.broadcast %253 : vector<16x1xf32> to vector<16x32xf32>
    %262 = arith.subf %247, %261 : vector<16x32xf32>
    %cst_93 = arith.constant 9.99999974E-6 : f32
    %263 = vector.broadcast %cst_93 : f32 to vector<16x1xf32>
    %264 = arith.addf %260, %263 : vector<16x1xf32>
    %265 = math.rsqrt %264 : vector<16x1xf32>
    %266 = vector.broadcast %265 : vector<16x1xf32> to vector<16x32xf32>
    %267 = arith.mulf %262, %266 : vector<16x32xf32>
    %268 = vector.broadcast %248 : vector<1x32xf32> to vector<16x32xf32>
    %269 = arith.mulf %267, %268 : vector<16x32xf32>
    %270 = vector.broadcast %249 : vector<1x32xf32> to vector<16x32xf32>
    %271 = arith.addf %269, %270 : vector<16x32xf32>
    %c0_94 = arith.constant 0 : index
    %c72 = arith.constant 72 : index
    %c0_95 = arith.constant 0 : index
    %272 = vector.load %arg5[%c0_94, %c72, %c0_95] : memref<2x168x128xf32, #tpu.memory_space<vmem>>, vector<1x32x64xf32>
    %273 = vector.shape_cast %272 : vector<1x32x64xf32> to vector<32x64xf32>
    %cst_96 = arith.constant dense<0.000000e+00> : vector<16x64xf32>
    %274 = tpu.matmul %271, %273, %cst_96 {dimension_numbers = #tpu.dot_dimension_numbers<[1], [0], [0], [1], [0, 0, 1, 1], [], []>} : vector<16x32xf32>, vector<32x64xf32>, vector<16x64xf32> -> vector<16x64xf32>
    %275 = vector.extract_strided_slice %137 {offsets = [6, 0], sizes = [1, 64], strides = [1, 1]} : vector<8x128xf32> to vector<1x64xf32>
    %276 = vector.broadcast %275 : vector<1x64xf32> to vector<16x64xf32>
    %277 = arith.addf %274, %276 : vector<16x64xf32>
    %278 = arith.mulf %277, %277 : vector<16x64xf32>
    %279 = arith.mulf %277, %278 : vector<16x64xf32>
    %cst_97 = arith.constant 4.471500e-02 : f32
    %280 = vector.broadcast %cst_97 : f32 to vector<16x64xf32>
    %281 = arith.mulf %280, %279 : vector<16x64xf32>
    %282 = arith.addf %277, %281 : vector<16x64xf32>
    %cst_98 = arith.constant 0.797884583 : f32
    %283 = vector.broadcast %cst_98 : f32 to vector<16x64xf32>
    %284 = arith.mulf %283, %282 : vector<16x64xf32>
    %285 = math.tanh %284 : vector<16x64xf32>
    %cst_99 = arith.constant 1.000000e+00 : f32
    %286 = vector.broadcast %cst_99 : f32 to vector<16x64xf32>
    %287 = arith.addf %286, %285 : vector<16x64xf32>
    %cst_100 = arith.constant 5.000000e-01 : f32
    %288 = vector.broadcast %cst_100 : f32 to vector<16x64xf32>
    %289 = arith.mulf %288, %287 : vector<16x64xf32>
    %290 = arith.mulf %277, %289 : vector<16x64xf32>
    %c0_101 = arith.constant 0 : index
    %c0_102 = arith.constant 0 : index
    %c0_103 = arith.constant 0 : index
    %c0_104 = arith.constant 0 : index
    %291 = vector.load %arg3[%c0_101, %c0_102, %c0_103, %c0_104] : memref<1x2x16x64xf32, #tpu.memory_space<vmem>>, vector<1x1x16x64xf32>
    %292 = vector.shape_cast %291 : vector<1x1x16x64xf32> to vector<16x64xf32>
    %293 = arith.mulf %290, %292 : vector<16x64xf32>
    %c0_105 = arith.constant 0 : index
    %c104 = arith.constant 104 : index
    %c0_106 = arith.constant 0 : index
    %294 = vector.load %arg5[%c0_105, %c104, %c0_106] : memref<2x168x128xf32, #tpu.memory_space<vmem>>, vector<1x64x32xf32>
    %295 = vector.shape_cast %294 : vector<1x64x32xf32> to vector<64x32xf32>
    %cst_107 = arith.constant dense<0.000000e+00> : vector<16x32xf32>
    %296 = tpu.matmul %293, %295, %cst_107 {dimension_numbers = #tpu.dot_dimension_numbers<[1], [0], [0], [1], [0, 0, 1, 1], [], []>} : vector<16x64xf32>, vector<64x32xf32>, vector<16x32xf32> -> vector<16x32xf32>
    %297 = arith.addf %247, %296 : vector<16x32xf32>
    %298 = vector.extract_strided_slice %137 {offsets = [7, 0], sizes = [1, 32], strides = [1, 1]} : vector<8x128xf32> to vector<1x32xf32>
    %299 = vector.broadcast %298 : vector<1x32xf32> to vector<16x32xf32>
    %300 = arith.addf %297, %299 : vector<16x32xf32>
    %c1 = arith.constant 1 : index
    %c0_108 = arith.constant 0 : index
    %c0_109 = arith.constant 0 : index
    %301 = vector.load %arg5[%c1, %c0_108, %c0_109] : memref<2x168x128xf32, #tpu.memory_space<vmem>>, vector<1x8x128xf32>
    %302 = vector.shape_cast %301 : vector<1x8x128xf32> to vector<8x128xf32>
    %303 = vector.extract_strided_slice %302 {offsets = [0, 0], sizes = [1, 32], strides = [1, 1]} : vector<8x128xf32> to vector<1x32xf32>
    %304 = vector.extract_strided_slice %302 {offsets = [1, 0], sizes = [1, 32], strides = [1, 1]} : vector<8x128xf32> to vector<1x32xf32>
    %cst_110 = arith.constant dense<0.000000e+00> : vector<16xf32>
    %305 = vector.multi_reduction <add>, %300, %cst_110 [1] : vector<16x32xf32> to vector<16xf32>
    %306 = vector.shape_cast %305 : vector<16xf32> to vector<16x1xf32>
    %cst_111 = arith.constant 3.200000e+01 : f32
    %307 = vector.broadcast %cst_111 : f32 to vector<16x1xf32>
    %308 = arith.divf %306, %307 : vector<16x1xf32>
    %309 = vector.broadcast %308 : vector<16x1xf32> to vector<16x32xf32>
    %310 = arith.subf %300, %309 : vector<16x32xf32>
    %311 = arith.mulf %310, %310 : vector<16x32xf32>
    %cst_112 = arith.constant dense<0.000000e+00> : vector<16xf32>
    %312 = vector.multi_reduction <add>, %311, %cst_112 [1] : vector<16x32xf32> to vector<16xf32>
    %313 = vector.shape_cast %312 : vector<16xf32> to vector<16x1xf32>
    %cst_113 = arith.constant 3.200000e+01 : f32
    %314 = vector.broadcast %cst_113 : f32 to vector<16x1xf32>
    %315 = arith.divf %313, %314 : vector<16x1xf32>
    %316 = vector.broadcast %308 : vector<16x1xf32> to vector<16x32xf32>
    %317 = arith.subf %300, %316 : vector<16x32xf32>
    %cst_114 = arith.constant 9.99999974E-6 : f32
    %318 = vector.broadcast %cst_114 : f32 to vector<16x1xf32>
    %319 = arith.addf %315, %318 : vector<16x1xf32>
    %320 = math.rsqrt %319 : vector<16x1xf32>
    %321 = vector.broadcast %320 : vector<16x1xf32> to vector<16x32xf32>
    %322 = arith.mulf %317, %321 : vector<16x32xf32>
    %323 = vector.broadcast %303 : vector<1x32xf32> to vector<16x32xf32>
    %324 = arith.mulf %322, %323 : vector<16x32xf32>
    %325 = vector.broadcast %304 : vector<1x32xf32> to vector<16x32xf32>
    %326 = arith.addf %324, %325 : vector<16x32xf32>
    %c1_115 = arith.constant 1 : index
    %c8_116 = arith.constant 8 : index
    %c0_117 = arith.constant 0 : index
    %327 = vector.load %arg5[%c1_115, %c8_116, %c0_117] : memref<2x168x128xf32, #tpu.memory_space<vmem>>, vector<1x32x96xf32>
    %328 = vector.shape_cast %327 : vector<1x32x96xf32> to vector<32x96xf32>
    %cst_118 = arith.constant dense<0.000000e+00> : vector<16x96xf32>
    %329 = tpu.matmul %326, %328, %cst_118 {dimension_numbers = #tpu.dot_dimension_numbers<[1], [0], [0], [1], [0, 0, 1, 1], [], []>} : vector<16x32xf32>, vector<32x96xf32>, vector<16x96xf32> -> vector<16x96xf32>
    %330 = vector.extract_strided_slice %302 {offsets = [4, 0], sizes = [1, 96], strides = [1, 1]} : vector<8x128xf32> to vector<1x96xf32>
    %331 = vector.broadcast %330 : vector<1x96xf32> to vector<16x96xf32>
    %332 = arith.addf %329, %331 : vector<16x96xf32>
    %333 = vector.extract_strided_slice %332 {offsets = [0, 0], sizes = [16, 32], strides = [1, 1]} : vector<16x96xf32> to vector<16x32xf32>
    %334 = vector.extract_strided_slice %332 {offsets = [0, 32], sizes = [16, 32], strides = [1, 1]} : vector<16x96xf32> to vector<16x32xf32>
    %335 = vector.extract_strided_slice %332 {offsets = [0, 64], sizes = [16, 32], strides = [1, 1]} : vector<16x96xf32> to vector<16x32xf32>
    %336 = arith.mulf %333, %133 : vector<16x32xf32>
    %cst_119 = arith.constant dense<0.000000e+00> : vector<16x32xf32>
    %337 = tpu.matmul %333, %135, %cst_119 {dimension_numbers = #tpu.dot_dimension_numbers<[1], [0], [0], [1], [0, 0, 1, 1], [], []>} : vector<16x32xf32>, vector<32x32xf32>, vector<16x32xf32> -> vector<16x32xf32>
    %338 = arith.mulf %337, %134 : vector<16x32xf32>
    %339 = arith.addf %336, %338 : vector<16x32xf32>
    %340 = arith.mulf %334, %133 : vector<16x32xf32>
    %cst_120 = arith.constant dense<0.000000e+00> : vector<16x32xf32>
    %341 = tpu.matmul %334, %135, %cst_120 {dimension_numbers = #tpu.dot_dimension_numbers<[1], [0], [0], [1], [0, 0, 1, 1], [], []>} : vector<16x32xf32>, vector<32x32xf32>, vector<16x32xf32> -> vector<16x32xf32>
    %342 = arith.mulf %341, %134 : vector<16x32xf32>
    %343 = arith.addf %340, %342 : vector<16x32xf32>
    %344 = tpu.transpose %343, [1, 0] : vector<16x32xf32> -> vector<32x16xf32>
    %345 = vector.extract_strided_slice %339 {offsets = [0, 0], sizes = [16, 8], strides = [1, 1]} : vector<16x32xf32> to vector<16x8xf32>
    %346 = vector.extract_strided_slice %335 {offsets = [0, 0], sizes = [16, 8], strides = [1, 1]} : vector<16x32xf32> to vector<16x8xf32>
    %347 = vector.extract_strided_slice %344 {offsets = [0, 0], sizes = [8, 16], strides = [1, 1]} : vector<32x16xf32> to vector<8x16xf32>
    %cst_121 = arith.constant dense<0.000000e+00> : vector<16x16xf32>
    %348 = tpu.matmul %345, %347, %cst_121 {dimension_numbers = #tpu.dot_dimension_numbers<[1], [0], [0], [1], [0, 0, 1, 1], [], []>} : vector<16x8xf32>, vector<8x16xf32>, vector<16x16xf32> -> vector<16x16xf32>
    %cst_122 = arith.constant dense<0xFF800000> : vector<16xf32>
    %349 = vector.multi_reduction <maximumf>, %348, %cst_122 [1] : vector<16x16xf32> to vector<16xf32>
    %350 = vector.shape_cast %349 : vector<16xf32> to vector<16x1xf32>
    %351 = vector.broadcast %350 : vector<16x1xf32> to vector<16x16xf32>
    %352 = arith.subf %348, %351 : vector<16x16xf32>
    %353 = math.exp %352 : vector<16x16xf32>
    %cst_123 = arith.constant dense<0.000000e+00> : vector<16xf32>
    %354 = vector.multi_reduction <add>, %353, %cst_123 [1] : vector<16x16xf32> to vector<16xf32>
    %355 = vector.shape_cast %354 : vector<16xf32> to vector<16x1xf32>
    %356 = vector.broadcast %355 : vector<16x1xf32> to vector<16x16xf32>
    %357 = arith.divf %353, %356 : vector<16x16xf32>
    %cst_124 = arith.constant dense<0.000000e+00> : vector<16x8xf32>
    %358 = tpu.matmul %357, %346, %cst_124 {dimension_numbers = #tpu.dot_dimension_numbers<[1], [0], [0], [1], [0, 0, 1, 1], [], []>} : vector<16x16xf32>, vector<16x8xf32>, vector<16x8xf32> -> vector<16x8xf32>
    %c0_125 = arith.constant 0 : index
    %c0_126 = arith.constant 0 : index
    %359 = vector.load %arg7[%c0_125, %c0_126] : memref<16x32xf32, #tpu.memory_space<vmem>>, vector<16x8xf32>
    tpu.vector_store %arg7[%c0_125, %c0_126], %358 {strides = array<i32>} : memref<16x32xf32, #tpu.memory_space<vmem>>, vector<16x8xf32>,
    %360 = vector.extract_strided_slice %339 {offsets = [0, 8], sizes = [16, 8], strides = [1, 1]} : vector<16x32xf32> to vector<16x8xf32>
    %361 = vector.extract_strided_slice %335 {offsets = [0, 8], sizes = [16, 8], strides = [1, 1]} : vector<16x32xf32> to vector<16x8xf32>
    %362 = vector.extract_strided_slice %344 {offsets = [8, 0], sizes = [8, 16], strides = [1, 1]} : vector<32x16xf32> to vector<8x16xf32>
    %cst_127 = arith.constant dense<0.000000e+00> : vector<16x16xf32>
    %363 = tpu.matmul %360, %362, %cst_127 {dimension_numbers = #tpu.dot_dimension_numbers<[1], [0], [0], [1], [0, 0, 1, 1], [], []>} : vector<16x8xf32>, vector<8x16xf32>, vector<16x16xf32> -> vector<16x16xf32>
    %cst_128 = arith.constant dense<0xFF800000> : vector<16xf32>
    %364 = vector.multi_reduction <maximumf>, %363, %cst_128 [1] : vector<16x16xf32> to vector<16xf32>
    %365 = vector.shape_cast %364 : vector<16xf32> to vector<16x1xf32>
    %366 = vector.broadcast %365 : vector<16x1xf32> to vector<16x16xf32>
    %367 = arith.subf %363, %366 : vector<16x16xf32>
    %368 = math.exp %367 : vector<16x16xf32>
    %cst_129 = arith.constant dense<0.000000e+00> : vector<16xf32>
    %369 = vector.multi_reduction <add>, %368, %cst_129 [1] : vector<16x16xf32> to vector<16xf32>
    %370 = vector.shape_cast %369 : vector<16xf32> to vector<16x1xf32>
    %371 = vector.broadcast %370 : vector<16x1xf32> to vector<16x16xf32>
    %372 = arith.divf %368, %371 : vector<16x16xf32>
    %cst_130 = arith.constant dense<0.000000e+00> : vector<16x8xf32>
    %373 = tpu.matmul %372, %361, %cst_130 {dimension_numbers = #tpu.dot_dimension_numbers<[1], [0], [0], [1], [0, 0, 1, 1], [], []>} : vector<16x16xf32>, vector<16x8xf32>, vector<16x8xf32> -> vector<16x8xf32>
    %c0_131 = arith.constant 0 : index
    %c8_132 = arith.constant 8 : index
    %374 = vector.load %arg7[%c0_131, %c8_132] : memref<16x32xf32, #tpu.memory_space<vmem>>, vector<16x8xf32>
    tpu.vector_store %arg7[%c0_131, %c8_132], %373 {strides = array<i32>} : memref<16x32xf32, #tpu.memory_space<vmem>>, vector<16x8xf32>,
    %375 = vector.extract_strided_slice %339 {offsets = [0, 16], sizes = [16, 8], strides = [1, 1]} : vector<16x32xf32> to vector<16x8xf32>
    %376 = vector.extract_strided_slice %335 {offsets = [0, 16], sizes = [16, 8], strides = [1, 1]} : vector<16x32xf32> to vector<16x8xf32>
    %377 = vector.extract_strided_slice %344 {offsets = [16, 0], sizes = [8, 16], strides = [1, 1]} : vector<32x16xf32> to vector<8x16xf32>
    %cst_133 = arith.constant dense<0.000000e+00> : vector<16x16xf32>
    %378 = tpu.matmul %375, %377, %cst_133 {dimension_numbers = #tpu.dot_dimension_numbers<[1], [0], [0], [1], [0, 0, 1, 1], [], []>} : vector<16x8xf32>, vector<8x16xf32>, vector<16x16xf32> -> vector<16x16xf32>
    %cst_134 = arith.constant dense<0xFF800000> : vector<16xf32>
    %379 = vector.multi_reduction <maximumf>, %378, %cst_134 [1] : vector<16x16xf32> to vector<16xf32>
    %380 = vector.shape_cast %379 : vector<16xf32> to vector<16x1xf32>
    %381 = vector.broadcast %380 : vector<16x1xf32> to vector<16x16xf32>
    %382 = arith.subf %378, %381 : vector<16x16xf32>
    %383 = math.exp %382 : vector<16x16xf32>
    %cst_135 = arith.constant dense<0.000000e+00> : vector<16xf32>
    %384 = vector.multi_reduction <add>, %383, %cst_135 [1] : vector<16x16xf32> to vector<16xf32>
    %385 = vector.shape_cast %384 : vector<16xf32> to vector<16x1xf32>
    %386 = vector.broadcast %385 : vector<16x1xf32> to vector<16x16xf32>
    %387 = arith.divf %383, %386 : vector<16x16xf32>
    %cst_136 = arith.constant dense<0.000000e+00> : vector<16x8xf32>
    %388 = tpu.matmul %387, %376, %cst_136 {dimension_numbers = #tpu.dot_dimension_numbers<[1], [0], [0], [1], [0, 0, 1, 1], [], []>} : vector<16x16xf32>, vector<16x8xf32>, vector<16x8xf32> -> vector<16x8xf32>
    %c0_137 = arith.constant 0 : index
    %c16_138 = arith.constant 16 : index
    %389 = vector.load %arg7[%c0_137, %c16_138] : memref<16x32xf32, #tpu.memory_space<vmem>>, vector<16x8xf32>
    tpu.vector_store %arg7[%c0_137, %c16_138], %388 {strides = array<i32>} : memref<16x32xf32, #tpu.memory_space<vmem>>, vector<16x8xf32>,
    %390 = vector.extract_strided_slice %339 {offsets = [0, 24], sizes = [16, 8], strides = [1, 1]} : vector<16x32xf32> to vector<16x8xf32>
    %391 = vector.extract_strided_slice %335 {offsets = [0, 24], sizes = [16, 8], strides = [1, 1]} : vector<16x32xf32> to vector<16x8xf32>
    %392 = vector.extract_strided_slice %344 {offsets = [24, 0], sizes = [8, 16], strides = [1, 1]} : vector<32x16xf32> to vector<8x16xf32>
    %cst_139 = arith.constant dense<0.000000e+00> : vector<16x16xf32>
    %393 = tpu.matmul %390, %392, %cst_139 {dimension_numbers = #tpu.dot_dimension_numbers<[1], [0], [0], [1], [0, 0, 1, 1], [], []>} : vector<16x8xf32>, vector<8x16xf32>, vector<16x16xf32> -> vector<16x16xf32>
    %cst_140 = arith.constant dense<0xFF800000> : vector<16xf32>
    %394 = vector.multi_reduction <maximumf>, %393, %cst_140 [1] : vector<16x16xf32> to vector<16xf32>
    %395 = vector.shape_cast %394 : vector<16xf32> to vector<16x1xf32>
    %396 = vector.broadcast %395 : vector<16x1xf32> to vector<16x16xf32>
    %397 = arith.subf %393, %396 : vector<16x16xf32>
    %398 = math.exp %397 : vector<16x16xf32>
    %cst_141 = arith.constant dense<0.000000e+00> : vector<16xf32>
    %399 = vector.multi_reduction <add>, %398, %cst_141 [1] : vector<16x16xf32> to vector<16xf32>
    %400 = vector.shape_cast %399 : vector<16xf32> to vector<16x1xf32>
    %401 = vector.broadcast %400 : vector<16x1xf32> to vector<16x16xf32>
    %402 = arith.divf %398, %401 : vector<16x16xf32>
    %cst_142 = arith.constant dense<0.000000e+00> : vector<16x8xf32>
    %403 = tpu.matmul %402, %391, %cst_142 {dimension_numbers = #tpu.dot_dimension_numbers<[1], [0], [0], [1], [0, 0, 1, 1], [], []>} : vector<16x16xf32>, vector<16x8xf32>, vector<16x8xf32> -> vector<16x8xf32>
    %c0_143 = arith.constant 0 : index
    %c24_144 = arith.constant 24 : index
    %404 = vector.load %arg7[%c0_143, %c24_144] : memref<16x32xf32, #tpu.memory_space<vmem>>, vector<16x8xf32>
    tpu.vector_store %arg7[%c0_143, %c24_144], %403 {strides = array<i32>} : memref<16x32xf32, #tpu.memory_space<vmem>>, vector<16x8xf32>,
    %c0_145 = arith.constant 0 : index
    %c0_146 = arith.constant 0 : index
    %405 = vector.load %arg7[%c0_145, %c0_146] : memref<16x32xf32, #tpu.memory_space<vmem>>, vector<16x32xf32>
    %c1_147 = arith.constant 1 : index
    %c40_148 = arith.constant 40 : index
    %c0_149 = arith.constant 0 : index
    %406 = vector.load %arg5[%c1_147, %c40_148, %c0_149] : memref<2x168x128xf32, #tpu.memory_space<vmem>>, vector<1x32x32xf32>
    %407 = vector.shape_cast %406 : vector<1x32x32xf32> to vector<32x32xf32>
    %cst_150 = arith.constant dense<0.000000e+00> : vector<16x32xf32>
    %408 = tpu.matmul %405, %407, %cst_150 {dimension_numbers = #tpu.dot_dimension_numbers<[1], [0], [0], [1], [0, 0, 1, 1], [], []>} : vector<16x32xf32>, vector<32x32xf32>, vector<16x32xf32> -> vector<16x32xf32>
    %409 = arith.addf %300, %408 : vector<16x32xf32>
    %410 = vector.extract_strided_slice %302 {offsets = [5, 0], sizes = [1, 32], strides = [1, 1]} : vector<8x128xf32> to vector<1x32xf32>
    %411 = vector.broadcast %410 : vector<1x32xf32> to vector<16x32xf32>
    %412 = arith.addf %409, %411 : vector<16x32xf32>
    %413 = vector.extract_strided_slice %302 {offsets = [2, 0], sizes = [1, 32], strides = [1, 1]} : vector<8x128xf32> to vector<1x32xf32>
    %414 = vector.extract_strided_slice %302 {offsets = [3, 0], sizes = [1, 32], strides = [1, 1]} : vector<8x128xf32> to vector<1x32xf32>
    %cst_151 = arith.constant dense<0.000000e+00> : vector<16xf32>
    %415 = vector.multi_reduction <add>, %412, %cst_151 [1] : vector<16x32xf32> to vector<16xf32>
    %416 = vector.shape_cast %415 : vector<16xf32> to vector<16x1xf32>
    %cst_152 = arith.constant 3.200000e+01 : f32
    %417 = vector.broadcast %cst_152 : f32 to vector<16x1xf32>
    %418 = arith.divf %416, %417 : vector<16x1xf32>
    %419 = vector.broadcast %418 : vector<16x1xf32> to vector<16x32xf32>
    %420 = arith.subf %412, %419 : vector<16x32xf32>
    %421 = arith.mulf %420, %420 : vector<16x32xf32>
    %cst_153 = arith.constant dense<0.000000e+00> : vector<16xf32>
    %422 = vector.multi_reduction <add>, %421, %cst_153 [1] : vector<16x32xf32> to vector<16xf32>
    %423 = vector.shape_cast %422 : vector<16xf32> to vector<16x1xf32>
    %cst_154 = arith.constant 3.200000e+01 : f32
    %424 = vector.broadcast %cst_154 : f32 to vector<16x1xf32>
    %425 = arith.divf %423, %424 : vector<16x1xf32>
    %426 = vector.broadcast %418 : vector<16x1xf32> to vector<16x32xf32>
    %427 = arith.subf %412, %426 : vector<16x32xf32>
    %cst_155 = arith.constant 9.99999974E-6 : f32
    %428 = vector.broadcast %cst_155 : f32 to vector<16x1xf32>
    %429 = arith.addf %425, %428 : vector<16x1xf32>
    %430 = math.rsqrt %429 : vector<16x1xf32>
    %431 = vector.broadcast %430 : vector<16x1xf32> to vector<16x32xf32>
    %432 = arith.mulf %427, %431 : vector<16x32xf32>
    %433 = vector.broadcast %413 : vector<1x32xf32> to vector<16x32xf32>
    %434 = arith.mulf %432, %433 : vector<16x32xf32>
    %435 = vector.broadcast %414 : vector<1x32xf32> to vector<16x32xf32>
    %436 = arith.addf %434, %435 : vector<16x32xf32>
    %c1_156 = arith.constant 1 : index
    %c72_157 = arith.constant 72 : index
    %c0_158 = arith.constant 0 : index
    %437 = vector.load %arg5[%c1_156, %c72_157, %c0_158] : memref<2x168x128xf32, #tpu.memory_space<vmem>>, vector<1x32x64xf32>
    %438 = vector.shape_cast %437 : vector<1x32x64xf32> to vector<32x64xf32>
    %cst_159 = arith.constant dense<0.000000e+00> : vector<16x64xf32>
    %439 = tpu.matmul %436, %438, %cst_159 {dimension_numbers = #tpu.dot_dimension_numbers<[1], [0], [0], [1], [0, 0, 1, 1], [], []>} : vector<16x32xf32>, vector<32x64xf32>, vector<16x64xf32> -> vector<16x64xf32>
    %440 = vector.extract_strided_slice %302 {offsets = [6, 0], sizes = [1, 64], strides = [1, 1]} : vector<8x128xf32> to vector<1x64xf32>
    %441 = vector.broadcast %440 : vector<1x64xf32> to vector<16x64xf32>
    %442 = arith.addf %439, %441 : vector<16x64xf32>
    %443 = arith.mulf %442, %442 : vector<16x64xf32>
    %444 = arith.mulf %442, %443 : vector<16x64xf32>
    %cst_160 = arith.constant 4.471500e-02 : f32
    %445 = vector.broadcast %cst_160 : f32 to vector<16x64xf32>
    %446 = arith.mulf %445, %444 : vector<16x64xf32>
    %447 = arith.addf %442, %446 : vector<16x64xf32>
    %cst_161 = arith.constant 0.797884583 : f32
    %448 = vector.broadcast %cst_161 : f32 to vector<16x64xf32>
    %449 = arith.mulf %448, %447 : vector<16x64xf32>
    %450 = math.tanh %449 : vector<16x64xf32>
    %cst_162 = arith.constant 1.000000e+00 : f32
    %451 = vector.broadcast %cst_162 : f32 to vector<16x64xf32>
    %452 = arith.addf %451, %450 : vector<16x64xf32>
    %cst_163 = arith.constant 5.000000e-01 : f32
    %453 = vector.broadcast %cst_163 : f32 to vector<16x64xf32>
    %454 = arith.mulf %453, %452 : vector<16x64xf32>
    %455 = arith.mulf %442, %454 : vector<16x64xf32>
    %c0_164 = arith.constant 0 : index
    %c1_165 = arith.constant 1 : index
    %c0_166 = arith.constant 0 : index
    %c0_167 = arith.constant 0 : index
    %456 = vector.load %arg3[%c0_164, %c1_165, %c0_166, %c0_167] : memref<1x2x16x64xf32, #tpu.memory_space<vmem>>, vector<1x1x16x64xf32>
    %457 = vector.shape_cast %456 : vector<1x1x16x64xf32> to vector<16x64xf32>
    %458 = arith.mulf %455, %457 : vector<16x64xf32>
    %c1_168 = arith.constant 1 : index
    %c104_169 = arith.constant 104 : index
    %c0_170 = arith.constant 0 : index
    %459 = vector.load %arg5[%c1_168, %c104_169, %c0_170] : memref<2x168x128xf32, #tpu.memory_space<vmem>>, vector<1x64x32xf32>
    %460 = vector.shape_cast %459 : vector<1x64x32xf32> to vector<64x32xf32>
    %cst_171 = arith.constant dense<0.000000e+00> : vector<16x32xf32>
    %461 = tpu.matmul %458, %460, %cst_171 {dimension_numbers = #tpu.dot_dimension_numbers<[1], [0], [0], [1], [0, 0, 1, 1], [], []>} : vector<16x64xf32>, vector<64x32xf32>, vector<16x32xf32> -> vector<16x32xf32>
    %462 = arith.addf %412, %461 : vector<16x32xf32>
    %463 = vector.extract_strided_slice %302 {offsets = [7, 0], sizes = [1, 32], strides = [1, 1]} : vector<8x128xf32> to vector<1x32xf32>
    %464 = vector.broadcast %463 : vector<1x32xf32> to vector<16x32xf32>
    %465 = arith.addf %462, %464 : vector<16x32xf32>
    %466 = vector.extract_strided_slice %3 {offsets = [6, 0], sizes = [1, 32], strides = [1, 1]} : vector<8x32xf32> to vector<1x32xf32>
    %467 = vector.extract_strided_slice %3 {offsets = [7, 0], sizes = [1, 32], strides = [1, 1]} : vector<8x32xf32> to vector<1x32xf32>
    %cst_172 = arith.constant dense<0.000000e+00> : vector<16xf32>
    %468 = vector.multi_reduction <add>, %465, %cst_172 [1] : vector<16x32xf32> to vector<16xf32>
    %469 = vector.shape_cast %468 : vector<16xf32> to vector<16x1xf32>
    %cst_173 = arith.constant 3.200000e+01 : f32
    %470 = vector.broadcast %cst_173 : f32 to vector<16x1xf32>
    %471 = arith.divf %469, %470 : vector<16x1xf32>
    %472 = vector.broadcast %471 : vector<16x1xf32> to vector<16x32xf32>
    %473 = arith.subf %465, %472 : vector<16x32xf32>
    %474 = arith.mulf %473, %473 : vector<16x32xf32>
    %cst_174 = arith.constant dense<0.000000e+00> : vector<16xf32>
    %475 = vector.multi_reduction <add>, %474, %cst_174 [1] : vector<16x32xf32> to vector<16xf32>
    %476 = vector.shape_cast %475 : vector<16xf32> to vector<16x1xf32>
    %cst_175 = arith.constant 3.200000e+01 : f32
    %477 = vector.broadcast %cst_175 : f32 to vector<16x1xf32>
    %478 = arith.divf %476, %477 : vector<16x1xf32>
    %479 = vector.broadcast %471 : vector<16x1xf32> to vector<16x32xf32>
    %480 = arith.subf %465, %479 : vector<16x32xf32>
    %cst_176 = arith.constant 9.99999974E-6 : f32
    %481 = vector.broadcast %cst_176 : f32 to vector<16x1xf32>
    %482 = arith.addf %478, %481 : vector<16x1xf32>
    %483 = math.rsqrt %482 : vector<16x1xf32>
    %484 = vector.broadcast %483 : vector<16x1xf32> to vector<16x32xf32>
    %485 = arith.mulf %480, %484 : vector<16x32xf32>
    %486 = vector.broadcast %466 : vector<1x32xf32> to vector<16x32xf32>
    %487 = arith.mulf %485, %486 : vector<16x32xf32>
    %488 = vector.broadcast %467 : vector<1x32xf32> to vector<16x32xf32>
    %489 = arith.addf %487, %488 : vector<16x32xf32>
    %c288 = arith.constant 288 : index
    %c0_177 = arith.constant 0 : index
    %490 = vector.load %arg4[%c288, %c0_177] : memref<320x128xf32, #tpu.memory_space<vmem>>, vector<32x128xf32>
    %cst_178 = arith.constant dense<0.000000e+00> : vector<16x128xf32>
    %491 = tpu.matmul %489, %490, %cst_178 {dimension_numbers = #tpu.dot_dimension_numbers<[1], [0], [0], [1], [0, 0, 1, 1], [], []>} : vector<16x32xf32>, vector<32x128xf32>, vector<16x128xf32> -> vector<16x128xf32>
    %c93 = arith.constant 93 : index
    %c0_179 = arith.constant 0 : index
    %492 = vector.load %arg4[%c93, %c0_179] : memref<320x128xf32, #tpu.memory_space<vmem>>, vector<1x128xf32>
    %493 = vector.broadcast %492 : vector<1x128xf32> to vector<16x128xf32>
    %494 = arith.addf %491, %493 : vector<16x128xf32>
    %c0_180 = arith.constant 0 : index
    %c0_181 = arith.constant 0 : index
    %c0_182 = arith.constant 0 : index
    %495 = vector.load %arg6[%c0_180, %c0_181, %c0_182] : memref<1x16x128xf32, #tpu.memory_space<vmem>>, vector<1x16x128xf32>
    %496 = vector.shape_cast %495 : vector<1x16x128xf32> to vector<16x128xf32>
    %497 = vector.shape_cast %494 : vector<16x128xf32> to vector<1x16x128xf32>
    tpu.vector_store %arg6[%c0_180, %c0_181, %c0_182], %497 {strides = array<i32>} : memref<1x16x128xf32, #tpu.memory_space<vmem>>, vector<1x16x128xf32>,
    return
  }
  func.func @transform_0(%arg0: i32) -> (i32, i32, i32) {
    %c0_i32 = arith.constant 0 : i32
    %c0_i32_0 = arith.constant 0 : i32
    %c0_i32_1 = arith.constant 0 : i32
    return %arg0, %c0_i32, %c0_i32_0 : i32, i32, i32
  }
  func.func @transform_1(%arg0: i32) -> (i32, i32, i32) {
    %c0_i32 = arith.constant 0 : i32
    %c0_i32_0 = arith.constant 0 : i32
    %c0_i32_1 = arith.constant 0 : i32
    return %arg0, %c0_i32, %c0_i32_0 : i32, i32, i32
  }
  func.func @transform_2(%arg0: i32) -> (i32, i32, i32, i32) {
    %c0_i32 = arith.constant 0 : i32
    %c0_i32_0 = arith.constant 0 : i32
    %c0_i32_1 = arith.constant 0 : i32
    %c0_i32_2 = arith.constant 0 : i32
    return %arg0, %c0_i32, %c0_i32_0, %c0_i32_1 : i32, i32, i32, i32
  }
  func.func @transform_3(%arg0: i32) -> (i32, i32) {
    %c0_i32 = arith.constant 0 : i32
    %c0_i32_0 = arith.constant 0 : i32
    %c0_i32_1 = arith.constant 0 : i32
    return %c0_i32, %c0_i32_0 : i32, i32
  }
  func.func @transform_4(%arg0: i32) -> (i32, i32, i32) {
    %c0_i32 = arith.constant 0 : i32
    %c0_i32_0 = arith.constant 0 : i32
    %c0_i32_1 = arith.constant 0 : i32
    %c0_i32_2 = arith.constant 0 : i32
    return %c0_i32, %c0_i32_0, %c0_i32_1 : i32, i32, i32
  }
  func.func @transform_5(%arg0: i32) -> (i32, i32, i32) {
    %c0_i32 = arith.constant 0 : i32
    %c0_i32_0 = arith.constant 0 : i32
    %c0_i32_1 = arith.constant 0 : i32
    return %arg0, %c0_i32, %c0_i32_0 : i32, i32, i32
  }
}

</mosaic_0001>

<bundles_post_ra>
// kernel: net_forward.1
= control target key start
LH: loop header
LB: loop body
LE: loop exit
PB: predicated region body
PF: predicated region fallthrough
CT: control target
= control target key end

     0   :  { %10 = vsyncpa [#allocation4], 0  ;;  %s4052_s0 = inlined_call_operand.vmem [shape: f32[2,8,32], index: 0, kind: input, shape index: {}]   ;;  %s4053_s1 = inlined_call_operand.vmem [shape: f32[2,1,8], index: 1, kind: input, shape index: {}]   ;;  %s4054_s2 = inlined_call_operand.vmem [shape: f32[2,2,16,64], index: 2, kind: input, shape index: {}]   ;;  %s4055_s3 = inlined_call_operand.vmem [shape: f32[320,128], index: 3, kind: input, shape index: {}]   ;;  %s4056_s4 = inlined_call_operand.vmem [shape: f32[2,168,128], index: 4, kind: input, shape index: {}]   ;;  %s4057_s5 = inlined_call_operand.hbm [shape: f32[2,16,128], index: 5, kind: output, shape index: {}]  }
   0x1   :  { %12 = vsyncpa [#allocation4 + $0x1], 0  ;;  %s3126_s18 = smov 0   ;;  %s3128_s19 = smov 0  }
   0x2   :  { %s3130_s20 = smov 0   ;;  %s3132_s21 = smov 0  }
   0x3 LB: > { %s3147_s22 = sadd.s32 4294967295, %s3077_s21   ;;  %s2663_s23 = sadd.s32 4294967294, %s3077_s21   ;;  %s3077_s21 = sphi %s3132_s21, %s4091_s21   ;;  %s3073_s20 = sphi %s3130_s20, %s4090_s20   ;;  %s3069_s19 = sphi %s3128_s19, %s4089_s19   ;;  %s3065_s18 = sphi %s3126_s18, %s4088_s18  }
   0x4   : > { %s3151_s24 = sadd.s32 1, %s3077_s21   ;;  %s145_s25 = sadd.s32 1, %s3073_s20 }
   0x5   : > { %s142_s26 = ssub.s32 %s3077_s21, %s3151_s24  ;;  %p155_p0 = scmp.ne.s32.totalorder %s3073_s20, %s3069_s19 }
   0x6   : > { %p143_p1 = scmp.eq.s32.totalorder %s142_s26, 0  ;;  %p156_p2 = scmp.eq.s32.totalorder %s3147_s22, 1 }
   0x7   : > { %p161_p3 = scmp.ne.s32.totalorder %s3069_s19, %s3065_s18  ;;  %p162_p4 = scmp.eq.s32.totalorder %s2663_s23, 1 }
   0x8   : > { %s3162_s27 = scalar_select %p143_p1, %s3073_s20, %s145_s25  }
   0x9   : > { %p3164_p5 = por %p156_p2, %p155_p0  ;;  %p3168_p6 = por %p162_p4, %p161_p3 }
   0xa   : > { %p2666_p7 = scmp.ge.s32.totalorder %s3077_s21, 1  ;;  %p207_p8 = scmp.lt.s32.totalorder %s3077_s21, 3 }
   0xc   : > { %p208_p9 = pnand %p2666_p7, %p207_p8 }
   0xd   : > { %p242_p10 = scmp.lt.s32.totalorder (!%p208_p9), %s3147_s22, 1  ;;  %s3080_s9 = smov (!%p208_p9), 96  }
   0xe   : > { %211 = sbr.rel (%p208_p9) target bundleno = 6580 (0x19b4), region = 40  ;;  %s3081_s12 = smov (!%p208_p9), 32  }
   0xf   : > { %s4068_s26 = smov (!%p208_p9), 88   ;;  %s3084_s30 = smov (!%p208_p9), 104  }
  0x10   : > { %s3085_s6 = smov (!%p208_p9), 120   ;;  %s4062_s10 = smov (!%p208_p9), 112  }
  0x11   : > { %s4058_s13 = smov (!%p208_p9), 40   ;;  %s4061_s14 = smov (!%p208_p9), 64  }
  0x12   : > { %s4060_s15 = smov (!%p208_p9), 48   ;;  %s4066_s16 = smov (!%p208_p9), 8  }
  0x13   : > { %vm258_vm0 = vcmask 261120   ;;  %v3178_v0 = vld [vmem:[%s4055_s3 + $0x8] sm:$0xff]  ;;  %s3183_s7 = scalar_select %p242_p10, %s3147_s22, 1  ;;  %v3193_v4 = vld [vmem:[%s4055_s3] sm:$0xff]  ;;  %v3079_v6 = vmov 32.0   ;;  %v380_v28 = vld [vmem:[%s4055_s3 + $0x98] sm:$0xff] }
  0x14   : > { %v262_v1 = vsel %vm258_vm0, %v3178_v0, 0.0  ;;  %v259_v5 = vsel %vm258_vm0, %v3193_v4, 0.0  ;;  %2892 = vrcp.f32 %v3079_v6  ;;  %398 = vmatpush.msra.mxu1 %v380_v28  ;;  %v379_v29 = vld [vmem:[%s4055_s3 + $0x90] sm:$0xff]  ;;  %v378_v30 = vld [vmem:[%s4055_s3 + $0x88] sm:$0xff]  ;;  %v377_v31 = vld [vmem:[%s4055_s3 + $0x80] sm:$0xff]  ;;  %vm442_vm11 = vcmask 64512  }
  0x15   : > { %263 = vadd.xlane.f32.xlu1 %v262_v1  ;;  %s2668_s8 = sshll.u32 %s3183_s7, 3  ;;  %v345_v32 = vld [vmem:[%s4055_s3 + $0x78] sm:$0xff]  ;;  %v344_v33 = vld [vmem:[%s4055_s3 + $0x70] sm:$0xff]  ;;  %v343_v36 = vld [vmem:[%s4055_s3 + $0x68] sm:$0xff]  ;;  %s248_s25 = scalar_lea.vmem %s4053_s1, %s3183_s7 }
  0x16   : > { %s245_s11 = scalar_lea.vmem %s4052_s0, %s2668_s8  ;;  %399 = vmatpush.msra.mxu1 %v379_v29  ;;  %366 = vmatpush.msra.mxu0 %v345_v32  ;;  %v342_v38 = vld [vmem:[%s4055_s3 + $0x60] sm:$0xff]  ;;  %v3245_v49 = vld [vmem:[%s4055_s3 + $0x50] sm:$0xff]  ;;  %s4064_s8 = smov 72  }
  0x17   : > { %v254_v2 = vld [vmem:[%s245_s11] sm:$0xff]  ;;  %v338_v54 = vperm.slane %v3245_v49, 2  ;;  %v340_v58 = vperm.slane %v3245_v49, 3  ;;  %s4059_s11 = smov 56   ;;  %s4070_s17 = smov 24  }
  0x18   : > { %v316_v3 = vsel %vm258_vm0, %v254_v2, 0.0  ;;  %400 = vmatpush.msra.mxu1 %v378_v30  ;;  %367 = vmatpush.msra.mxu0 %v344_v33  ;;  %s4072_s23 = smov 16  }
  0x19   : > { %317 = vadd.xlane.f32.xlu0 %v316_v3  ;;  %v310_v3 = vperm.slane %v3245_v49, 0 }
  0x1a   : > { %v2893_v7 = vpop.eup %2892  ;;  %401 = vmatpush.msra.mxu1 %v377_v31  ;;  %368 = vmatpush.msra.mxu0 %v343_v36 }
  0x1b   : > { %v266_v8 = vmul.f32 32.0, %v2893_v7  ;;  %vm270_vm1 = vweird.f32 %v2893_v7 }
  0x1c   : > { %369 = vmatpush.msra.mxu0 %v342_v38 }
  0x1d   : > { %v267_v9 = vsub.f32 1.0, %v266_v8  ;;  %v313_v8 = vperm.slane %v3245_v49, 1 }
  0x1f   : > { %v268_v10 = vmul.f32 %v2893_v7, %v267_v9 }
  0x21   : > { %260 = vadd.xlane.f32.xlu0 %v259_v5  ;;  %v269_v11 = vadd.f32 %v2893_v7, %v268_v10 }
  0x23   : > { %v3197_v12 = vsel %vm270_vm1, %v2893_v7, %v269_v11 }
  0x88   : > { %v264_v17 = vpop.xlane.xlu1 %263 }
  0x89   : > { %v273_v21 = vmul.f32 %v3197_v12, %v264_v17 }
  0x8b   : > { %v3207_v23 = vsub.f32 %v3178_v0, %v273_v21 }
  0x8c   : > { %v318_v13 = vpop.xlane.xlu0 %317 }
  0x8d   : > { %v319_v14 = vmul.f32 %v318_v13, %v3197_v12  ;;  %v277_v26 = vmul.f32 %v3207_v23, %v3207_v23 }
  0x8f   : > { %v320_v15 = vsub.f32 %v254_v2, %v319_v14  ;;  %v281_v27 = vsel %vm258_vm0, %v277_v26, 0.0 }
  0x91   : > { %v321_v16 = vmul.f32 %v320_v15, %v320_v15 }
  0x93   : > { %v322_v18 = vsel %vm258_vm0, %v321_v16, 0.0 }
  0x94   : > { %323 = vadd.xlane.f32.xlu1 %v322_v18  ;;  %v261_v19 = vpop.xlane.xlu0 %260 }
  0x95   : > { %v272_v20 = vmul.f32 %v3197_v12, %v261_v19  ;;  %v2885_v19 = vld [vmem:[%s4055_s3 + $0x5b] ss:$0 sm:$0xff] }
  0x97   : > { %v3204_v22 = vsub.f32 %v3193_v4, %v272_v20 }
  0x99   : > { %v276_v24 = vmul.f32 %v3204_v22, %v3204_v22 }
  0x9b   : > { %v278_v25 = vsel %vm258_vm0, %v276_v24, 0.0 }
  0x9c   : > { %279 = vadd.xlane.f32.xlu2 %v278_v25 }
  0xa4   : > { %282 = vadd.xlane.f32.xlu2 %v281_v27  ;;  %v2887_v27 = vld [vmem:[%s248_s25] ss:$0 sm:$0xff]  ;;  %s3082_s25 = smov 80  }
 0x107   : > { %v324_v34 = vpop.xlane.xlu1 %323 }
 0x108   : > { %v325_v35 = vmul.f32 %v324_v34, %v3197_v12 }
 0x10a   : > { %v326_v37 = vadd.f32 1e-05, %v325_v35 }
 0x10c   : > { %2894 = vrsqrt.f32 %v326_v37  ;;  %vm333_vm3 = vweird.f32 %v326_v37 }
 0x10f   : > { %v280_v39 = vpop.xlane.xlu2 %279 }
 0x110   : > { %v284_v40 = vmul.f32 %v280_v39, %v3197_v12 }
 0x112   : > { %v2895_v41 = vpop.eup %2894  ;;  %v286_v42 = vadd.f32 1e-05, %v284_v40 }
 0x113   : > { %v328_v43 = vmul.f32 %v2895_v41, %v326_v37  ;;  %vm334_vm2 = vweird.f32 %v2895_v41 }
 0x114   : > { %2896 = vrsqrt.f32 %v286_v42  ;;  %vm335_vm4 = vmor %vm333_vm3, %vm334_vm2  ;;  %vm294_vm6 = vweird.f32 %v286_v42 }
 0x115   : > { %v329_v44 = vmul.f32 %v2895_v41, %v328_v43 }
 0x117   : > { %v330_v45 = vmul.f32 0.5, %v329_v44  ;;  %v283_v46 = vpop.xlane.xlu2 %282 }
 0x118   : > { %v285_v47 = vmul.f32 %v283_v46, %v3197_v12  ;;  %v525_v46 = vld [vmem:[%s4055_s3 + $0xb0] sm:$0xff] }
 0x119   : > { %v331_v48 = vsub.f32 1.5, %v330_v45  ;;  %v526_v45 = vld [vmem:[%s4055_s3 + $0xb8] sm:$0xff] }
 0x11a   : > { %v2897_v50 = vpop.eup %2896  ;;  %v287_v51 = vadd.f32 1e-05, %v285_v47  ;;  %545 = vmatpush.msrb.mxu1 %v526_v45  ;;  %v524_v47 = vld [vmem:[%s4055_s3 + $0xa8] sm:$0xff] }
 0x11b   : > { %v332_v52 = vmul.f32 %v2895_v41, %v331_v48  ;;  %v289_v53 = vmul.f32 %v2897_v50, %v286_v42  ;;  %vm295_vm5 = vweird.f32 %v2897_v50 }
 0x11c   : > { %2898 = vrsqrt.f32 %v287_v51  ;;  %vm296_vm7 = vmor %vm294_vm6, %vm295_vm5  ;;  %vm304_vm8 = vweird.f32 %v287_v51  ;;  %546 = vmatpush.msrb.mxu1 %v525_v46 }
 0x11d   : > { %v336_v55 = vsel %vm335_vm4, %v2895_v41, %v332_v52  ;;  %v290_v56 = vmul.f32 %v2897_v50, %v289_v53 }
 0x11e   : > { %v337_v57 = vmul.f32 %v336_v55, %v320_v15  ;;  %547 = vmatpush.msrb.mxu1 %v524_v47 }
 0x11f   : > { %v291_v59 = vmul.f32 0.5, %v290_v56 }
 0x120   : > { %v339_v60 = vmul.f32 %v338_v54, %v337_v57 }
 0x121   : > { %v292_v61 = vsub.f32 1.5, %v291_v59 }
 0x122   : > { %v2899_v62 = vpop.eup %2898  ;;  %v341_v63 = vadd.f32 %v340_v58, %v339_v60 }
 0x123   : > { %v293_v1 = vmul.f32 %v2897_v50, %v292_v61  ;;  %v299_v2 = vmul.f32 %v2899_v62, %v287_v51  ;;  %vm305_vm9 = vweird.f32 %v2899_v62 }
 0x124   : > { %2673 = vmatmul.msk.f32.vlgmr.msra.gmra.mxu1 %vm258_vm0, %v341_v63  ;;  %vm306_vm10 = vmor %vm304_vm8, %vm305_vm9 }
 0x125   : > { %v297_v5 = vsel %vm296_vm7, %v2897_v50, %v293_v1  ;;  %v300_v6 = vmul.f32 %v2899_v62, %v299_v2 }
 0x126   : > { %v308_v7 = vmul.f32 %v297_v5, %v3204_v22  ;;  %v2886_v22 = vld [vmem:[%s4055_s3 + $0x58] ss:$0 sm:$0xff] }
 0x127   : > { %v301_v9 = vmul.f32 0.5, %v300_v6 }
 0x128   : > { %v311_v10 = vmul.f32 %v310_v3, %v308_v7 }
 0x129   : > { %v302_v11 = vsub.f32 1.5, %v301_v9 }
 0x12a   : > { %v314_v13 = vadd.f32 %v313_v8, %v311_v10 }
 0x12b   : > { %v303_v14 = vmul.f32 %v2899_v62, %v302_v11  ;;  %v523_v11 = vld [vmem:[%s4055_s3 + $0xa0] sm:$0xff] }
 0x12c   : > { %2671 = vmatmul.msk.f32.vlgmr.msra.gmra.mxu0 %vm258_vm0, %v314_v13  ;;  %548 = vmatpush.msrb.mxu1 %v523_v11 }
 0x12d   : > { %v307_v15 = vsel %vm306_vm10, %v2899_v62, %v303_v14 }
 0x12e   : > { %v309_v16 = vmul.f32 %v307_v15, %v3207_v23  ;;  %v2888_v15 = vld [vmem:[%s4055_s3 + $0x59] ss:$0 sm:$0xff] }
 0x130   : > { %v312_v17 = vmul.f32 %v310_v3, %v309_v16 }
 0x132   : > { %v315_v18 = vadd.f32 %v313_v8, %v312_v17 }
 0x134   : > { %2672 = vmatmul.msk.f32.gmra.mxu0 %vm258_vm0, %v315_v18 }
 0x1a1   : > { %v403_v20 = vpop.f32.mrf.mxu1 }
 0x1a2   : > { %v404_v21 = vadd.f32 %v2885_v19, %v403_v20 }
 0x1a4   : > { %2674 = vmatpush.xpose.msk.msra.mxu2 %vm258_vm0, %v404_v21 }
 0x1a9   : > { %v371_v23 = vpop.f32.mrf.mxu0 }
 0x1aa   : > { %v372_v24 = vadd.f32 %v2886_v22, %v371_v23 }
 0x1ac   : > { %2675 = vmatmul.msk.f32.vlgmr.msra.gmra.mxu2 %vm258_vm0, %v372_v24 }
 0x1b1   : > { %v374_v25 = vpop.f32.mrf.mxu0 }
 0x1b2   : > { %v375_v26 = vadd.f32 %v2886_v22, %v374_v25 }
 0x1b4   : > { %2676 = vmatmul.msk.f32.gmra.mxu2 %vm258_vm0, %v375_v26 }
 0x22f   : > { %v436_v28 = vpop.f32.mrf.mxu2 }
 0x230   : > { %v437_v29 = vadd.f32 %v2887_v27, %v436_v28 }
 0x232   : > { %v443_v30 = vsel %vm442_vm11, %v437_v29, -inf }
 0x233   : > { %444 = vmax.xlane.f32.xlu0 %v443_v30 }
 0x237   : > { %v439_v31 = vpop.f32.mrf.mxu2 }
 0x238   : > { %v440_v32 = vadd.f32 %v2887_v27, %v439_v31 }
 0x23a   : > { %v446_v33 = vsel %vm442_vm11, %v440_v32, -inf }
 0x23b   : > { %447 = vmax.xlane.f32.xlu1 %v446_v33  ;;  %v614_v33 = vld [vmem:[%s4055_s3 + $0xd0] sm:$0xff] }
 0x254   : > { %491 = vrot.lane.b32.xlu1 %v404_v21, %s3080_s9 }
 0x2a6   : > { %v445_v34 = vpop.xlane.xlu0 %444 }
 0x2a7   : > { %v449_v35 = vsub.f32 %v437_v29, %v445_v34  ;;  %v613_v34 = vld [vmem:[%s4055_s3 + $0xc8] sm:$0xff] }
 0x2a9   : > { %v451_v36 = vmul.f32 1.442695, %v449_v35  ;;  %v612_v35 = vld [vmem:[%s4055_s3 + $0xc0] sm:$0xff] }
 0x2ab   : > { %2900 = vpow2.f32 %v451_v36 }
 0x2ae   : > { %v448_v37 = vpop.xlane.xlu1 %447 }
 0x2af   : > { %v450_v38 = vsub.f32 %v440_v32, %v448_v37  ;;  %v615_v32 = vld [vmem:[%s4055_s3 + $0xd8] sm:$0xff] }
 0x2b1   : > { %v2901_v39 = vpop.eup %2900  ;;  %v453_v40 = vmul.f32 1.442695, %v450_v38 }
 0x2b2   : > { %v455_v41 = vsel %vm442_vm11, %v2901_v39, 0.0 }
 0x2b3   : > { %2902 = vpow2.f32 %v453_v40  ;;  %456 = vadd.xlane.f32.xlu2 %v455_v41 }
 0x2b9   : > { %v2903_v42 = vpop.eup %2902 }
 0x2ba   : > { %v458_v43 = vsel %vm442_vm11, %v2903_v42, 0.0 }
 0x2bb   : > { %459 = vadd.xlane.f32.xlu0 %v458_v43 }
 0x2c6   : > { %v492_v44 = vpop.permute.xlu1 %491 }
 0x2c7   : > { %515 = vmatpush.msra.mxu3 %v492_v44 }
 0x2c9   : > { %636 = vmatpush.msrb.mxu3 %v615_v32 }
 0x2cb   : > { %637 = vmatpush.msrb.mxu3 %v614_v33 }
 0x2cd   : > { %638 = vmatpush.msrb.mxu3 %v613_v34  ;;  %v2890_v34 = vld [vmem:[%s4055_s3 + $0x5a] ss:$0 sm:$0xff] }
 0x2cf   : > { %639 = vmatpush.msrb.mxu3 %v612_v35 }
 0x326   : > { %v457_v48 = vpop.xlane.xlu2 %456 }
 0x327   : > { %2904 = vrcp.f32 %v457_v48  ;;  %v472_v54 = vand.u32 2147483648, %v457_v48  ;;  %v470_v56 = vand.u32 2147483647, %v457_v48  ;;  %vm466_vm13 = vweird.f32 %v457_v48 }
 0x329   : > { %v473_v59 = vor.u32 1.1754944e-38, %v472_v54  ;;  %vm471_vm15 = vcmp.eq.f32.partialorder %v470_v56, 8.507059e+37 }
 0x32d   : > { %v2905_v50 = vpop.eup %2904 }
 0x32e   : > { %v462_v51 = vmul.f32 %v2905_v50, %v457_v48  ;;  %v460_v52 = vpop.xlane.xlu0 %459  ;;  %vm467_vm12 = vweird.f32 %v2905_v50 }
 0x32f   : > { %2906 = vrcp.f32 %v460_v52  ;;  %vm468_vm14 = vmor %vm466_vm13, %vm467_vm12  ;;  %v487_v2 = vand.u32 2147483648, %v460_v52  ;;  %v485_v5 = vand.u32 2147483647, %v460_v52  ;;  %vm481_vm2 = vweird.f32 %v460_v52 }
 0x330   : > { %v463_v53 = vsub.f32 1.0, %v462_v51  ;;  %v606_v51 = vperm.slane %v3245_v49, 4  ;;  %vm673_vm12 = vcmask 523264  }
 0x331   : > { %v488_v7 = vor.u32 1.1754944e-38, %v487_v2  ;;  %vm486_vm4 = vcmp.eq.f32.partialorder %v485_v5, 8.507059e+37  ;;  %v671_v2 = vld [vmem:[%s4055_s3 + $0x110] sm:$0xff]  ;;  %v669_v5 = vld [vmem:[%s4055_s3 + $0x100] sm:$0xff] }
 0x332   : > { %v464_v55 = vmul.f32 %v2905_v50, %v463_v53 }
 0x334   : > { %v465_v57 = vadd.f32 %v2905_v50, %v464_v55  ;;  %v609_v55 = vperm.slane %v3245_v49, 5  ;;  %v672_v49 = vld [vmem:[%s4055_s3 + $0x118] sm:$0xff] }
 0x335   : > { %v2907_v58 = vpop.eup %2906  ;;  %688 = vmatpush.msrb.mxu2 %v672_v49 }
 0x336   : > { %v477_v60 = vmul.f32 %v2907_v58, %v460_v52  ;;  %v469_v61 = vsel %vm468_vm14, %v2905_v50, %v465_v57  ;;  %vm482_vm1 = vweird.f32 %v2907_v58 }
 0x337   : > { %v474_v62 = vsel %vm471_vm15, %v473_v59, %v469_v61  ;;  %vm483_vm3 = vmor %vm481_vm2, %vm482_vm1  ;;  %689 = vmatpush.msrb.mxu2 %v671_v2 }
 0x338   : > { %v478_v63 = vsub.f32 1.0, %v477_v60  ;;  %v475_v1 = vmul.f32 %v2901_v39, %v474_v62 }
 0x33a   : > { %v479_v3 = vmul.f32 %v2907_v58, %v478_v63  ;;  %2677 = vmatmul.msk.f32.vlgmr.msra.gmra.mxu3 %vm442_vm11, %v475_v1 }
 0x33c   : > { %v480_v6 = vadd.f32 %v2907_v58, %v479_v3  ;;  %v670_v3 = vld [vmem:[%s4055_s3 + $0x108] sm:$0xff] }
 0x33d   : > { %690 = vmatpush.msrb.mxu2 %v670_v3 }
 0x33e   : > { %v484_v8 = vsel %vm483_vm3, %v2907_v58, %v480_v6  ;;  %v668_v6 = vld [vmem:[%s4055_s3 + $0xf8] sm:$0xff] }
 0x33f   : > { %v489_v9 = vsel %vm486_vm4, %v488_v7, %v484_v8  ;;  %691 = vmatpush.msrb.mxu2 %v669_v5  ;;  %v667_v7 = vld [vmem:[%s4055_s3 + $0xf0] sm:$0xff]  ;;  %v666_v8 = vld [vmem:[%s4055_s3 + $0xe8] sm:$0xff]  ;;  %vm929_vm4 = vcmask 130048  }
 0x340   : > { %v490_v10 = vmul.f32 %v2903_v42, %v489_v9  ;;  %v665_v9 = vld [vmem:[%s4055_s3 + $0xe0] sm:$0xff] }
 0x341   : > { %692 = vmatpush.msrb.mxu2 %v668_v6  ;;  %v3406_v6 = vld [vmem:[%s4056_s4] sm:$0xff] }
 0x342   : > { %2678 = vmatmul.msk.f32.gmra.mxu3 %vm442_vm11, %v490_v10  ;;  %v2889_v10 = vld [vmem:[%s4055_s3 + $0x5c] ss:$0 sm:$0xff] }
 0x343   : > { %693 = vmatpush.msrb.mxu2 %v667_v7 }
 0x345   : > { %694 = vmatpush.msrb.mxu2 %v666_v8 }
 0x347   : > { %695 = vmatpush.msrb.mxu2 %v665_v9 }
 0x3bd   : > { %v517_v13 = vpop.f32.mrf.mxu3 }
 0x3be   : > { %2679 = vmatmul.msk.f32.vlgmr.msrb.gmra.mxu1 %vm258_vm0, %v517_v13 }
 0x3c5   : > { %v520_v14 = vpop.f32.mrf.mxu3 }
 0x3c6   : > { %2680 = vmatmul.msk.f32.gmra.mxu1 %vm258_vm0, %v520_v14 }
 0x43b   : > { %v550_v16 = vpop.f32.mrf.mxu1 }
 0x43c   : > { %v556_v17 = vadd.f32 %v550_v16, %v3193_v4 }
 0x43e   : > { %v3294_v18 = vadd.f32 %v2888_v15, %v556_v17 }
 0x440   : > { %v562_v19 = vsel %vm258_vm0, %v3294_v18, 0.0 }
 0x441   : > { %563 = vadd.xlane.f32.xlu2 %v562_v19 }
 0x443   : > { %v553_v20 = vpop.f32.mrf.mxu1 }
 0x444   : > { %v557_v21 = vadd.f32 %v553_v20, %v3178_v0 }
 0x446   : > { %v3299_v22 = vadd.f32 %v2888_v15, %v557_v21 }
 0x448   : > { %v565_v23 = vsel %vm258_vm0, %v3299_v22, 0.0 }
 0x449   : > { %566 = vadd.xlane.f32.xlu0 %v565_v23 }
 0x4b4   : > { %v564_v24 = vpop.xlane.xlu2 %563 }
 0x4b5   : > { %v568_v25 = vmul.f32 %v564_v24, %v3197_v12 }
 0x4b7   : > { %v570_v4 = vsub.f32 %v3294_v18, %v568_v25 }
 0x4b9   : > { %v572_v26 = vmul.f32 %v570_v4, %v570_v4 }
 0x4bb   : > { %v574_v27 = vsel %vm258_vm0, %v572_v26, 0.0 }
 0x4bc   : > { %575 = vadd.xlane.f32.xlu2 %v574_v27  ;;  %v567_v28 = vpop.xlane.xlu0 %566 }
 0x4bd   : > { %v569_v29 = vmul.f32 %v567_v28, %v3197_v12 }
 0x4bf   : > { %v571_v0 = vsub.f32 %v3299_v22, %v569_v29 }
 0x4c1   : > { %v573_v30 = vmul.f32 %v571_v0, %v571_v0 }
 0x4c3   : > { %v577_v31 = vsel %vm258_vm0, %v573_v30, 0.0 }
 0x4c4   : > { %578 = vadd.xlane.f32.xlu0 %v577_v31 }
 0x52f   : > { %v576_v36 = vpop.xlane.xlu2 %575 }
 0x530   : > { %v580_v37 = vmul.f32 %v576_v36, %v3197_v12 }
 0x532   : > { %v582_v38 = vadd.f32 1e-05, %v580_v37 }
 0x534   : > { %2908 = vrsqrt.f32 %v582_v38  ;;  %vm590_vm6 = vweird.f32 %v582_v38 }
 0x537   : > { %v579_v39 = vpop.xlane.xlu0 %578 }
 0x538   : > { %v581_v40 = vmul.f32 %v579_v39, %v3197_v12 }
 0x53a   : > { %v2909_v41 = vpop.eup %2908  ;;  %v583_v42 = vadd.f32 1e-05, %v581_v40 }
 0x53b   : > { %v585_v43 = vmul.f32 %v2909_v41, %v582_v38  ;;  %vm591_vm5 = vweird.f32 %v2909_v41 }
 0x53c   : > { %2910 = vrsqrt.f32 %v583_v42  ;;  %vm592_vm7 = vmor %vm590_vm6, %vm591_vm5  ;;  %vm600_vm9 = vweird.f32 %v583_v42 }
 0x53d   : > { %v586_v44 = vmul.f32 %v2909_v41, %v585_v43 }
 0x53f   : > { %v587_v45 = vmul.f32 0.5, %v586_v44 }
 0x541   : > { %v588_v46 = vsub.f32 1.5, %v587_v45 }
 0x542   : > { %v2911_v47 = vpop.eup %2910 }
 0x543   : > { %v589_v48 = vmul.f32 %v2909_v41, %v588_v46  ;;  %v595_v50 = vmul.f32 %v2911_v47, %v583_v42  ;;  %vm601_vm8 = vweird.f32 %v2911_v47 }
 0x544   : > { %vm602_vm10 = vmor %vm600_vm9, %vm601_vm8 }
 0x545   : > { %v593_v52 = vsel %vm592_vm7, %v2909_v41, %v589_v48  ;;  %v596_v53 = vmul.f32 %v2911_v47, %v595_v50 }
 0x546   : > { %v604_v54 = vmul.f32 %v593_v52, %v570_v4  ;;  %v771_v52 = vld [vmem:[%s4056_s4 + $0x20] sm:$0xff] }
 0x547   : > { %v597_v56 = vmul.f32 0.5, %v596_v53  ;;  %791 = vmatpush.msrb.mxu0 %v771_v52  ;;  %v770_v53 = vld [vmem:[%s4056_s4 + $0x18] sm:$0xff] }
 0x548   : > { %v607_v57 = vmul.f32 %v606_v51, %v604_v54  ;;  %v769_v54 = vld [vmem:[%s4056_s4 + $0x10] sm:$0xff] }
 0x549   : > { %v598_v58 = vsub.f32 1.5, %v597_v56  ;;  %792 = vmatpush.msrb.mxu0 %v770_v53 }
 0x54a   : > { %v610_v59 = vadd.f32 %v609_v55, %v607_v57 }
 0x54b   : > { %v599_v60 = vmul.f32 %v2911_v47, %v598_v58  ;;  %793 = vmatpush.msrb.mxu0 %v769_v54 }
 0x54c   : > { %2681 = vmatmul.msk.f32.vlgmr.msrb.gmra.mxu3 %vm258_vm0, %v610_v59  ;;  %v3391_v59 = vld [vmem:[%s4055_s3 + $0x48] sm:$0xff] }
 0x54d   : > { %v603_v61 = vsel %vm602_vm10, %v2911_v47, %v599_v60  ;;  %v3396_v60 = vld [vmem:[%s4055_s3 + $0x40] sm:$0xff]  ;;  %822 = vmatpush.msra.mxu1 %v3391_v59  ;;  %867 = vmatpush.msra.mxu3 %v3391_v59 }
 0x54e   : > { %v605_v62 = vmul.f32 %v603_v61, %v571_v0 }
 0x54f   : > { %823 = vmatpush.msra.mxu1 %v3396_v60  ;;  %868 = vmatpush.msra.mxu3 %v3396_v60 }
 0x550   : > { %v608_v63 = vmul.f32 %v606_v51, %v605_v62 }
 0x552   : > { %v611_v1 = vadd.f32 %v609_v55, %v608_v63  ;;  %v768_v55 = vld [vmem:[%s4056_s4 + $0x8] sm:$0xff] }
 0x553   : > { %794 = vmatpush.msrb.mxu0 %v768_v55 }
 0x554   : > { %2682 = vmatmul.msk.f32.gmra.mxu3 %vm258_vm0, %v611_v1 }
 0x5cf   : > { %v641_v11 = vpop.f32.mrf.mxu3 }
 0x5d0   : > { %v642_v13 = vadd.f32 %v2889_v10, %v641_v11 }
 0x5d2   : > { %v647_v14 = vmul.f32 %v642_v13, %v642_v13 }
 0x5d4   : > { %v649_v15 = vmul.f32 %v647_v14, %v642_v13 }
 0x5d6   : > { %v651_v16 = vmul.f32 0.044715, %v649_v15  ;;  %v765_v15 = vperm.slane %v3406_v6, 1 }
 0x5d7   : > { %v644_v17 = vpop.f32.mrf.mxu3 }
 0x5d8   : > { %v653_v19 = vadd.f32 %v651_v16, %v642_v13  ;;  %v645_v20 = vadd.f32 %v2889_v10, %v644_v17  ;;  %v762_v10 = vperm.slane %v3406_v6, 0 }
 0x5da   : > { %v655_v21 = vmul.f32 0.7978846, %v653_v19  ;;  %v648_v23 = vmul.f32 %v645_v20, %v645_v20 }
 0x5dc   : > { %2912 = vtanh.f32 %v655_v21  ;;  %v650_v24 = vmul.f32 %v648_v23, %v645_v20 }
 0x5de   : > { %v652_v25 = vmul.f32 0.044715, %v650_v24 }
 0x5e0   : > { %v654_v4 = vadd.f32 %v652_v25, %v645_v20 }
 0x5e2   : > { %v2913_v26 = vpop.eup %2912  ;;  %v656_v27 = vmul.f32 0.7978846, %v654_v4 }
 0x5e3   : > { %v659_v28 = vadd.f32 1.0, %v2913_v26  ;;  %v3415_v26 = vld [vmem:[%s4055_s3 + $0x38] sm:$0xff] }
 0x5e4   : > { %2914 = vtanh.f32 %v656_v27  ;;  %824 = vmatpush.msra.mxu1 %v3415_v26  ;;  %869 = vmatpush.msra.mxu3 %v3415_v26  ;;  %v3422_v27 = vld [vmem:[%s4055_s3 + $0x30] sm:$0xff] }
 0x5e5   : > { %v661_v29 = vmul.f32 0.5, %v659_v28  ;;  %v772_v28 = vperm.slane %v3406_v6, 4 }
 0x5e6   : > { %825 = vmatpush.msra.mxu1 %v3422_v27  ;;  %870 = vmatpush.msra.mxu3 %v3422_v27 }
 0x5e7   : > { %v663_v0 = vmul.f32 %v661_v29, %v642_v13 }
 0x5e9   : > { %2683 = vmatmul.msk.f32.vlgmr.msrb.gmra.mxu2 %vm673_vm12, %v663_v0 }
 0x5ea   : > { %v2915_v30 = vpop.eup %2914 }
 0x5eb   : > { %v660_v31 = vadd.f32 1.0, %v2915_v30 }
 0x5ed   : > { %v662_v32 = vmul.f32 0.5, %v660_v31  ;;  %v710_v31 = vld [vmem:[%s4055_s3 + $0x18] sm:$0xff] }
 0x5ef   : > { %v664_v33 = vmul.f32 %v662_v32, %v645_v20 }
 0x5f1   : > { %2684 = vmatmul.msk.f32.gmra.mxu2 %vm673_vm12, %v664_v33  ;;  %v709_v33 = vld [vmem:[%s4055_s3 + $0x10] sm:$0xff] }
 0x66c   : > { %v697_v35 = vpop.f32.mrf.mxu2 }
 0x66d   : > { %v703_v36 = vadd.f32 %v697_v35, %v3294_v18 }
 0x66f   : > { %v3360_v37 = vadd.f32 %v2890_v34, %v703_v36 }
 0x671   : > { %v718_v38 = vsel %vm258_vm0, %v3360_v37, 0.0 }
 0x672   : > { %719 = vadd.xlane.f32.xlu2 %v718_v38  ;;  %v712_v38 = vld [vmem:[%s4055_s3 + $0x28] sm:$0xff] }
 0x674   : > { %v700_v39 = vpop.f32.mrf.mxu2 }
 0x675   : > { %v704_v40 = vadd.f32 %v700_v39, %v3299_v22 }
 0x677   : > { %v3365_v41 = vadd.f32 %v2890_v34, %v704_v40 }
 0x679   : > { %v721_v42 = vsel %vm258_vm0, %v3365_v41, 0.0 }
 0x67a   : > { %722 = vadd.xlane.f32.xlu0 %v721_v42  ;;  %v711_v42 = vld [vmem:[%s4055_s3 + $0x20] sm:$0xff] }
 0x6e5   : > { %v720_v43 = vpop.xlane.xlu2 %719 }
 0x6e6   : > { %v724_v44 = vmul.f32 %v720_v43, %v3197_v12 }
 0x6e8   : > { %v726_v18 = vsub.f32 %v3360_v37, %v724_v44 }
 0x6ea   : > { %v728_v45 = vmul.f32 %v726_v18, %v726_v18 }
 0x6ec   : > { %v730_v46 = vsel %vm258_vm0, %v728_v45, 0.0 }
 0x6ed   : > { %731 = vadd.xlane.f32.xlu2 %v730_v46  ;;  %v723_v47 = vpop.xlane.xlu0 %722 }
 0x6ee   : > { %v725_v48 = vmul.f32 %v723_v47, %v3197_v12 }
 0x6f0   : > { %v727_v22 = vsub.f32 %v3365_v41, %v725_v48 }
 0x6f2   : > { %v729_v50 = vmul.f32 %v727_v22, %v727_v22 }
 0x6f4   : > { %v733_v51 = vsel %vm258_vm0, %v729_v50, 0.0 }
 0x6f5   : > { %734 = vadd.xlane.f32.xlu1 %v733_v51 }
 0x760   : > { %v732_v56 = vpop.xlane.xlu2 %731 }
 0x761   : > { %v736_v57 = vmul.f32 %v732_v56, %v3197_v12 }
 0x763   : > { %v738_v58 = vadd.f32 1e-05, %v736_v57 }
 0x765   : > { %2916 = vrsqrt.f32 %v738_v58  ;;  %vm746_vm14 = vweird.f32 %v738_v58 }
 0x768   : > { %v735_v61 = vpop.xlane.xlu1 %734 }
 0x769   : > { %v737_v62 = vmul.f32 %v735_v61, %v3197_v12 }
 0x76b   : > { %v2917_v63 = vpop.eup %2916  ;;  %v739_v1 = vadd.f32 1e-05, %v737_v62 }
 0x76c   : > { %v741_v49 = vmul.f32 %v2917_v63, %v738_v58  ;;  %vm747_vm13 = vweird.f32 %v2917_v63 }
 0x76d   : > { %2918 = vrsqrt.f32 %v739_v1  ;;  %vm748_vm15 = vmor %vm746_vm14, %vm747_vm13  ;;  %vm756_vm2 = vweird.f32 %v739_v1 }
 0x76e   : > { %v742_v2 = vmul.f32 %v2917_v63, %v741_v49 }
 0x770   : > { %v743_v3 = vmul.f32 0.5, %v742_v2 }
 0x772   : > { %v744_v5 = vsub.f32 1.5, %v743_v3 }
 0x773   : > { %v2919_v7 = vpop.eup %2918 }
 0x774   : > { %v745_v8 = vmul.f32 %v2917_v63, %v744_v5  ;;  %v751_v9 = vmul.f32 %v2919_v7, %v739_v1  ;;  %vm757_vm1 = vweird.f32 %v2919_v7 }
 0x775   : > { %vm758_vm3 = vmor %vm756_vm2, %vm757_vm1 }
 0x776   : > { %v749_v11 = vsel %vm748_vm15, %v2917_v63, %v745_v8  ;;  %v752_v13 = vmul.f32 %v2919_v7, %v751_v9 }
 0x777   : > { %v760_v14 = vmul.f32 %v749_v11, %v726_v18 }
 0x778   : > { %v753_v16 = vmul.f32 0.5, %v752_v13 }
 0x779   : > { %v763_v17 = vmul.f32 %v762_v10, %v760_v14 }
 0x77a   : > { %v754_v19 = vsub.f32 1.5, %v753_v16 }
 0x77b   : > { %v766_v20 = vadd.f32 %v765_v15, %v763_v17 }
 0x77c   : > { %v755_v21 = vmul.f32 %v2919_v7, %v754_v19 }
 0x77d   : > { %2685 = vmatmul.msk.f32.vlgmr.msrb.gmra.mxu0 %vm258_vm0, %v766_v20 }
 0x77e   : > { %v759_v23 = vsel %vm758_vm3, %v2919_v7, %v755_v21 }
 0x77f   : > { %v761_v24 = vmul.f32 %v759_v23, %v727_v22 }
 0x781   : > { %v764_v25 = vmul.f32 %v762_v10, %v761_v24 }
 0x783   : > { %v767_v4 = vadd.f32 %v765_v15, %v764_v25 }
 0x785   : > { %2686 = vmatmul.msk.f32.gmra.mxu0 %vm258_vm0, %v767_v4 }
 0x7fa   : > { %v796_v29 = vpop.f32.mrf.mxu0 }
 0x7fb   : > { %v3427_v0 = vadd.f32 %v796_v29, %v772_v28 }
 0x7fd   : > { %2687 = vmatmul.msk.f32.vlgmr.msra.gmra.mxu1 %vm258_vm0, %v3427_v0  ;;  %847 = vrot.lane.b32.xlu0 %v3427_v0, %s3080_s9  ;;  %v802_v53 = vmul.f32 %v3427_v0, %v709_v33 }
 0x802   : > { %v799_v30 = vpop.f32.mrf.mxu0 }
 0x803   : > { %v3436_v32 = vadd.f32 %v799_v30, %v772_v28 }
 0x805   : > { %841 = vrot.lane.b32.xlu0 %v710_v31, %s3081_s12  ;;  %849 = vrot.lane.b32.xlu2 %v3436_v32, %s3080_s9  ;;  %v803_v57 = vmul.f32 %v3436_v32, %v710_v31 }
 0x806   : > { %2688 = vmatmul.msk.f32.gmra.mxu1 %vm258_vm0, %v3436_v32 }
 0x80d   : > { %839 = vrot.lane.b32.xlu0 %v709_v33, %s3081_s12 }
 0x85f   : > { %v850_v35 = vpop.permute.xlu2 %849 }
 0x86f   : > { %v848_v34 = vpop.permute.xlu0 %847 }
 0x870   : > { %2689 = vmatmul.msk.f32.vlgmr.msra.gmra.mxu3 %vm258_vm0, %v848_v34  ;;  %v3507_v34 = vpack.i.bf16 %v3427_v0, %v3436_v32 }
 0x877   : > { %v3457_v44 = vpop.permute.xlu0 %841 }
 0x878   : > { %2690 = vmatmul.msk.f32.gmra.mxu3 %vm258_vm0, %v850_v35  ;;  %v846_v18 = vmul.f32 %v3457_v44, %v3436_v32 }
 0x87a   : > { %v827_v22 = vpop.f32.mrf.mxu1 }
 0x87b   : > { %v833_v52 = vmul.f32 %v827_v22, %v711_v42 }
 0x87d   : > { %v835_v54 = vadd.f32 %v833_v52, %v802_v53 }
 0x87f   : > { %v3462_v47 = vpop.permute.xlu0 %839 }
 0x880   : > { %v845_v48 = vmul.f32 %v3462_v47, %v3427_v0 }
 0x883   : > { %v830_v55 = vpop.f32.mrf.mxu1 }
 0x884   : > { %v834_v56 = vmul.f32 %v830_v55, %v712_v38 }
 0x886   : > { %v836_v58 = vadd.f32 %v834_v56, %v803_v57 }
 0x8f3   : > { %v872_v36 = vpop.f32.mrf.mxu3 }
 0x8f4   : > { %v878_v43 = vmul.f32 %v872_v36, %v711_v42 }
 0x8fb   : > { %v875_v39 = vpop.f32.mrf.mxu3 }
 0x8fc   : > { %v879_v40 = vmul.f32 %v875_v39, %v712_v38 }
 0x8fe   : > { %884 = vrot.lane.b32.xlu2 %v879_v40, %s3081_s12 }
 0x906   : > { %882 = vrot.lane.b32.xlu2 %v878_v43, %s3081_s12 }
 0x958   : > { %v885_v45 = vpop.permute.xlu2 %884 }
 0x959   : > { %v889_v46 = vadd.f32 %v885_v45, %v846_v18 }
 0x95b   : > { %894 = vrot.lane.b32.xlu1 %v889_v46, %s3080_s9 }
 0x960   : > { %v883_v50 = vpop.permute.xlu2 %882 }
 0x961   : > { %v888_v51 = vadd.f32 %v883_v50, %v845_v48 }
 0x963   : > { %1152 = vrot.lane.b32.xlu1 %v888_v51, %s3082_s25  ;;  %1019 = vrot.lane.b32.xlu0 %v888_v51, %s4068_s26 }
 0x964   : > { %892 = vrot.lane.b32.xlu2 %v888_v51, %s3080_s9 }
 0x96b   : > { %1281 = vrot.lane.b32.xlu1 %v835_v54, %s3084_s30  ;;  %1021 = vrot.lane.b32.xlu0 %v889_v46, %s4068_s26  ;;  %s4078_s26 = smov 112  }
 0x96c   : > { %1015 = vrot.lane.b32.xlu2 %v835_v54, %s3085_s6 }
 0x973   : > { %1017 = vrot.lane.b32.xlu0 %v836_v58, %s3085_s6 }
 0x974   : > { %1154 = vrot.lane.b32.xlu2 %v889_v46, %s3082_s25 }
 0x97b   : > { %1287 = vrot.lane.b32.xlu0 %v889_v46, %s4064_s8 }
 0x97c   : > { %1285 = vrot.lane.b32.xlu2 %v888_v51, %s4064_s8 }
 0x983   : > { %1148 = vrot.lane.b32.xlu0 %v835_v54, %s4062_s10 }
 0x984   : > { %1150 = vrot.lane.b32.xlu2 %v836_v58, %s4062_s10  ;;  %s4086_s10 = smov 16  }
 0x98b   : > { %1283 = vrot.lane.b32.xlu0 %v836_v58, %s3084_s30 }
 0x9be   : > { %v893_v61 = vpop.permute.xlu2 %892 }
 0x9c6   : > { %v1016_v62 = vpop.permute.xlu2 %1015 }
 0x9cd   : > { %v895_v63 = vpop.permute.xlu1 %894 }
 0x9ce   : > { %2691 = vmatpush.xpose.msk.msra.mxu2 %vm442_vm11, %v895_v63  ;;  %v1155_v1 = vpop.permute.xlu2 %1154 }
 0x9d2   : > { %2692 = vmatpush.xpose.msk.msra.mxu2 %vm442_vm11, %v893_v61 }
 0x9d5   : > { %v1153_v49 = vpop.permute.xlu1 %1152  ;;  %v1020_v2 = vpop.permute.xlu0 %1019  ;;  %2693 = vmatmul.msk.f32.vlgmr.msra.gmra.mxu2 %vm442_vm11, %v835_v54 }
 0x9d6   : > { %2703 = vmatpush.xpose.msk.msrb.mxu2 %vm442_vm11, %v1155_v1  ;;  %v1286_v8 = vpop.permute.xlu2 %1285 }
 0x9da   : > { %2704 = vmatpush.xpose.msk.msrb.mxu2 %vm442_vm11, %v1153_v49 }
 0x9dd   : > { %v1022_v3 = vpop.permute.xlu0 %1021  ;;  %2694 = vmatmul.msk.f32.gmra.mxu2 %vm442_vm11, %v836_v58  ;;  %v1282_v9 = vpop.permute.xlu1 %1281 }
 0x9de   : > { %2697 = vmatpush.xpose.msk.msrb.mxu1 %vm442_vm11, %v1022_v3  ;;  %v1151_v11 = vpop.permute.xlu2 %1150 }
 0x9e2   : > { %2698 = vmatpush.xpose.msk.msrb.mxu1 %vm442_vm11, %v1020_v2 }
 0x9e5   : > { %v1018_v5 = vpop.permute.xlu0 %1017  ;;  %2699 = vmatmul.msk.f32.vlgmr.msrb.gmra.mxu1 %vm442_vm11, %v1016_v62 }
 0x9ed   : > { %v1288_v7 = vpop.permute.xlu0 %1287  ;;  %2700 = vmatmul.msk.f32.gmra.mxu1 %vm442_vm11, %v1018_v5 }
 0x9ee   : > { %2709 = vmatpush.xpose.msk.msra.mxu1 %vm442_vm11, %v1288_v7 }
 0x9f2   : > { %2710 = vmatpush.xpose.msk.msra.mxu1 %vm442_vm11, %v1286_v8 }
 0x9f5   : > { %v1149_v10 = vpop.permute.xlu0 %1148  ;;  %2711 = vmatmul.msk.f32.vlgmr.msra.gmra.mxu1 %vm442_vm11, %v1282_v9 }
 0x9f6   : > { %2705 = vmatmul.msk.f32.vlgmr.msrb.gmra.mxu2 %vm442_vm11, %v1149_v10 }
 0x9fd   : > { %v1284_v13 = vpop.permute.xlu0 %1283 }
 0x9fe   : > { %2706 = vmatmul.msk.f32.gmra.mxu2 %vm442_vm11, %v1151_v11  ;;  %2712 = vmatmul.msk.f32.gmra.mxu1 %vm442_vm11, %v1284_v13 }
 0xa58   : > { %v923_v14 = vpop.f32.mrf.mxu2 }
 0xa59   : > { %v930_v15 = vsel %vm929_vm4, %v923_v14, -inf }
 0xa5a   : > { %931 = vmax.xlane.f32.xlu2 %v930_v15 }
 0xa60   : > { %v926_v19 = vpop.f32.mrf.mxu2 }
 0xa61   : > { %v933_v21 = vsel %vm929_vm4, %v926_v19, -inf }
 0xa62   : > { %v1048_v16 = vpop.f32.mrf.mxu1 }
 0xa63   : > { %v1054_v17 = vsel %vm929_vm4, %v1048_v16, -inf }
 0xa64   : > { %1055 = vmax.xlane.f32.xlu1 %v1054_v17 }
 0xa6a   : > { %v1051_v20 = vpop.f32.mrf.mxu1 }
 0xa6b   : > { %v1057_v23 = vsel %vm929_vm4, %v1051_v20, -inf }
 0xa6c   : > { %934 = vmax.xlane.f32.xlu1 %v933_v21  ;;  %1058 = vmax.xlane.f32.xlu0 %v1057_v23 }
 0xa72   : > { %v1314_v24 = vpop.f32.mrf.mxu1 }
 0xa73   : > { %v1320_v25 = vsel %vm929_vm4, %v1314_v24, -inf }
 0xa74   : > { %1321 = vmax.xlane.f32.xlu2 %v1320_v25 }
 0xa79   : > { %v1181_v4 = vpop.f32.mrf.mxu2 }
 0xa7a   : > { %v1187_v28 = vsel %vm929_vm4, %v1181_v4, -inf }
 0xa7b   : > { %1188 = vmax.xlane.f32.xlu0 %v1187_v28  ;;  %v1317_v29 = vpop.f32.mrf.mxu1 }
 0xa7c   : > { %v1323_v30 = vsel %vm929_vm4, %v1317_v29, -inf }
 0xa7d   : > { %1324 = vmax.xlane.f32.xlu1 %v1323_v30 }
 0xa81   : > { %v1184_v31 = vpop.f32.mrf.mxu2 }
 0xa82   : > { %v1190_v33 = vsel %vm929_vm4, %v1184_v31, -inf }
 0xa83   : > { %1191 = vmax.xlane.f32.xlu2 %v1190_v33 }
 0xa9b   : > { %2846 = vrot.lane.b32.xlu2 %v3507_v34, %s4059_s11  ;;  %s4087_s11 = smov 24  }
 0xacd   : > { %v932_v35 = vpop.xlane.xlu2 %931 }
 0xace   : > { %v936_v36 = vsub.f32 %v923_v14, %v932_v35 }
 0xad0   : > { %v938_v38 = vmul.f32 1.442695, %v936_v36 }
 0xad2   : > { %2920 = vpow2.f32 %v938_v38 }
 0xad7   : > { %v1056_v39 = vpop.xlane.xlu1 %1055 }
 0xad8   : > { %v3511_v40 = vpop.eup %2920  ;;  %v1060_v42 = vsub.f32 %v1048_v16, %v1056_v39 }
 0xad9   : > { %v942_v43 = vsel %vm929_vm4, %v3511_v40, 0.0 }
 0xada   : > { %v1062_v18 = vmul.f32 1.442695, %v1060_v42  ;;  %943 = vadd.xlane.f32.xlu1 %v942_v43 }
 0xadc   : > { %2922 = vpow2.f32 %v1062_v18 }
 0xadf   : > { %v935_v0 = vpop.xlane.xlu1 %934  ;;  %v1059_v32 = vpop.xlane.xlu0 %1058 }
 0xae0   : > { %v937_v45 = vsub.f32 %v926_v19, %v935_v0  ;;  %v1061_v46 = vsub.f32 %v1051_v20, %v1059_v32 }
 0xae2   : > { %v3515_v48 = vpop.eup %2922  ;;  %v940_v22 = vmul.f32 1.442695, %v937_v45  ;;  %v1064_v50 = vmul.f32 1.442695, %v1061_v46 }
 0xae3   : > { %v1066_v51 = vsel %vm929_vm4, %v3515_v48, 0.0 }
 0xae4   : > { %2924 = vpow2.f32 %v940_v22  ;;  %1067 = vadd.xlane.f32.xlu0 %v1066_v51 }
 0xae5   : > { %2926 = vpow2.f32 %v1064_v50 }
 0xae7   : > { %v1322_v52 = vpop.xlane.xlu2 %1321 }
 0xae8   : > { %v1326_v53 = vsub.f32 %v1314_v24, %v1322_v52 }
 0xaea   : > { %v3519_v54 = vpop.eup %2924  ;;  %v1328_v55 = vmul.f32 1.442695, %v1326_v53 }
 0xaeb   : > { %v3521_v56 = vpop.eup %2926  ;;  %v945_v57 = vsel %vm929_vm4, %v3519_v54, 0.0 }
 0xaec   : > { %2928 = vpow2.f32 %v1328_v55  ;;  %946 = vadd.xlane.f32.xlu0 %v945_v57  ;;  %v1069_v58 = vsel %vm929_vm4, %v3521_v56, 0.0 }
 0xaed   : > { %1070 = vadd.xlane.f32.xlu2 %v1069_v58 }
 0xaee   : > { %v1189_v61 = vpop.xlane.xlu0 %1188 }
 0xaef   : > { %v1193_v62 = vsub.f32 %v1181_v4, %v1189_v61 }
 0xaf0   : > { %v1325_v63 = vpop.xlane.xlu1 %1324 }
 0xaf1   : > { %v1195_v1 = vmul.f32 1.442695, %v1193_v62  ;;  %v1327_v49 = vsub.f32 %v1317_v29, %v1325_v63 }
 0xaf2   : > { %v3527_v2 = vpop.eup %2928 }
 0xaf3   : > { %2930 = vpow2.f32 %v1195_v1  ;;  %v1332_v3 = vsel %vm929_vm4, %v3527_v2, 0.0  ;;  %v1330_v5 = vmul.f32 1.442695, %v1327_v49 }
 0xaf4   : > { %1333 = vadd.xlane.f32.xlu1 %v1332_v3 }
 0xaf5   : > { %2932 = vpow2.f32 %v1330_v5 }
 0xaf6   : > { %v1192_v7 = vpop.xlane.xlu2 %1191 }
 0xaf7   : > { %v1194_v9 = vsub.f32 %v1184_v31, %v1192_v7 }
 0xaf9   : > { %v3531_v8 = vpop.eup %2930  ;;  %v1197_v11 = vmul.f32 1.442695, %v1194_v9 }
 0xafa   : > { %v1199_v10 = vsel %vm929_vm4, %v3531_v8, 0.0 }
 0xafb   : > { %1200 = vadd.xlane.f32.xlu0 %v1199_v10  ;;  %v3535_v14 = vpop.eup %2932  ;;  %2934 = vpow2.f32 %v1197_v11 }
 0xafc   : > { %v1335_v17 = vsel %vm929_vm4, %v3535_v14, 0.0 }
 0xafe   : > { %v2847_v13 = vpop.permute.xlu2 %2846 }
 0xaff   : > { %v2848_v15 = vunpack.i.l.bf16 %v2847_v13  ;;  %v2849_v16 = vunpack.i.h.bf16 %v2847_v13 }
 0xb01   : > { %1128 = vmatpush.msrb.mxu3 %v2848_v15  ;;  %v3541_v19 = vpop.eup %2934 }
 0xb02   : > { %v1202_v20 = vsel %vm929_vm4, %v3541_v19, 0.0 }
 0xb03   : > { %1336 = vadd.xlane.f32.xlu0 %v1335_v17  ;;  %1129 = vmatpush.msrb.mxu3 %v2849_v16 }
 0xb05   : > { %2856 = vrot.lane.b32.xlu2 %v3507_v34, %s4058_s13 }
 0xb0b   : > { %1203 = vadd.xlane.f32.xlu0 %v1202_v20 }
 0xb0d   : > { %2851 = vrot.lane.b32.xlu1 %v3507_v34, %s4061_s14  ;;  %s239_s14 = sand.u32 1, %s3069_s19  }
 0xb1f   : > { %2861 = vrot.lane.b32.xlu0 %v3507_v34, %s4060_s15  ;;  %s2667_s15 = sshll.u32 %s239_s14, 4 }
 0xb4d   : > { %v3549_v24 = vpop.xlane.xlu1 %943 }
 0xb57   : > { %v1068_v21 = vpop.xlane.xlu0 %1067 }
 0xb58   : > { %2936 = vrcp.f32 %v1068_v21  ;;  %v1083_v29 = vand.u32 2147483648, %v1068_v21  ;;  %v1081_v31 = vand.u32 2147483647, %v1068_v21  ;;  %vm1077_vm6 = vweird.f32 %v1068_v21 }
 0xb5a   : > { %v1084_v35 = vor.u32 1.1754944e-38, %v1083_v29  ;;  %vm1082_vm8 = vcmp.eq.f32.partialorder %v1081_v31, 8.507059e+37 }
 0xb5e   : > { %v2937_v23 = vpop.eup %2936 }
 0xb5f   : > { %v1073_v25 = vmul.f32 %v2937_v23, %v1068_v21  ;;  %vm1078_vm5 = vweird.f32 %v2937_v23  ;;  %v3552_v34 = vpop.xlane.xlu0 %946 }
 0xb60   : > { %v1071_v4 = vpop.xlane.xlu2 %1070  ;;  %vm1079_vm7 = vmor %vm1077_vm6, %vm1078_vm5  ;;  %vm953_vm6 = vweird.f32 %v3549_v24 }
 0xb61   : > { %v1074_v28 = vsub.f32 1.0, %v1073_v25  ;;  %2938 = vrcp.f32 %v1071_v4  ;;  %v1098_v22 = vand.u32 2147483648, %v1071_v4  ;;  %v1096_v52 = vand.u32 2147483647, %v1071_v4 }
 0xb62   : > { %2940 = vrcp.f32 %v3549_v24  ;;  %vm1092_vm10 = vweird.f32 %v1071_v4 }
 0xb63   : > { %v1075_v30 = vmul.f32 %v2937_v23, %v1074_v28  ;;  %vm1097_vm14 = vcmp.eq.f32.partialorder %v1096_v52, 8.507059e+37  ;;  %v957_v28 = vand.u32 2147483647, %v3549_v24  ;;  %v972_v52 = vand.u32 2147483647, %v3552_v34 }
 0xb65   : > { %v1076_v33 = vadd.f32 %v2937_v23, %v1075_v30 }
 0xb67   : > { %v2939_v36 = vpop.eup %2938  ;;  %v1080_v38 = vsel %vm1079_vm7, %v2937_v23, %v1076_v33  ;;  %v1334_v39 = vpop.xlane.xlu1 %1333 }
 0xb68   : > { %v1085_v42 = vsel %vm1082_vm8, %v1084_v35, %v1080_v38  ;;  %v1088_v43 = vmul.f32 %v2939_v36, %v1071_v4  ;;  %2942 = vrcp.f32 %v1334_v39  ;;  %v2857_v18 = vpop.permute.xlu2 %2856  ;;  %v3554_v0 = vpop.eup %2940  ;;  %vm1093_vm9 = vweird.f32 %v2939_v36 }
 0xb69   : > { %v2858_v45 = vunpack.i.l.bf16 %v2857_v18  ;;  %v1086_v46 = vmul.f32 %v3515_v48, %v1085_v42  ;;  %2944 = vrcp.f32 %v3552_v34  ;;  %v2859_v51 = vunpack.i.h.bf16 %v2857_v18  ;;  %vm1094_vm13 = vmor %vm1092_vm10, %vm1093_vm9 }
 0xb6a   : > { %v1089_v32 = vsub.f32 1.0, %v1088_v43  ;;  %v949_v53 = vmul.f32 %v3554_v0, %v3549_v24  ;;  %v1099_v48 = vor.u32 1.1754944e-38, %v1098_v22  ;;  %v1349_v5 = vand.u32 2147483648, %v1334_v39 }
 0xb6b   : > { %1394 = vmatpush.msra.mxu3 %v2858_v45  ;;  %v1347_v10 = vand.u32 2147483647, %v1334_v39  ;;  %vm1343_vm1 = vweird.f32 %v1334_v39  ;;  %vm954_vm5 = vweird.f32 %v3554_v0  ;;  %v959_v4 = vand.u32 2147483648, %v3549_v24 }
 0xb6c   : > { %v1090_v50 = vmul.f32 %v2939_v36, %v1089_v32  ;;  %2701 = vmatmul.msk.f32.vlgmr.msrb.gmra.mxu3 %vm929_vm4, %v1086_v46  ;;  %v950_v1 = vsub.f32 1.0, %v949_v53  ;;  %v1350_v16 = vor.u32 1.1754944e-38, %v1349_v5  ;;  %vm955_vm7 = vmor %vm953_vm6, %vm954_vm5  ;;  %vm958_vm8 = vcmp.eq.f32.partialorder %v957_v28, 8.507059e+37 }
 0xb6d   : > { %1395 = vmatpush.msra.mxu3 %v2859_v51  ;;  %vm1348_vm3 = vcmp.eq.f32.partialorder %v1347_v10, 8.507059e+37  ;;  %v960_v35 = vor.u32 1.1754944e-38, %v959_v4  ;;  %v974_v18 = vand.u32 2147483648, %v3552_v34 }
 0xb6e   : > { %v2943_v55 = vpop.eup %2942  ;;  %v3561_v57 = vpop.xlane.xlu0 %1200  ;;  %v1091_v58 = vadd.f32 %v2939_v36, %v1090_v50  ;;  %v951_v11 = vmul.f32 %v3554_v0, %v950_v1 }
 0xb6f   : > { %v1339_v61 = vmul.f32 %v2943_v55, %v1334_v39  ;;  %v3563_v63 = vpop.eup %2944  ;;  %vm1344_vm15 = vweird.f32 %v2943_v55  ;;  %2946 = vrcp.f32 %v3561_v57  ;;  %vm1210_vm6 = vweird.f32 %v3561_v57 }
 0xb70   : > { %v1095_v62 = vsel %vm1094_vm13, %v2939_v36, %v1091_v58  ;;  %v964_v13 = vmul.f32 %v3563_v63, %v3552_v34  ;;  %vm1345_vm2 = vmor %vm1343_vm1, %vm1344_vm15  ;;  %v952_v21 = vadd.f32 %v3554_v0, %v951_v11  ;;  %vm969_vm9 = vweird.f32 %v3563_v63 }
 0xb71   : > { %v1340_v49 = vsub.f32 1.0, %v1339_v61  ;;  %v1100_v3 = vsel %vm1097_vm14, %v1099_v48, %v1095_v62  ;;  %vm968_vm13 = vweird.f32 %v3552_v34  ;;  %v975_v61 = vor.u32 1.1754944e-38, %v974_v18 }
 0xb72   : > { %v1101_v7 = vmul.f32 %v3521_v56, %v1100_v3  ;;  %v965_v23 = vsub.f32 1.0, %v964_v13  ;;  %v956_v31 = vsel %vm955_vm7, %v3554_v0, %v952_v21  ;;  %vm970_vm15 = vmor %vm968_vm13, %vm969_vm9  ;;  %v1214_v10 = vand.u32 2147483647, %v3561_v57 }
 0xb73   : > { %v1341_v9 = vmul.f32 %v2943_v55, %v1340_v49  ;;  %v961_v39 = vsel %vm958_vm8, %v960_v35, %v956_v31 }
 0xb74   : > { %2702 = vmatmul.msk.f32.gmra.mxu3 %vm929_vm4, %v1101_v7  ;;  %v966_v33 = vmul.f32 %v3563_v63, %v965_v23  ;;  %v962_v51 = vmul.f32 %v3511_v40, %v961_v39  ;;  %vm1215_vm8 = vcmp.eq.f32.partialorder %v1214_v10, 8.507059e+37  ;;  %v1416_v39 = vld [vmem:[%s4056_s4 + $0x28] sm:$0xff]  ;;  %v1506_v10 = vld [vmem:[%s4056_s4 + $0x58] sm:$0xff] }
 0xb75   : > { %v1342_v15 = vadd.f32 %v2943_v55, %v1341_v9  ;;  %v3577_v29 = vpop.eup %2946  ;;  %v1216_v9 = vand.u32 2147483648, %v3561_v57 }
 0xb76   : > { %v1337_v17 = vpop.xlane.xlu0 %1336  ;;  %v967_v32 = vadd.f32 %v3563_v63, %v966_v33  ;;  %vm1211_vm5 = vweird.f32 %v3577_v29 }
 0xb77   : > { %v1346_v20 = vsel %vm1345_vm2, %v2943_v55, %v1342_v15  ;;  %2948 = vrcp.f32 %v1337_v17  ;;  %v1364_v0 = vand.u32 2147483648, %v1337_v17  ;;  %v1362_v22 = vand.u32 2147483647, %v1337_v17  ;;  %vm1212_vm7 = vmor %vm1210_vm6, %vm1211_vm5 }
 0xb78   : > { %v1351_v56 = vsel %vm1348_vm3, %v1350_v16, %v1346_v20  ;;  %vm1358_vm14 = vweird.f32 %v1337_v17  ;;  %v971_v48 = vsel %vm970_vm15, %v3563_v63, %v967_v32  ;;  %vm973_vm3 = vcmp.eq.f32.partialorder %v972_v52, 8.507059e+37 }
 0xb79   : > { %v1352_v25 = vmul.f32 %v3527_v2, %v1351_v56  ;;  %v1206_v2 = vmul.f32 %v3577_v29, %v3561_v57  ;;  %v1365_v58 = vor.u32 1.1754944e-38, %v1364_v0  ;;  %vm1363_vm2 = vcmp.eq.f32.partialorder %v1362_v22, 8.507059e+37 }
 0xb7a   : > { %v976_v3 = vsel %vm973_vm3, %v975_v61, %v971_v48  ;;  %v1217_v13 = vor.u32 1.1754944e-38, %v1216_v9  ;;  %vm1145_vm15 = vcmask 130112   ;;  %v1507_v9 = vld [vmem:[%s4056_s4 + $0x60] sm:$0xff] }
 0xb7b   : > { %v1207_v50 = vsub.f32 1.0, %v1206_v2  ;;  %v977_v63 = vmul.f32 %v3519_v54, %v976_v3  ;;  %v1418_v2 = vld [vmem:[%s4056_s4 + $0x38] sm:$0xff] }
 0xb7c   : > { %2713 = vmatmul.msk.f32.vlgmr.msra.gmra.mxu3 %vm929_vm4, %v1352_v25 }
 0xb7d   : > { %v2949_v30 = vpop.eup %2948  ;;  %v1208_v1 = vmul.f32 %v3577_v29, %v1207_v50  ;;  %v1451_v50 = vperm.slane %v3406_v6, 5 }
 0xb7e   : > { %v1354_v36 = vmul.f32 %v2949_v30, %v1337_v17  ;;  %v3582_v38 = vpop.xlane.xlu0 %1203  ;;  %vm1359_vm10 = vweird.f32 %v2949_v30 }
 0xb7f   : > { %2950 = vrcp.f32 %v3582_v38  ;;  %v2852_v24 = vpop.permute.xlu1 %2851  ;;  %vm1360_vm1 = vmor %vm1358_vm14, %vm1359_vm10  ;;  %v1209_v5 = vadd.f32 %v3577_v29, %v1208_v1  ;;  %v1231_v54 = vand.u32 2147483648, %v3582_v38  ;;  %vm1225_vm10 = vweird.f32 %v3582_v38 }
 0xb80   : > { %v1355_v42 = vsub.f32 1.0, %v1354_v36  ;;  %v2853_v43 = vunpack.i.l.bf16 %v2852_v24  ;;  %v2854_v46 = vunpack.i.h.bf16 %v2852_v24  ;;  %v1229_v21 = vand.u32 2147483647, %v3582_v38  ;;  %v1417_v24 = vld [vmem:[%s4056_s4 + $0x30] sm:$0xff] }
 0xb81   : > { %v1232_v25 = vor.u32 1.1754944e-38, %v1231_v54 }
 0xb82   : > { %v1356_v45 = vmul.f32 %v2949_v30, %v1355_v42  ;;  %1004 = vmatpush.msra.mxu0 %v2853_v43  ;;  %vm1230_vm14 = vcmp.eq.f32.partialorder %v1229_v21, 8.507059e+37 }
 0xb84   : > { %1005 = vmatpush.msra.mxu0 %v2854_v46  ;;  %v1357_v53 = vadd.f32 %v2949_v30, %v1356_v45 }
 0xb85   : > { %v2951_v55 = vpop.eup %2950  ;;  %2695 = vmatmul.msk.f32.vlgmr.msra.gmra.mxu0 %vm929_vm4, %v962_v51 }
 0xb86   : > { %v1361_v62 = vsel %vm1360_vm1, %v2949_v30, %v1357_v53  ;;  %v1221_v40 = vmul.f32 %v2951_v55, %v3582_v38  ;;  %vm1226_vm9 = vweird.f32 %v2951_v55  ;;  %v1419_v38 = vld [vmem:[%s4056_s4 + $0x40] sm:$0xff]  ;;  %vm1278_vm1 = vcmask 195712  }
 0xb87   : > { %v1366_v49 = vsel %vm1363_vm2, %v1365_v58, %v1361_v62  ;;  %vm1227_vm13 = vmor %vm1225_vm10, %vm1226_vm9  ;;  %1438 = vmatpush.msra.mxu2 %v1419_v38  ;;  %vm1411_vm2 = vcmask 261312  }
 0xb88   : > { %v1367_v34 = vmul.f32 %v3535_v14, %v1366_v49  ;;  %v1222_v7 = vsub.f32 1.0, %v1221_v40  ;;  %v1213_v14 = vsel %vm1212_vm7, %v3577_v29, %v1209_v5 }
 0xb89   : > { %v1218_v16 = vsel %vm1215_vm8, %v1217_v13, %v1213_v14  ;;  %1439 = vmatpush.msra.mxu2 %v1418_v2  ;;  %v1505_v14 = vld [vmem:[%s4056_s4 + $0x50] sm:$0xff] }
 0xb8a   : > { %2714 = vmatmul.msk.f32.gmra.mxu3 %vm929_vm4, %v1367_v34  ;;  %v1223_v11 = vmul.f32 %v2951_v55, %v1222_v7  ;;  %v1219_v57 = vmul.f32 %v3531_v8, %v1218_v16 }
 0xb8b   : > { %1440 = vmatpush.msra.mxu2 %v1417_v24  ;;  %v1567_v24 = vld [vmem:[%s4056_s4 + $0xa0] sm:$0xff] }
 0xb8c   : > { %v1224_v20 = vadd.f32 %v2951_v55, %v1223_v11  ;;  %v1504_v11 = vld [vmem:[%s4056_s4 + $0x48] sm:$0xff]  ;;  %1582 = vmatpush.msrb.mxu1 %v1567_v24 }
 0xb8d   : > { %2696 = vmatmul.msk.f32.gmra.mxu0 %vm929_vm4, %v977_v63  ;;  %1441 = vmatpush.msra.mxu2 %v1416_v39  ;;  %v1566_v39 = vld [vmem:[%s4056_s4 + $0x98] sm:$0xff] }
 0xb8e   : > { %v1228_v23 = vsel %vm1227_vm13, %v2951_v55, %v1224_v20  ;;  %1583 = vmatpush.msrb.mxu1 %v1566_v39 }
 0xb8f   : > { %v1233_v4 = vsel %vm1230_vm14, %v1232_v25, %v1228_v23  ;;  %1708 = vmatpush.msrb.mxu2 %v3391_v59  ;;  %v1501_v25 = vperm.slane %v3406_v6, 3 }
 0xb90   : > { %v1234_v28 = vmul.f32 %v3541_v19, %v1233_v4 }
 0xb91   : > { %v2862_v15 = vpop.permute.xlu0 %2861  ;;  %1709 = vmatpush.msrb.mxu2 %v3396_v60 }
 0xb92   : > { %v2863_v17 = vunpack.i.l.bf16 %v2862_v15  ;;  %v2864_v56 = vunpack.i.h.bf16 %v2862_v15 }
 0xb93   : > { %1710 = vmatpush.msrb.mxu2 %v3415_v26 }
 0xb94   : > { %1261 = vmatpush.msrb.mxu0 %v2863_v17 }
 0xb95   : > { %1711 = vmatpush.msrb.mxu2 %v3422_v27 }
 0xb96   : > { %1262 = vmatpush.msrb.mxu0 %v2864_v56 }
 0xb97   : > { %2707 = vmatmul.msk.f32.vlgmr.msrb.gmra.mxu0 %vm929_vm4, %v1219_v57 }
 0xb98   : > { %1527 = vmatpush.msra.mxu0 %v1507_v9 }
 0xb9a   : > { %1528 = vmatpush.msra.mxu0 %v1506_v10 }
 0xb9c   : > { %1529 = vmatpush.msra.mxu0 %v1505_v14 }
 0xb9e   : > { %1530 = vmatpush.msra.mxu0 %v1504_v11 }
 0xb9f   : > { %2708 = vmatmul.msk.f32.gmra.mxu0 %vm929_vm4, %v1234_v28 }
 0xba0   : > { %1745 = vmatpush.msrb.mxu0 %v3391_v59  ;;  %v1498_v59 = vperm.slane %v3406_v6, 2 }
 0xba2   : > { %1746 = vmatpush.msrb.mxu0 %v3396_v60 }
 0xba4   : > { %1747 = vmatpush.msrb.mxu0 %v3415_v26 }
 0xba6   : > { %1748 = vmatpush.msrb.mxu0 %v3422_v27 }
 0xbef   : > { %v1131_v29 = vpop.f32.mrf.mxu3 }
 0xbf0   : > { %1139 = vrot.lane.b32.xlu1 %v1131_v29, %s4066_s16 }
 0xbf7   : > { %v1134_v30 = vpop.f32.mrf.mxu3 }
 0xbff   : > { %v1397_v8 = vpop.f32.mrf.mxu3 }
 0xc00   : > { %1405 = vrot.lane.b32.xlu1 %v1397_v8, %s4070_s17 }
 0xc02   : > { %v1007_v31 = vpop.f32.mrf.mxu0 }
 0xc03   : > { %1013 = vst.msk [vmem:[#allocation2] sm:$0xff] %vm442_vm11, %v1007_v31 }
 0xc0a   : > { %v1010_v33 = vpop.f32.mrf.mxu0 }
 0xc0b   : > { %1014 = vst.msk [vmem:[#allocation2 + $0x8] sm:$0xff] %vm442_vm11, %v1010_v33 }
 0xc0d   : > { %v1400_v36 = vpop.f32.mrf.mxu3 }
 0xc14   : > { %v1264_v35 = vpop.f32.mrf.mxu0 }
 0xc15   : > { %1272 = vrot.lane.b32.xlu2 %v1264_v35, %s4072_s23 }
 0xc1c   : > { %v1267_v19 = vpop.f32.mrf.mxu0 }
 0xc1d   : > { %1141 = vrot.lane.b32.xlu2 %v1134_v30, %s4066_s16  ;;  %1274 = vrot.lane.b32.xlu1 %v1267_v19, %s4072_s23  ;;  %s2787_s23 = sshll.u32 %s3183_s7, 5  ;;  %s4077_s16 = smov 72  }
 0xc1e   : > { %s3716_s8 = scalar_lea.vmem %s4054_s2, %s2787_s23  ;;  %s4076_s23 = smov 88  }
 0xc1f   : > { %s4085_s7 = smov 8  }
 0xc25   : > { %1407 = vrot.lane.b32.xlu2 %v1400_v36, %s4070_s17 }
 0xc62   : > { %v1140_v42 = vpop.permute.xlu1 %1139 }
 0xc63   : > { %1146 = vst.msk [vmem:[#allocation2] sm:$0xff] %vm1145_vm15, %v1140_v42  ;;  %v1565_v42 = vld [vmem:[%s4056_s4 + $0x90] sm:$0xff] }
 0xc64   : > { %1584 = vmatpush.msrb.mxu1 %v1565_v42 }
 0xc6f   : > { %v1273_v43 = vpop.permute.xlu2 %1272 }
 0xc70   : > { %1279 = vst.msk [vmem:[#allocation2] sm:$0xff] %vm1278_vm1, %v1273_v43  ;;  %v1564_v43 = vld [vmem:[%s4056_s4 + $0x88] sm:$0xff] }
 0xc71   : > { %1585 = vmatpush.msrb.mxu1 %v1564_v43 }
 0xc72   : > { %v1406_v18 = vpop.permute.xlu1 %1405 }
 0xc73   : > { %1412 = vst.msk [vmem:[#allocation2] sm:$0xff] %vm1411_vm2, %v1406_v18  ;;  %v1563_v18 = vld [vmem:[%s4056_s4 + $0x80] sm:$0xff] }
 0xc74   : > { %1586 = vmatpush.msrb.mxu1 %v1563_v18 }
 0xc77   : > { %v1142_v0 = vpop.permute.xlu2 %1141 }
 0xc78   : > { %1147 = vst.msk [vmem:[#allocation2 + $0x8] sm:$0xff] %vm1145_vm15, %v1142_v0  ;;  %v1562_v0 = vld [vmem:[%s4056_s4 + $0x78] sm:$0xff] }
 0xc79   : > { %1587 = vmatpush.msrb.mxu1 %v1562_v0  ;;  %v3754_v0 = vld [vmem:[%s4056_s4 + $0xa8] sm:$0xff] }
 0xc7a   : > { %v1414_v32 = vld [vmem:[#allocation2] sm:$0xff] }
 0xc7b   : > { %2715 = vmatmul.msk.f32.vlgmr.msra.gmra.mxu2 %vm258_vm0, %v1414_v32  ;;  %v1561_v32 = vld [vmem:[%s4056_s4 + $0x70] sm:$0xff] }
 0xc7c   : > { %1588 = vmatpush.msrb.mxu1 %v1561_v32 }
 0xc7f   : > { %v1408_v46 = vpop.permute.xlu2 %1407 }
 0xc8f   : > { %v1275_v45 = vpop.permute.xlu1 %1274 }
 0xc90   : > { %1280 = vst.msk [vmem:[#allocation2 + $0x8] sm:$0xff] %vm1278_vm1, %v1275_v45  ;;  %v1560_v45 = vld [vmem:[%s4056_s4 + $0x68] sm:$0xff] }
 0xc91   : > { %1413 = vst.msk [vmem:[#allocation2 + $0x8] sm:$0xff] %vm1411_vm2, %v1408_v46  ;;  %1589 = vmatpush.msrb.mxu1 %v1560_v45  ;;  %v3008_v46 = vld [vmem:[%s4056_s4] sm:$0xff] }
 0xc98   : > { %v1415_v22 = vld [vmem:[#allocation2 + $0x8] sm:$0xff] }
 0xc99   : > { %2716 = vmatmul.msk.f32.gmra.mxu2 %vm258_vm0, %v1415_v22  ;;  %v1508_v22 = vperm.slane %v3008_v46, 6 }
 0xcfe   : > { %v1443_v51 = vpop.f32.mrf.mxu2 }
 0xcff   : > { %v1449_v52 = vadd.f32 %v1443_v51, %v3360_v37 }
 0xd01   : > { %v3648_v53 = vadd.f32 %v1451_v50, %v1449_v52 }
 0xd03   : > { %v1454_v55 = vsel %vm258_vm0, %v3648_v53, 0.0 }
 0xd04   : > { %1455 = vadd.xlane.f32.xlu0 %v1454_v55 }
 0xd1c   : > { %v1446_v58 = vpop.f32.mrf.mxu2 }
 0xd1d   : > { %v1450_v48 = vadd.f32 %v1446_v58, %v3365_v41 }
 0xd1f   : > { %v3653_v61 = vadd.f32 %v1451_v50, %v1450_v48 }
 0xd21   : > { %v1457_v62 = vsel %vm258_vm0, %v3653_v61, 0.0 }
 0xd22   : > { %1458 = vadd.xlane.f32.xlu1 %v1457_v62 }
 0xd77   : > { %v1456_v1 = vpop.xlane.xlu0 %1455 }
 0xd78   : > { %v1460_v40 = vmul.f32 %v1456_v1, %v3197_v12 }
 0xd7a   : > { %v1462_v37 = vsub.f32 %v3648_v53, %v1460_v40 }
 0xd7c   : > { %v1464_v49 = vmul.f32 %v1462_v37, %v1462_v37 }
 0xd7e   : > { %v1466_v34 = vsel %vm258_vm0, %v1464_v49, 0.0  ;;  %v1556_v49 = vld [vmem:[%s3716_s8] sm:$0xff] }
 0xd7f   : > { %1467 = vadd.xlane.f32.xlu2 %v1466_v34 }
 0xd95   : > { %v1459_v3 = vpop.xlane.xlu1 %1458 }
 0xd96   : > { %v1461_v5 = vmul.f32 %v1459_v3, %v3197_v12 }
 0xd98   : > { %v1463_v41 = vsub.f32 %v3653_v61, %v1461_v5 }
 0xd9a   : > { %v1465_v7 = vmul.f32 %v1463_v41, %v1463_v41 }
 0xd9c   : > { %v1469_v63 = vsel %vm258_vm0, %v1465_v7, 0.0 }
 0xd9d   : > { %1470 = vadd.xlane.f32.xlu0 %v1469_v63 }
 0xdf2   : > { %v1468_v13 = vpop.xlane.xlu2 %1467 }
 0xdf3   : > { %v1472_v15 = vmul.f32 %v1468_v13, %v3197_v12 }
 0xdf5   : > { %v1474_v16 = vadd.f32 1e-05, %v1472_v15 }
 0xdf7   : > { %2952 = vrsqrt.f32 %v1474_v16  ;;  %vm1482_vm5 = vweird.f32 %v1474_v16 }
 0xdfd   : > { %v2953_v17 = vpop.eup %2952 }
 0xdfe   : > { %v1477_v20 = vmul.f32 %v2953_v17, %v1474_v16  ;;  %vm1483_vm3 = vweird.f32 %v2953_v17  ;;  %v1557_v16 = vld [vmem:[%s3716_s8 + $0x8] sm:$0xff] }
 0xdff   : > { %vm1484_vm6 = vmor %vm1482_vm5, %vm1483_vm3 }
 0xe00   : > { %v1478_v54 = vmul.f32 %v2953_v17, %v1477_v20 }
 0xe02   : > { %v1479_v56 = vmul.f32 0.5, %v1478_v54  ;;  %v1599_v54 = vperm.slane %v3008_v46, 7  ;;  %v1648_v46 = vperm.slane %v3754_v0, 0 }
 0xe04   : > { %v1480_v57 = vsub.f32 1.5, %v1479_v56 }
 0xe06   : > { %v1481_v21 = vmul.f32 %v2953_v17, %v1480_v57 }
 0xe08   : > { %v1485_v60 = vsel %vm1484_vm6, %v2953_v17, %v1481_v21 }
 0xe09   : > { %v1496_v23 = vmul.f32 %v1485_v60, %v1462_v37 }
 0xe0b   : > { %v1499_v26 = vmul.f32 %v1498_v59, %v1496_v23 }
 0xe0d   : > { %v1502_v4 = vadd.f32 %v1501_v25, %v1499_v26 }
 0xe0f   : > { %2717 = vmatmul.msk.f32.vlgmr.msra.gmra.mxu0 %vm258_vm0, %v1502_v4 }
 0xe10   : > { %v1471_v27 = vpop.xlane.xlu0 %1470 }
 0xe11   : > { %v1473_v28 = vmul.f32 %v1471_v27, %v3197_v12 }
 0xe13   : > { %v1475_v29 = vadd.f32 1e-05, %v1473_v28 }
 0xe15   : > { %2954 = vrsqrt.f32 %v1475_v29  ;;  %vm1492_vm8 = vweird.f32 %v1475_v29 }
 0xe1b   : > { %v2955_v30 = vpop.eup %2954 }
 0xe1c   : > { %v1487_v8 = vmul.f32 %v2955_v30, %v1475_v29  ;;  %vm1493_vm7 = vweird.f32 %v2955_v30 }
 0xe1d   : > { %vm1494_vm9 = vmor %vm1492_vm8, %vm1493_vm7 }
 0xe1e   : > { %v1488_v31 = vmul.f32 %v2955_v30, %v1487_v8 }
 0xe20   : > { %v1489_v33 = vmul.f32 0.5, %v1488_v31 }
 0xe22   : > { %v1490_v35 = vsub.f32 1.5, %v1489_v33 }
 0xe24   : > { %v1491_v19 = vmul.f32 %v2955_v30, %v1490_v35  ;;  %v2725_v35 = vld [vmem:[%s4056_s4 + $0xc8] sm:$0xff] }
 0xe25   : > { %1677 = vmatpush.msrb.mxu3 %v2725_v35 }
 0xe26   : > { %v1495_v36 = vsel %vm1494_vm9, %v2955_v30, %v1491_v19  ;;  %v2724_v19 = vld [vmem:[%s4056_s4 + $0xc0] sm:$0xff] }
 0xe27   : > { %v1497_v6 = vmul.f32 %v1495_v36, %v1463_v41  ;;  %1678 = vmatpush.msrb.mxu3 %v2724_v19  ;;  %v2723_v36 = vld [vmem:[%s4056_s4 + $0xb8] sm:$0xff] }
 0xe29   : > { %v1500_v38 = vmul.f32 %v1498_v59, %v1497_v6  ;;  %v2722_v6 = vld [vmem:[%s4056_s4 + $0xb0] sm:$0xff]  ;;  %1679 = vmatpush.msrb.mxu3 %v2723_v36 }
 0xe2b   : > { %v1503_v2 = vadd.f32 %v1501_v25, %v1500_v38  ;;  %1680 = vmatpush.msrb.mxu3 %v2722_v6 }
 0xe2d   : > { %2718 = vmatmul.msk.f32.gmra.mxu0 %vm258_vm0, %v1503_v2 }
 0xe8c   : > { %v1532_v50 = vpop.f32.mrf.mxu0 }
 0xe8d   : > { %v1533_v51 = vadd.f32 %v1532_v50, %v1508_v22 }
 0xe8f   : > { %v1538_v52 = vmul.f32 %v1533_v51, %v1533_v51 }
 0xe91   : > { %v1540_v55 = vmul.f32 %v1538_v52, %v1533_v51 }
 0xe93   : > { %v1542_v58 = vmul.f32 0.044715, %v1540_v55 }
 0xe95   : > { %v1544_v48 = vadd.f32 %v1542_v58, %v1533_v51 }
 0xe97   : > { %v1546_v62 = vmul.f32 0.7978846, %v1544_v48 }
 0xe99   : > { %2956 = vtanh.f32 %v1546_v62 }
 0xe9f   : > { %v2957_v1 = vpop.eup %2956 }
 0xea0   : > { %v1550_v40 = vadd.f32 1.0, %v2957_v1 }
 0xea2   : > { %v1552_v37 = vmul.f32 0.5, %v1550_v40 }
 0xea4   : > { %v1554_v34 = vmul.f32 %v1552_v37, %v1533_v51  ;;  %v1651_v51 = vperm.slane %v3754_v0, 1 }
 0xea6   : > { %v1558_v3 = vmul.f32 %v1556_v49, %v1554_v34 }
 0xea8   : > { %2719 = vmatmul.msk.f32.vlgmr.msrb.gmra.mxu1 %vm673_vm12, %v1558_v3 }
 0xeaa   : > { %v1535_v5 = vpop.f32.mrf.mxu0 }
 0xeab   : > { %v1536_v41 = vadd.f32 %v1535_v5, %v1508_v22 }
 0xead   : > { %v1539_v7 = vmul.f32 %v1536_v41, %v1536_v41 }
 0xeaf   : > { %v1541_v63 = vmul.f32 %v1539_v7, %v1536_v41 }
 0xeb1   : > { %v1543_v9 = vmul.f32 0.044715, %v1541_v63 }
 0xeb3   : > { %v1545_v10 = vadd.f32 %v1543_v9, %v1536_v41  ;;  %v1658_v9 = vperm.slane %v3754_v0, 4 }
 0xeb5   : > { %v1547_v14 = vmul.f32 0.7978846, %v1545_v10 }
 0xeb7   : > { %2958 = vtanh.f32 %v1547_v14 }
 0xebd   : > { %v2959_v11 = vpop.eup %2958 }
 0xebe   : > { %v1551_v13 = vadd.f32 1.0, %v2959_v11 }
 0xec0   : > { %v1553_v15 = vmul.f32 0.5, %v1551_v13 }
 0xec2   : > { %v1555_v17 = vmul.f32 %v1553_v15, %v1536_v41 }
 0xec4   : > { %v1559_v20 = vmul.f32 %v1557_v16, %v1555_v17 }
 0xec6   : > { %2720 = vmatmul.msk.f32.gmra.mxu1 %vm673_vm12, %v1559_v20 }
 0xf25   : > { %v1591_v56 = vpop.f32.mrf.mxu1 }
 0xf26   : > { %v1597_v57 = vadd.f32 %v1591_v56, %v3648_v53 }
 0xf28   : > { %v3723_v21 = vadd.f32 %v1599_v54, %v1597_v57 }
 0xf2a   : > { %v1604_v59 = vsel %vm258_vm0, %v3723_v21, 0.0 }
 0xf2b   : > { %1605 = vadd.xlane.f32.xlu1 %v1604_v59  ;;  %v3010_v59 = vld [vmem:[%s4055_s3 + $0x28] sm:$0xff] }
 0xf43   : > { %v1594_v60 = vpop.f32.mrf.mxu1 }
 0xf44   : > { %v1598_v23 = vadd.f32 %v1594_v60, %v3653_v61 }
 0xf46   : > { %v3728_v25 = vadd.f32 %v1599_v54, %v1598_v23  ;;  %v3009_v54 = vld [vmem:[%s4055_s3 + $0x20] sm:$0xff] }
 0xf48   : > { %v1607_v26 = vsel %vm258_vm0, %v3728_v25, 0.0 }
 0xf49   : > { %1608 = vadd.xlane.f32.xlu2 %v1607_v26 }
 0xf9e   : > { %v1606_v4 = vpop.xlane.xlu1 %1605 }
 0xf9f   : > { %v1610_v27 = vmul.f32 %v1606_v4, %v3197_v12 }
 0xfa1   : > { %v1612_v53 = vsub.f32 %v3723_v21, %v1610_v27 }
 0xfa3   : > { %v1614_v28 = vmul.f32 %v1612_v53, %v1612_v53 }
 0xfa5   : > { %v1616_v29 = vsel %vm258_vm0, %v1614_v28, 0.0 }
 0xfa6   : > { %1617 = vadd.xlane.f32.xlu0 %v1616_v29  ;;  %v3011_v29 = vld [vmem:[%s4055_s3 + $0x18] sm:$0xff] }
 0xfbc   : > { %v1609_v30 = vpop.xlane.xlu2 %1608 }
 0xfbd   : > { %v1611_v8 = vmul.f32 %v1609_v30, %v3197_v12 }
 0xfbf   : > { %v1613_v61 = vsub.f32 %v3728_v25, %v1611_v8 }
 0xfc1   : > { %v1615_v31 = vmul.f32 %v1613_v61, %v1613_v61 }
 0xfc3   : > { %v1619_v33 = vsel %vm258_vm0, %v1615_v31, 0.0 }
 0xfc4   : > { %1620 = vadd.xlane.f32.xlu1 %v1619_v33 }
0x1019   : > { %v1618_v38 = vpop.xlane.xlu0 %1617 }
0x101a   : > { %v1622_v2 = vmul.f32 %v1618_v38, %v3197_v12 }
0x101c   : > { %v1624_v24 = vadd.f32 1e-05, %v1622_v2 }
0x101e   : > { %2960 = vrsqrt.f32 %v1624_v24  ;;  %vm1632_vm13 = vweird.f32 %v1624_v24 }
0x1024   : > { %v2961_v39 = vpop.eup %2960 }
0x1025   : > { %v1627_v42 = vmul.f32 %v2961_v39, %v1624_v24  ;;  %vm1633_vm10 = vweird.f32 %v2961_v39 }
0x1026   : > { %vm1634_vm14 = vmor %vm1632_vm13, %vm1633_vm10 }
0x1027   : > { %v1628_v43 = vmul.f32 %v2961_v39, %v1627_v42 }
0x1029   : > { %v1629_v18 = vmul.f32 0.5, %v1628_v43 }
0x102b   : > { %v1630_v32 = vsub.f32 1.5, %v1629_v18 }
0x102d   : > { %v1631_v45 = vmul.f32 %v2961_v39, %v1630_v32 }
0x102f   : > { %v1635_v22 = vsel %vm1634_vm14, %v2961_v39, %v1631_v45 }
0x1030   : > { %v1646_v50 = vmul.f32 %v1635_v22, %v1612_v53 }
0x1032   : > { %v1649_v52 = vmul.f32 %v1648_v46, %v1646_v50 }
0x1034   : > { %v1652_v55 = vadd.f32 %v1651_v51, %v1649_v52 }
0x1036   : > { %2726 = vmatmul.msk.f32.vlgmr.msrb.gmra.mxu3 %vm258_vm0, %v1652_v55 }
0x1037   : > { %v1621_v58 = vpop.xlane.xlu1 %1620 }
0x1038   : > { %v1623_v48 = vmul.f32 %v1621_v58, %v3197_v12 }
0x103a   : > { %v1625_v62 = vadd.f32 1e-05, %v1623_v48 }
0x103c   : > { %2962 = vrsqrt.f32 %v1625_v62  ;;  %vm1642_vm5 = vweird.f32 %v1625_v62 }
0x1042   : > { %v2963_v1 = vpop.eup %2962 }
0x1043   : > { %v1637_v40 = vmul.f32 %v2963_v1, %v1625_v62  ;;  %vm1643_vm3 = vweird.f32 %v2963_v1 }
0x1044   : > { %vm1644_vm6 = vmor %vm1642_vm5, %vm1643_vm3 }
0x1045   : > { %v1638_v37 = vmul.f32 %v2963_v1, %v1637_v40 }
0x1047   : > { %v1639_v49 = vmul.f32 0.5, %v1638_v37 }
0x1049   : > { %v1640_v34 = vsub.f32 1.5, %v1639_v49 }
0x104b   : > { %v1641_v3 = vmul.f32 %v2963_v1, %v1640_v34 }
0x104d   : > { %v1645_v5 = vsel %vm1644_vm6, %v2963_v1, %v1641_v3 }
0x104e   : > { %v1647_v41 = vmul.f32 %v1645_v5, %v1613_v61 }
0x1050   : > { %v1650_v7 = vmul.f32 %v1648_v46, %v1647_v41 }
0x1052   : > { %v1653_v63 = vadd.f32 %v1651_v51, %v1650_v7 }
0x1054   : > { %2727 = vmatmul.msk.f32.gmra.mxu3 %vm258_vm0, %v1653_v63 }
0x10b9   : > { %v1682_v10 = vpop.f32.mrf.mxu3 }
0x10ba   : > { %v1683_v14 = vadd.f32 %v1682_v10, %v1658_v9 }
0x10bc   : > { %2728 = vmatmul.msk.f32.vlgmr.msrb.gmra.mxu2 %vm258_vm0, %v1683_v14  ;;  %1725 = vrot.lane.b32.xlu2 %v1683_v14, %s3080_s9  ;;  %v1723_v26 = vmul.f32 %v1683_v14, %v3462_v47  ;;  %v3012_v47 = vld [vmem:[%s4055_s3 + $0x10] sm:$0xff] }
0x10bd   : > { %v1688_v31 = vmul.f32 %v3012_v47, %v1683_v14 }
0x10d7   : > { %v1685_v11 = vpop.f32.mrf.mxu3 }
0x10d8   : > { %v1686_v13 = vadd.f32 %v1685_v11, %v1658_v9 }
0x10da   : > { %1727 = vrot.lane.b32.xlu0 %v1686_v13, %s3080_s9  ;;  %2729 = vmatmul.msk.f32.gmra.mxu2 %vm258_vm0, %v1686_v13  ;;  %v3766_v15 = vpack.i.bf16 %v1683_v14, %v1686_v13  ;;  %v1689_v30 = vmul.f32 %v3011_v29, %v1686_v13  ;;  %v1724_v35 = vmul.f32 %v1686_v13, %v3457_v44 }
0x1116   : > { %v1726_v16 = vpop.permute.xlu2 %1725 }
0x1117   : > { %2730 = vmatmul.msk.f32.vlgmr.msrb.gmra.mxu0 %vm258_vm0, %v1726_v16 }
0x113f   : > { %v1713_v23 = vpop.f32.mrf.mxu2 }
0x1140   : > { %v1719_v61 = vmul.f32 %v3009_v54, %v1713_v23 }
0x1142   : > { %v1721_v33 = vadd.f32 %v1719_v61, %v1688_v31 }
0x114c   : > { %v1728_v17 = vpop.permute.xlu0 %1727 }
0x114d   : > { %2731 = vmatmul.msk.f32.gmra.mxu0 %vm258_vm0, %v1728_v17 }
0x115d   : > { %v1716_v53 = vpop.f32.mrf.mxu2 }
0x115e   : > { %v1720_v28 = vmul.f32 %v3010_v59, %v1716_v53 }
0x1160   : > { %v1722_v8 = vadd.f32 %v1720_v28, %v1689_v30 }
0x1194   : > { %v1750_v20 = vpop.f32.mrf.mxu0 }
0x1195   : > { %v1756_v56 = vmul.f32 %v3009_v54, %v1750_v20 }
0x1197   : > { %1760 = vrot.lane.b32.xlu0 %v1756_v56, %s3081_s12 }
0x11ca   : > { %v1753_v57 = vpop.f32.mrf.mxu0 }
0x11cb   : > { %v1757_v60 = vmul.f32 %v3010_v59, %v1753_v57 }
0x11cd   : > { %1762 = vrot.lane.b32.xlu1 %v1757_v60, %s3081_s12 }
0x1209   : > { %v1761_v4 = vpop.permute.xlu0 %1760 }
0x120a   : > { %v1766_v27 = vadd.f32 %v1761_v4, %v1723_v26 }
0x120c   : > { %1770 = vrot.lane.b32.xlu1 %v1766_v27, %s3080_s9 }
0x1214   : > { %1894 = vrot.lane.b32.xlu1 %v1722_v8, %s3085_s6 }
0x121c   : > { %2028 = vrot.lane.b32.xlu1 %v1766_v27, %s3082_s25 }
0x1224   : > { %2156 = vrot.lane.b32.xlu1 %v1721_v33, %s3084_s30 }
0x123f   : > { %v1763_v19 = vpop.permute.xlu1 %1762 }
0x1240   : > { %v1767_v36 = vadd.f32 %v1763_v19, %v1724_v35 }
0x1242   : > { %1898 = vrot.lane.b32.xlu0 %v1767_v36, %s4076_s23  ;;  %1772 = vrot.lane.b32.xlu2 %v1767_v36, %s3080_s9  ;;  %s4079_s9 = smov 64  }
0x124a   : > { %1892 = vrot.lane.b32.xlu0 %v1721_v33, %s3085_s6  ;;  %1896 = vrot.lane.b32.xlu2 %v1766_v27, %s4076_s23  ;;  %s4082_s6 = smov 40   ;;  %s241_s23 = scalar_lea.vmem [#allocation3], %s2667_s15 }
0x124b   : > { %s3035_s15 = scalar_lea.hbm %s4057_s5, 32 }
0x1252   : > { %2162 = vrot.lane.b32.xlu0 %v1767_v36, %s4077_s16  ;;  %2030 = vrot.lane.b32.xlu2 %v1767_v36, %s3082_s25  ;;  %s4080_s25 = smov 48  }
0x125a   : > { %2024 = vrot.lane.b32.xlu0 %v1721_v33, %s4078_s26  ;;  %2160 = vrot.lane.b32.xlu2 %v1766_v27, %s4077_s16 }
0x1262   : > { %2158 = vrot.lane.b32.xlu0 %v1722_v8, %s3084_s30  ;;  %2026 = vrot.lane.b32.xlu2 %v1722_v8, %s4078_s26  ;;  %s4081_s30 = smov 56  }
0x127e   : > { %v1771_v44 = vpop.permute.xlu1 %1770 }
0x1286   : > { %v1895_v2 = vpop.permute.xlu1 %1894 }
0x128e   : > { %v2029_v39 = vpop.permute.xlu1 %2028 }
0x1296   : > { %v2157_v45 = vpop.permute.xlu1 %2156 }
0x129c   : > { %v1773_v6 = vpop.permute.xlu2 %1772 }
0x129d   : > { %2732 = vmatpush.xpose.msk.msra.mxu1 %vm442_vm11, %v1773_v6 }
0x12a1   : > { %2733 = vmatpush.xpose.msk.msra.mxu1 %vm442_vm11, %v1771_v44 }
0x12a4   : > { %v1897_v38 = vpop.permute.xlu2 %1896  ;;  %2734 = vmatmul.msk.f32.vlgmr.msra.gmra.mxu1 %vm442_vm11, %v1721_v33 }
0x12ac   : > { %v2031_v24 = vpop.permute.xlu2 %2030  ;;  %2735 = vmatmul.msk.f32.gmra.mxu1 %vm442_vm11, %v1722_v8 }
0x12ad   : > { %2744 = vmatpush.xpose.msk.msrb.mxu1 %vm442_vm11, %v2031_v24 }
0x12b1   : > { %2745 = vmatpush.xpose.msk.msrb.mxu1 %vm442_vm11, %v2029_v39 }
0x12b4   : > { %v1899_v42 = vpop.permute.xlu0 %1898  ;;  %v2161_v32 = vpop.permute.xlu2 %2160 }
0x12b5   : > { %2738 = vmatpush.xpose.msk.msra.mxu2 %vm442_vm11, %v1899_v42 }
0x12b9   : > { %2739 = vmatpush.xpose.msk.msra.mxu2 %vm442_vm11, %v1897_v38 }
0x12bc   : > { %v1893_v43 = vpop.permute.xlu0 %1892  ;;  %v2027_v22 = vpop.permute.xlu2 %2026 }
0x12bd   : > { %2740 = vmatmul.msk.f32.vlgmr.msra.gmra.mxu2 %vm442_vm11, %v1893_v43 }
0x12c4   : > { %v2163_v18 = vpop.permute.xlu0 %2162 }
0x12c5   : > { %2741 = vmatmul.msk.f32.gmra.mxu2 %vm442_vm11, %v1895_v2 }
0x12c6   : > { %2750 = vmatpush.xpose.msk.msrb.mxu2 %vm442_vm11, %v2163_v18 }
0x12ca   : > { %2751 = vmatpush.xpose.msk.msrb.mxu2 %vm442_vm11, %v2161_v32 }
0x12cc   : > { %v2025_v46 = vpop.permute.xlu0 %2024 }
0x12cd   : > { %2746 = vmatmul.msk.f32.vlgmr.msrb.gmra.mxu1 %vm442_vm11, %v2025_v46  ;;  %2752 = vmatmul.msk.f32.vlgmr.msrb.gmra.mxu2 %vm442_vm11, %v2157_v45 }
0x12d4   : > { %v2159_v50 = vpop.permute.xlu0 %2158 }
0x12d5   : > { %2747 = vmatmul.msk.f32.gmra.mxu1 %vm442_vm11, %v2027_v22  ;;  %2753 = vmatmul.msk.f32.gmra.mxu2 %vm442_vm11, %v2159_v50 }
0x1321   : > { %v1801_v51 = vpop.f32.mrf.mxu1 }
0x1322   : > { %v1807_v52 = vsel %vm929_vm4, %v1801_v51, -inf }
0x1323   : > { %1808 = vmax.xlane.f32.xlu1 %v1807_v52 }
0x1329   : > { %v1804_v55 = vpop.f32.mrf.mxu1 }
0x132a   : > { %v1810_v58 = vsel %vm929_vm4, %v1804_v55, -inf }
0x132b   : > { %1811 = vmax.xlane.f32.xlu0 %v1810_v58 }
0x1340   : > { %v1925_v48 = vpop.f32.mrf.mxu2 }
0x1341   : > { %v1931_v62 = vsel %vm929_vm4, %v1925_v48, -inf }
0x1342   : > { %1932 = vmax.xlane.f32.xlu2 %v1931_v62 }
0x1348   : > { %v1928_v1 = vpop.f32.mrf.mxu2 }
0x1349   : > { %v1934_v40 = vsel %vm929_vm4, %v1928_v1, -inf }
0x134a   : > { %1935 = vmax.xlane.f32.xlu2 %v1934_v40  ;;  %v2057_v37 = vpop.f32.mrf.mxu1 }
0x134b   : > { %v2063_v49 = vsel %vm929_vm4, %v2057_v37, -inf }
0x134c   : > { %2064 = vmax.xlane.f32.xlu1 %v2063_v49 }
0x1350   : > { %v2189_v34 = vpop.f32.mrf.mxu2 }
0x1351   : > { %v2195_v3 = vsel %vm929_vm4, %v2189_v34, -inf }
0x1352   : > { %v2060_v5 = vpop.f32.mrf.mxu1  ;;  %2196 = vmax.xlane.f32.xlu0 %v2195_v3 }
0x1353   : > { %v2066_v41 = vsel %vm929_vm4, %v2060_v5, -inf }
0x1354   : > { %2067 = vmax.xlane.f32.xlu2 %v2066_v41 }
0x1358   : > { %v2192_v7 = vpop.f32.mrf.mxu2 }
0x1359   : > { %v2198_v63 = vsel %vm929_vm4, %v2192_v7, -inf }
0x135a   : > { %2199 = vmax.xlane.f32.xlu1 %v2198_v63 }
0x1373   : > { %2866 = vrot.lane.b32.xlu1 %v3766_v15, %s4079_s9 }
0x1396   : > { %v1809_v9 = vpop.xlane.xlu1 %1808 }
0x1397   : > { %v1813_v10 = vsub.f32 %v1801_v51, %v1809_v9 }
0x1399   : > { %v1815_v14 = vmul.f32 1.442695, %v1813_v10 }
0x139b   : > { %2964 = vpow2.f32 %v1815_v14 }
0x139e   : > { %v1812_v11 = vpop.xlane.xlu0 %1811 }
0x139f   : > { %v1814_v13 = vsub.f32 %v1804_v55, %v1812_v11 }
0x13a1   : > { %v3826_v16 = vpop.eup %2964  ;;  %v1817_v17 = vmul.f32 1.442695, %v1814_v13 }
0x13a2   : > { %v1819_v20 = vsel %vm929_vm4, %v3826_v16, 0.0 }
0x13a3   : > { %2966 = vpow2.f32 %v1817_v17  ;;  %1820 = vadd.xlane.f32.xlu0 %v1819_v20 }
0x13a9   : > { %v3830_v54 = vpop.eup %2966 }
0x13aa   : > { %v1822_v56 = vsel %vm929_vm4, %v3830_v54, 0.0 }
0x13ab   : > { %1823 = vadd.xlane.f32.xlu1 %v1822_v56 }
0x13b5   : > { %v1933_v57 = vpop.xlane.xlu2 %1932 }
0x13b6   : > { %v1937_v59 = vsub.f32 %v1925_v48, %v1933_v57 }
0x13b8   : > { %v1939_v60 = vmul.f32 1.442695, %v1937_v59 }
0x13ba   : > { %2968 = vpow2.f32 %v1939_v60 }
0x13bd   : > { %v1936_v23 = vpop.xlane.xlu2 %1935 }
0x13be   : > { %v1938_v26 = vsub.f32 %v1928_v1, %v1936_v23 }
0x13bf   : > { %v2065_v4 = vpop.xlane.xlu1 %2064 }
0x13c0   : > { %v3834_v27 = vpop.eup %2968  ;;  %v1941_v53 = vmul.f32 1.442695, %v1938_v26  ;;  %v2069_v28 = vsub.f32 %v2057_v37, %v2065_v4 }
0x13c1   : > { %v1943_v29 = vsel %vm929_vm4, %v3834_v27, 0.0 }
0x13c2   : > { %2970 = vpow2.f32 %v1941_v53  ;;  %v2071_v30 = vmul.f32 1.442695, %v2069_v28  ;;  %1944 = vadd.xlane.f32.xlu2 %v1943_v29 }
0x13c4   : > { %2972 = vpow2.f32 %v2071_v30  ;;  %2876 = vrot.lane.b32.xlu1 %v3766_v15, %s4080_s25  ;;  %s2577_s25 = sshll.u32 %s241_s23, 4  ;;  %s2578_s25 = int_to_ptr.vmem [resolvable:$true] %s2577_s25 }
0x13c5   : > { %v2197_v8 = vpop.xlane.xlu0 %2196 }
0x13c6   : > { %v2201_v61 = vsub.f32 %v2189_v34, %v2197_v8 }
0x13c7   : > { %v2068_v47 = vpop.xlane.xlu2 %2067 }
0x13c8   : > { %v3840_v31 = vpop.eup %2970  ;;  %v2203_v33 = vmul.f32 1.442695, %v2201_v61  ;;  %v2070_v35 = vsub.f32 %v2060_v5, %v2068_v47 }
0x13c9   : > { %v1946_v19 = vsel %vm929_vm4, %v3840_v31, 0.0 }
0x13ca   : > { %v3844_v36 = vpop.eup %2972  ;;  %2974 = vpow2.f32 %v2203_v33  ;;  %1947 = vadd.xlane.f32.xlu0 %v1946_v19  ;;  %v2073_v6 = vmul.f32 1.442695, %v2070_v35 }
0x13cb   : > { %v2075_v44 = vsel %vm929_vm4, %v3844_v36, 0.0 }
0x13cc   : > { %2076 = vadd.xlane.f32.xlu2 %v2075_v44  ;;  %2976 = vpow2.f32 %v2073_v6 }
0x13cd   : > { %v2200_v38 = vpop.xlane.xlu1 %2199 }
0x13ce   : > { %v2202_v24 = vsub.f32 %v2192_v7, %v2200_v38 }
0x13d0   : > { %v3848_v2 = vpop.eup %2974  ;;  %v2205_v42 = vmul.f32 1.442695, %v2202_v24 }
0x13d1   : > { %v2207_v39 = vsel %vm929_vm4, %v3848_v2, 0.0 }
0x13d2   : > { %2208 = vadd.xlane.f32.xlu0 %v2207_v39  ;;  %v3852_v43 = vpop.eup %2976  ;;  %2978 = vpow2.f32 %v2205_v42 }
0x13d3   : > { %v2078_v18 = vsel %vm929_vm4, %v3852_v43, 0.0 }
0x13d8   : > { %v3856_v32 = vpop.eup %2978 }
0x13d9   : > { %v2210_v45 = vsel %vm929_vm4, %v3856_v32, 0.0 }
0x13da   : > { %2079 = vadd.xlane.f32.xlu0 %v2078_v18 }
0x13e2   : > { %2211 = vadd.xlane.f32.xlu0 %v2210_v45 }
0x13e4   : > { %2871 = vrot.lane.b32.xlu2 %v3766_v15, %s4081_s30 }
0x13e5   : > { %v2867_v46 = vpop.permute.xlu1 %2866 }
0x13e6   : > { %v2868_v22 = vunpack.i.l.bf16 %v2867_v46  ;;  %v2869_v50 = vunpack.i.h.bf16 %v2867_v46 }
0x13e8   : > { %1881 = vmatpush.msra.mxu3 %v2868_v22 }
0x13ea   : > { %1882 = vmatpush.msra.mxu3 %v2869_v50 }
0x13f6   : > { %2881 = vrot.lane.b32.xlu0 %v3766_v15, %s4082_s6  ;;  %s2565_s6 = scalar_lea.sflag [#allocation4], %s239_s14 }
0x1416   : > { %v1821_v51 = vpop.xlane.xlu0 %1820 }
0x1417   : > { %2980 = vrcp.f32 %v1821_v51  ;;  %v1836_v62 = vand.u32 2147483648, %v1821_v51  ;;  %v1834_v40 = vand.u32 2147483647, %v1821_v51  ;;  %vm1830_vm8 = vweird.f32 %v1821_v51 }
0x1419   : > { %v1837_v34 = vor.u32 1.1754944e-38, %v1836_v62  ;;  %vm1835_vm10 = vcmp.eq.f32.partialorder %v1834_v40, 8.507059e+37 }
0x141d   : > { %v2981_v52 = vpop.eup %2980 }
0x141e   : > { %v1826_v55 = vmul.f32 %v2981_v52, %v1821_v51  ;;  %v1824_v58 = vpop.xlane.xlu1 %1823  ;;  %vm1831_vm7 = vweird.f32 %v2981_v52 }
0x141f   : > { %2982 = vrcp.f32 %v1824_v58  ;;  %vm1832_vm9 = vmor %vm1830_vm8, %vm1831_vm7  ;;  %v1851_v63 = vand.u32 2147483648, %v1824_v58  ;;  %v1849_v10 = vand.u32 2147483647, %v1824_v58  ;;  %vm1845_vm14 = vweird.f32 %v1824_v58 }
0x1420   : > { %v1827_v48 = vsub.f32 1.0, %v1826_v55 }
0x1421   : > { %v1852_v11 = vor.u32 1.1754944e-38, %v1851_v63  ;;  %vm1850_vm5 = vcmp.eq.f32.partialorder %v1849_v10, 8.507059e+37 }
0x1422   : > { %v1828_v1 = vmul.f32 %v2981_v52, %v1827_v48  ;;  %v2756_v48 = vld [vmem:[%s4056_s4 + $0xd0] sm:$0xff] }
0x1424   : > { %v1829_v37 = vadd.f32 %v2981_v52, %v1828_v1 }
0x1425   : > { %v2983_v49 = vpop.eup %2982 }
0x1426   : > { %v1833_v3 = vsel %vm1832_vm9, %v2981_v52, %v1829_v37  ;;  %v1841_v5 = vmul.f32 %v2983_v49, %v1824_v58  ;;  %vm1846_vm13 = vweird.f32 %v2983_v49 }
0x1427   : > { %v1838_v15 = vsel %vm1835_vm10, %v1837_v34, %v1833_v3  ;;  %vm1847_vm3 = vmor %vm1845_vm14, %vm1846_vm13 }
0x1428   : > { %v1842_v41 = vsub.f32 1.0, %v1841_v5  ;;  %v1839_v7 = vmul.f32 %v3826_v16, %v1838_v15 }
0x142a   : > { %v1843_v9 = vmul.f32 %v2983_v49, %v1842_v41  ;;  %2736 = vmatmul.msk.f32.vlgmr.msra.gmra.mxu3 %vm929_vm4, %v1839_v7 }
0x142c   : > { %v1844_v14 = vadd.f32 %v2983_v49, %v1843_v9 }
0x142e   : > { %v1848_v13 = vsel %vm1847_vm3, %v2983_v49, %v1844_v14 }
0x142f   : > { %v1853_v17 = vsel %vm1850_vm5, %v1852_v11, %v1848_v13 }
0x1430   : > { %v1854_v20 = vmul.f32 %v3830_v54, %v1853_v17 }
0x1432   : > { %2737 = vmatmul.msk.f32.gmra.mxu3 %vm929_vm4, %v1854_v20 }
0x1435   : > { %v1945_v56 = vpop.xlane.xlu2 %1944 }
0x1436   : > { %2984 = vrcp.f32 %v1945_v56  ;;  %v2877_v16 = vpop.permute.xlu1 %2876  ;;  %v1960_v29 = vand.u32 2147483648, %v1945_v56  ;;  %vm1954_vm7 = vweird.f32 %v1945_v56  ;;  %v1958_v30 = vand.u32 2147483647, %v1945_v56 }
0x1437   : > { %v2878_v57 = vunpack.i.l.bf16 %v2877_v16  ;;  %v2879_v59 = vunpack.i.h.bf16 %v2877_v16 }
0x1438   : > { %v1961_v19 = vor.u32 1.1754944e-38, %v1960_v29  ;;  %vm1959_vm9 = vcmp.eq.f32.partialorder %v1958_v30, 8.507059e+37 }
0x1439   : > { %2137 = vmatpush.msrb.mxu3 %v2878_v57 }
0x143b   : > { %2138 = vmatpush.msrb.mxu3 %v2879_v59 }
0x143c   : > { %v2985_v60 = vpop.eup %2984 }
0x143d   : > { %v1950_v23 = vmul.f32 %v2985_v60, %v1945_v56  ;;  %v1948_v26 = vpop.xlane.xlu0 %1947  ;;  %vm1955_vm6 = vweird.f32 %v2985_v60 }
0x143e   : > { %2986 = vrcp.f32 %v1948_v26  ;;  %vm1956_vm8 = vmor %vm1954_vm7, %vm1955_vm6  ;;  %vm1969_vm10 = vweird.f32 %v1948_v26  ;;  %v1975_v18 = vand.u32 2147483648, %v1948_v26  ;;  %v1973_v51 = vand.u32 2147483647, %v1948_v26 }
0x143f   : > { %v1951_v4 = vsub.f32 1.0, %v1950_v23  ;;  %v2077_v53 = vpop.xlane.xlu2 %2076 }
0x1440   : > { %2988 = vrcp.f32 %v2077_v53  ;;  %v2090_v46 = vand.u32 2147483647, %v2077_v53  ;;  %v2092_v22 = vand.u32 2147483648, %v2077_v53  ;;  %vm2086_vm5 = vweird.f32 %v2077_v53 }
0x1441   : > { %v1952_v28 = vmul.f32 %v2985_v60, %v1951_v4  ;;  %v1976_v37 = vor.u32 1.1754944e-38, %v1975_v18 }
0x1442   : > { %vm2091_vm7 = vcmp.eq.f32.partialorder %v2090_v46, 8.507059e+37 }
0x1443   : > { %v1953_v54 = vadd.f32 %v2985_v60, %v1952_v28 }
0x1444   : > { %v2987_v8 = vpop.eup %2986 }
0x1445   : > { %v1957_v61 = vsel %vm1956_vm8, %v2985_v60, %v1953_v54  ;;  %v1965_v47 = vmul.f32 %v2987_v8, %v1948_v26  ;;  %v3868_v33 = vpop.xlane.xlu0 %2208  ;;  %vm1970_vm13 = vweird.f32 %v2987_v8  ;;  %vm1974_vm8 = vcmp.eq.f32.partialorder %v1973_v51, 8.507059e+37 }
0x1446   : > { %v2989_v35 = vpop.eup %2988  ;;  %v1962_v24 = vsel %vm1959_vm9, %v1961_v19, %v1957_v61  ;;  %vm3872_vm3 = vmor %vm1969_vm10, %vm1970_vm13  ;;  %2990 = vrcp.f32 %v3868_v33  ;;  %v2222_v28 = vand.u32 2147483647, %v3868_v33 }
0x1447   : > { %v1966_v44 = vsub.f32 1.0, %v1965_v47  ;;  %v2082_v6 = vmul.f32 %v2989_v35, %v2077_v53  ;;  %v2872_v38 = vpop.permute.xlu2 %2871  ;;  %vm2087_vm14 = vweird.f32 %v2989_v35  ;;  %v1963_v55 = vmul.f32 %v3834_v27, %v1962_v24 }
0x1448   : > { %v2873_v39 = vunpack.i.l.bf16 %v2872_v38  ;;  %v2874_v50 = vunpack.i.h.bf16 %v2872_v38  ;;  %vm2088_vm6 = vmor %vm2086_vm5, %vm2087_vm14  ;;  %v2093_v27 = vor.u32 1.1754944e-38, %v2092_v22  ;;  %v2224_v53 = vand.u32 2147483648, %v3868_v33 }
0x1449   : > { %v1967_v42 = vmul.f32 %v2987_v8, %v1966_v44  ;;  %v2083_v45 = vsub.f32 1.0, %v2082_v6  ;;  %vm2218_vm5 = vweird.f32 %v3868_v33 }
0x144a   : > { %2005 = vmatpush.msra.mxu0 %v2873_v39  ;;  %v2225_v30 = vor.u32 1.1754944e-38, %v2224_v53 }
0x144b   : > { %v2084_v52 = vmul.f32 %v2989_v35, %v2083_v45  ;;  %v1968_v58 = vadd.f32 %v2987_v8, %v1967_v42 }
0x144c   : > { %2006 = vmatpush.msra.mxu0 %v2874_v50  ;;  %v2991_v15 = vpop.eup %2990 }
0x144d   : > { %v2085_v62 = vadd.f32 %v2989_v35, %v2084_v52  ;;  %v2080_v1 = vpop.xlane.xlu0 %2079  ;;  %2742 = vmatmul.msk.f32.vlgmr.msra.gmra.mxu0 %vm929_vm4, %v1963_v55  ;;  %v1972_v40 = vsel %vm3872_vm3, %v2987_v8, %v1968_v58  ;;  %v2214_v10 = vmul.f32 %v2991_v15, %v3868_v33  ;;  %vm2219_vm3 = vweird.f32 %v2991_v15  ;;  %v2759_v52 = vld [vmem:[%s4056_s4 + $0xe8] sm:$0xff]  ;;  %v2758_v55 = vld [vmem:[%s4056_s4 + $0xe0] sm:$0xff]  ;;  %v2757_v58 = vld [vmem:[%s4056_s4 + $0xd8] sm:$0xff] }
0x144e   : > { %2992 = vrcp.f32 %v2080_v1  ;;  %v1977_v3 = vsel %vm1974_vm8, %v1976_v37, %v1972_v40  ;;  %v2107_v11 = vand.u32 2147483648, %v2080_v1  ;;  %v2105_v17 = vand.u32 2147483647, %v2080_v1  ;;  %2312 = vmatpush.msra.mxu1 %v2759_v52  ;;  %v2777_v52 = vld [vmem:[%s4056_s4 + $0x148] sm:$0xff] }
0x144f   : > { %v2089_v49 = vsel %vm2088_vm6, %v2989_v35, %v2085_v62  ;;  %v1978_v41 = vmul.f32 %v3840_v31, %v1977_v3  ;;  %v2215_v20 = vsub.f32 1.0, %v2214_v10  ;;  %vm2101_vm10 = vweird.f32 %v2080_v1  ;;  %vm2220_vm6 = vmor %vm2218_vm5, %vm2219_vm3  ;;  %2457 = vmatpush.msra.mxu2 %v2777_v52 }
0x1450   : > { %v2094_v34 = vsel %vm2091_vm7, %v2093_v27, %v2089_v49  ;;  %v2108_v16 = vor.u32 1.1754944e-38, %v2107_v11  ;;  %vm2106_vm14 = vcmp.eq.f32.partialorder %v2105_v17, 8.507059e+37  ;;  %vm2223_vm7 = vcmp.eq.f32.partialorder %v2222_v28, 8.507059e+37  ;;  %2313 = vmatpush.msra.mxu1 %v2758_v55  ;;  %v2776_v55 = vld [vmem:[%s4056_s4 + $0x140] sm:$0xff] }
0x1451   : > { %v2095_v5 = vmul.f32 %v3844_v36, %v2094_v34  ;;  %v2216_v57 = vmul.f32 %v2991_v15, %v2215_v20  ;;  %v2325_v3 = vperm.slane %v3754_v0, 5  ;;  %2458 = vmatpush.msra.mxu2 %v2776_v55 }
0x1452   : > { %2314 = vmatpush.msra.mxu1 %v2757_v58  ;;  %v2775_v58 = vld [vmem:[%s4056_s4 + $0x138] sm:$0xff] }
0x1453   : > { %2748 = vmatmul.msk.f32.vlgmr.msrb.gmra.mxu3 %vm929_vm4, %v2095_v5  ;;  %v2217_v26 = vadd.f32 %v2991_v15, %v2216_v57  ;;  %v2765_v57 = vld [vmem:[%s4056_s4 + $0x108] sm:$0xff]  ;;  %2459 = vmatpush.msra.mxu2 %v2775_v58 }
0x1454   : > { %v2993_v7 = vpop.eup %2992  ;;  %2315 = vmatpush.msra.mxu1 %v2756_v48  ;;  %2401 = vmatpush.msra.mxu3 %v2765_v57  ;;  %v2774_v48 = vld [vmem:[%s4056_s4 + $0x130] sm:$0xff] }
0x1455   : > { %v2097_v63 = vmul.f32 %v2993_v7, %v2080_v1  ;;  %2743 = vmatmul.msk.f32.gmra.mxu0 %vm929_vm4, %v1978_v41  ;;  %v2212_v9 = vpop.xlane.xlu0 %2211  ;;  %vm2102_vm9 = vweird.f32 %v2993_v7  ;;  %v2221_v29 = vsel %vm2220_vm6, %v2991_v15, %v2217_v26  ;;  %2460 = vmatpush.msra.mxu2 %v2774_v48 }
0x1456   : > { %2994 = vrcp.f32 %v2212_v9  ;;  %vm2103_vm13 = vmor %vm2101_vm10, %vm2102_vm9  ;;  %v2226_v61 = vsel %vm2223_vm7, %v2225_v30, %v2221_v29  ;;  %v2239_v35 = vand.u32 2147483648, %v2212_v9  ;;  %vm2233_vm9 = vweird.f32 %v2212_v9 }
0x1457   : > { %v2098_v14 = vsub.f32 1.0, %v2097_v63  ;;  %v2227_v44 = vmul.f32 %v3848_v2, %v2226_v61  ;;  %v2237_v6 = vand.u32 2147483647, %v2212_v9 }
0x1458   : > { %v2240_v38 = vor.u32 1.1754944e-38, %v2239_v35 }
0x1459   : > { %v2099_v13 = vmul.f32 %v2993_v7, %v2098_v14 }
0x145b   : > { %v2100_v36 = vadd.f32 %v2993_v7, %v2099_v13 }
0x145c   : > { %v2995_v56 = vpop.eup %2994 }
0x145d   : > { %v2104_v31 = vsel %vm2103_vm13, %v2993_v7, %v2100_v36  ;;  %v2229_v59 = vmul.f32 %v2995_v56, %v2212_v9  ;;  %vm2234_vm8 = vweird.f32 %v2995_v56  ;;  %vm2238_vm13 = vcmp.eq.f32.partialorder %v2237_v6, 8.507059e+37 }
0x145e   : > { %v2109_v60 = vsel %vm2106_vm14, %v2108_v16, %v2104_v31  ;;  %vm2235_vm10 = vmor %vm2233_vm9, %vm2234_vm8 }
0x145f   : > { %v2110_v23 = vmul.f32 %v3852_v43, %v2109_v60  ;;  %v2230_v4 = vsub.f32 1.0, %v2229_v59  ;;  %v2764_v59 = vld [vmem:[%s4056_s4 + $0x100] sm:$0xff]  ;;  %v2763_v60 = vld [vmem:[%s4056_s4 + $0xf8] sm:$0xff] }
0x1460   : > { %2402 = vmatpush.msra.mxu3 %v2764_v59 }
0x1461   : > { %2749 = vmatmul.msk.f32.gmra.mxu3 %vm929_vm4, %v2110_v23  ;;  %v2231_v54 = vmul.f32 %v2995_v56, %v2230_v4  ;;  %v2762_v23 = vld [vmem:[%s4056_s4 + $0xf0] sm:$0xff] }
0x1462   : > { %2403 = vmatpush.msra.mxu3 %v2763_v60 }
0x1463   : > { %v2232_v43 = vadd.f32 %v2995_v56, %v2231_v54 }
0x1464   : > { %2404 = vmatpush.msra.mxu3 %v2762_v23  ;;  %v2769_v23 = vld [vmem:[%s3716_s8 + $0x18] sm:$0xff] }
0x1465   : > { %v2236_v33 = vsel %vm2235_vm10, %v2995_v56, %v2232_v43 }
0x1466   : > { %v2241_v24 = vsel %vm2238_vm13, %v2240_v38, %v2236_v33 }
0x1467   : > { %v2242_v39 = vmul.f32 %v3856_v32, %v2241_v24 }
0x1468   : > { %v2882_v8 = vpop.permute.xlu0 %2881 }
0x1469   : > { %v2883_v47 = vunpack.i.l.bf16 %v2882_v8  ;;  %v2884_v19 = vunpack.i.h.bf16 %v2882_v8 }
0x146b   : > { %2269 = vmatpush.msrb.mxu0 %v2883_v47  ;;  %v2372_v47 = vperm.slane %v3754_v0, 2 }
0x146d   : > { %2270 = vmatpush.msrb.mxu0 %v2884_v19  ;;  %v2375_v19 = vperm.slane %v3754_v0, 3 }
0x146e   : > { %2754 = vmatmul.msk.f32.vlgmr.msrb.gmra.mxu0 %vm929_vm4, %v2227_v44 }
0x1476   : > { %2755 = vmatmul.msk.f32.gmra.mxu0 %vm929_vm4, %v2242_v39 }
0x14ad   : > { %v1884_v42 = vpop.f32.mrf.mxu3 }
0x14ae   : > { %1890 = vst.msk [vmem:[#allocation2] sm:$0xff] %vm442_vm11, %v1884_v42 }
0x14b5   : > { %v1887_v18 = vpop.f32.mrf.mxu3 }
0x14b6   : > { %1891 = vst.msk [vmem:[#allocation2 + $0x8] sm:$0xff] %vm442_vm11, %v1887_v18 }
0x14ca   : > { %v2008_v2 = vpop.f32.mrf.mxu0 }
0x14cb   : > { %2016 = vrot.lane.b32.xlu2 %v2008_v2, %s4085_s7 }
0x14d2   : > { %v2011_v46 = vpop.f32.mrf.mxu0 }
0x14d6   : > { %v2140_v45 = vpop.f32.mrf.mxu3 }
0x14d7   : > { %2148 = vrot.lane.b32.xlu1 %v2140_v45, %s4086_s10 }
0x14df   : > { %2018 = vrot.lane.b32.xlu1 %v2011_v46, %s4085_s7 }
0x14e4   : > { %v2143_v32 = vpop.f32.mrf.mxu3 }
0x14eb   : > { %v2272_v22 = vpop.f32.mrf.mxu0 }
0x14ec   : > { %2280 = vrot.lane.b32.xlu2 %v2272_v22, %s4087_s11 }
0x14f3   : > { %v2275_v50 = vpop.f32.mrf.mxu0 }
0x14f4   : > { %2282 = vrot.lane.b32.xlu1 %v2275_v50, %s4087_s11  ;;  %2150 = vrot.lane.b32.xlu2 %v2143_v32, %s4086_s10 }
0x1525   : > { %v2017_v51 = vpop.permute.xlu2 %2016 }
0x1526   : > { %2022 = vst.msk [vmem:[#allocation2] sm:$0xff] %vm1145_vm15, %v2017_v51 }
0x1546   : > { %v2281_v62 = vpop.permute.xlu2 %2280 }
0x1549   : > { %v2149_v1 = vpop.permute.xlu1 %2148 }
0x154a   : > { %2154 = vst.msk [vmem:[#allocation2] sm:$0xff] %vm1278_vm1, %v2149_v1  ;;  %v2772_v1 = vld [vmem:[%s4056_s4 + $0x120] sm:$0xff] }
0x154b   : > { %2286 = vst.msk [vmem:[#allocation2] sm:$0xff] %vm1411_vm2, %v2281_v62  ;;  %v2773_v62 = vld [vmem:[%s4056_s4 + $0x128] sm:$0xff] }
0x154c   : > { %2461 = vmatpush.msra.mxu2 %v2773_v62 }
0x154e   : > { %v2151_v37 = vpop.permute.xlu2 %2150  ;;  %2462 = vmatpush.msra.mxu2 %v2772_v1  ;;  %v3014_v1 = vld [vmem:[%s4055_s3 + $0x50] sm:$0xff] }
0x1551   : > { %v2019_v40 = vpop.permute.xlu1 %2018 }
0x1552   : > { %2023 = vst.msk [vmem:[#allocation2 + $0x8] sm:$0xff] %vm1145_vm15, %v2019_v40  ;;  %v2288_v27 = vld [vmem:[#allocation2] sm:$0xff]  ;;  %v2771_v40 = vld [vmem:[%s4056_s4 + $0x118] sm:$0xff] }
0x1553   : > { %2155 = vst.msk [vmem:[#allocation2 + $0x8] sm:$0xff] %vm1278_vm1, %v2151_v37  ;;  %2760 = vmatmul.msk.f32.vlgmr.msra.gmra.mxu1 %vm258_vm0, %v2288_v27  ;;  %v2770_v37 = vld [vmem:[%s4056_s4 + $0x110] sm:$0xff]  ;;  %2463 = vmatpush.msra.mxu2 %v2771_v40  ;;  %v2382_v27 = vperm.slane %v3754_v0, 6  ;;  %v2521_v40 = vperm.slane %v3014_v1, 6 }
0x1555   : > { %2464 = vmatpush.msra.mxu2 %v2770_v37 }
0x1566   : > { %v2283_v49 = vpop.permute.xlu1 %2282 }
0x1567   : > { %2287 = vst.msk [vmem:[#allocation2 + $0x8] sm:$0xff] %vm1411_vm2, %v2283_v49 }
0x156e   : > { %v2289_v34 = vld [vmem:[#allocation2 + $0x8] sm:$0xff] }
0x156f   : > { %2761 = vmatmul.msk.f32.gmra.mxu1 %vm258_vm0, %v2289_v34 }
0x15d0   : > { %v2317_v5 = vpop.f32.mrf.mxu1 }
0x15d1   : > { %v2323_v15 = vadd.f32 %v2317_v5, %v3723_v21 }
0x15d3   : > { %v3924_v41 = vadd.f32 %v2325_v3, %v2323_v15 }
0x15d5   : > { %v2328_v7 = vsel %vm258_vm0, %v3924_v41, 0.0 }
0x15d6   : > { %2329 = vadd.xlane.f32.xlu0 %v2328_v7 }
0x15ec   : > { %v2320_v63 = vpop.f32.mrf.mxu1 }
0x15ed   : > { %v2324_v9 = vadd.f32 %v2320_v63, %v3728_v25 }
0x15ef   : > { %v3929_v10 = vadd.f32 %v2325_v3, %v2324_v9 }
0x15f1   : > { %v2331_v14 = vsel %vm258_vm0, %v3929_v10, 0.0 }
0x15f2   : > { %2332 = vadd.xlane.f32.xlu2 %v2331_v14 }
0x1649   : > { %v2330_v11 = vpop.xlane.xlu0 %2329 }
0x164a   : > { %v2334_v13 = vmul.f32 %v2330_v11, %v3197_v12 }
0x164c   : > { %v2336_v21 = vsub.f32 %v3924_v41, %v2334_v13  ;;  %v2768_v13 = vld [vmem:[%s3716_s8 + $0x10] sm:$0xff]  ;;  %s2788_s8 = sshll.u32 %s3147_s22, 4 }
0x164d   : > { %s2576_s9 = scalar_lea.hbm %s4057_s5, %s2788_s8 }
0x164e   : > { %v2338_v17 = vmul.f32 %v2336_v21, %v2336_v21  ;;  %s2579_s30 = sshll.u32 %s2576_s9, 4  ;;  %s2580_s30 = int_to_ptr.hbm [resolvable:$true] %s2579_s30 }
0x164f   : > { %s3029_s10 = sshra.s32 %s2580_s30, 4  ;;  %s3030_s10 = int_to_ptr.hbm [resolvable:$true] %s3029_s10 }
0x1650   : > { %v2340_v20 = vsel %vm258_vm0, %v2338_v17, 0.0  ;;  %s3031_s11 = scalar_lea.hbm %s3030_s10, 16  ;;  %p3036_p0 = scmp.lt.s32.totalorder %s3030_s10, %s4057_s5 }
0x1651   : > { %2341 = vadd.xlane.f32.xlu1 %v2340_v20  ;;  %p3032_p11 = scmp.ne.s32.totalorder %s3030_s10, %s3031_s11  ;;  %p3037_p1 = scmp.lt.s32.totalorder %s3035_s15, %s3031_s11 }
0x1653   : > { %p3033_p12 = pnand %p3032_p11, %p3164_p5  ;;  %p3038_p2 = por %p3037_p1, %p3036_p0 }
0x1655   : > { %p3034_p13 = pneg %p3033_p12 }
0x1657   : > { %p3039_p3 = pnand %p3038_p2, %p3034_p13 }
0x1665   : > { %v2333_v36 = vpop.xlane.xlu2 %2332 }
0x1666   : > { %v2335_v56 = vmul.f32 %v2333_v36, %v3197_v12 }
0x1668   : > { %v2337_v25 = vsub.f32 %v3929_v10, %v2335_v56 }
0x166a   : > { %v2339_v16 = vmul.f32 %v2337_v25, %v2337_v25 }
0x166c   : > { %v2343_v31 = vsel %vm258_vm0, %v2339_v16, 0.0 }
0x166d   : > { %2344 = vadd.xlane.f32.xlu0 %v2343_v31 }
0x16c4   : > { %v2342_v26 = vpop.xlane.xlu1 %2341 }
0x16c5   : > { %v2346_v4 = vmul.f32 %v2342_v26, %v3197_v12 }
0x16c7   : > { %v2348_v53 = vadd.f32 1e-05, %v2346_v4 }
0x16c9   : > { %2996 = vrsqrt.f32 %v2348_v53  ;;  %vm2356_vm4 = vweird.f32 %v2348_v53 }
0x16cf   : > { %v2997_v28 = vpop.eup %2996 }
0x16d0   : > { %v2351_v29 = vmul.f32 %v2997_v28, %v2348_v53  ;;  %vm2357_vm11 = vweird.f32 %v2997_v28  ;;  %v3013_v53 = vld [vmem:[%s4056_s4 + $0xa8] sm:$0xff] }
0x16d1   : > { %vm2358_vm15 = vmor %vm2356_vm4, %vm2357_vm11 }
0x16d2   : > { %v2352_v54 = vmul.f32 %v2997_v28, %v2351_v29 }
0x16d4   : > { %v2353_v30 = vmul.f32 0.5, %v2352_v54 }
0x16d6   : > { %v2354_v8 = vsub.f32 1.5, %v2353_v30 }
0x16d8   : > { %v2355_v61 = vmul.f32 %v2997_v28, %v2354_v8 }
0x16da   : > { %v2359_v43 = vsel %vm2358_vm15, %v2997_v28, %v2355_v61  ;;  %v2474_v28 = vperm.slane %v3013_v53, 7 }
0x16db   : > { %v2370_v35 = vmul.f32 %v2359_v43, %v2336_v21 }
0x16dd   : > { %v2373_v44 = vmul.f32 %v2372_v47, %v2370_v35 }
0x16df   : > { %v2376_v6 = vadd.f32 %v2375_v19, %v2373_v44 }
0x16e0   : > { %v2345_v33 = vpop.xlane.xlu0 %2344 }
0x16e1   : > { %v2347_v38 = vmul.f32 %v2345_v33, %v3197_v12  ;;  %2766 = vmatmul.msk.f32.vlgmr.msra.gmra.mxu3 %vm258_vm0, %v2376_v6 }
0x16e3   : > { %v2349_v24 = vadd.f32 1e-05, %v2347_v38 }
0x16e5   : > { %2998 = vrsqrt.f32 %v2349_v24  ;;  %vm2366_vm2 = vweird.f32 %v2349_v24 }
0x16eb   : > { %v2999_v39 = vpop.eup %2998 }
0x16ec   : > { %v2361_v42 = vmul.f32 %v2999_v39, %v2349_v24  ;;  %vm2367_vm1 = vweird.f32 %v2999_v39 }
0x16ed   : > { %vm2368_vm14 = vmor %vm2366_vm2, %vm2367_vm1 }
0x16ee   : > { %v2362_v18 = vmul.f32 %v2999_v39, %v2361_v42 }
0x16f0   : > { %v2363_v2 = vmul.f32 0.5, %v2362_v18 }
0x16f2   : > { %v2364_v45 = vsub.f32 1.5, %v2363_v2  ;;  %v2529_v2 = vld [vmem:[%s4055_s3 + $0x130] sm:$0xff] }
0x16f4   : > { %v2365_v46 = vmul.f32 %v2999_v39, %v2364_v45  ;;  %v2528_v45 = vld [vmem:[%s4055_s3 + $0x128] sm:$0xff] }
0x16f6   : > { %v2369_v22 = vsel %vm2368_vm14, %v2999_v39, %v2365_v46  ;;  %v2527_v46 = vld [vmem:[%s4055_s3 + $0x120] sm:$0xff] }
0x16f7   : > { %v2371_v32 = vmul.f32 %v2369_v22, %v2337_v25 }
0x16f9   : > { %v2374_v50 = vmul.f32 %v2372_v47, %v2371_v32 }
0x16fb   : > { %v2377_v51 = vadd.f32 %v2375_v19, %v2374_v50 }
0x16fd   : > { %2767 = vmatmul.msk.f32.gmra.mxu3 %vm258_vm0, %v2377_v51 }
0x1764   : > { %v2406_v49 = vpop.f32.mrf.mxu3 }
0x1765   : > { %v2407_v34 = vadd.f32 %v2406_v49, %v2382_v27  ;;  %v2524_v49 = vperm.slane %v3014_v1, 7 }
0x1767   : > { %v2412_v3 = vmul.f32 %v2407_v34, %v2407_v34 }
0x1769   : > { %v2414_v5 = vmul.f32 %v2412_v3, %v2407_v34 }
0x176b   : > { %v2416_v15 = vmul.f32 0.044715, %v2414_v5 }
0x176d   : > { %v2418_v7 = vadd.f32 %v2416_v15, %v2407_v34 }
0x176f   : > { %v2420_v63 = vmul.f32 0.7978846, %v2418_v7 }
0x1771   : > { %3000 = vtanh.f32 %v2420_v63 }
0x1777   : > { %v3001_v9 = vpop.eup %3000 }
0x1778   : > { %v2424_v14 = vadd.f32 1.0, %v3001_v9 }
0x177a   : > { %v2426_v11 = vmul.f32 0.5, %v2424_v14 }
0x177c   : > { %v2428_v21 = vmul.f32 %v2426_v11, %v2407_v34 }
0x177e   : > { %v2433_v17 = vmul.f32 %v2768_v13, %v2428_v21 }
0x1780   : > { %v2409_v20 = vpop.f32.mrf.mxu3  ;;  %2778 = vmatmul.msk.f32.vlgmr.msra.gmra.mxu2 %vm673_vm12, %v2433_v17 }
0x1781   : > { %v2410_v0 = vadd.f32 %v2409_v20, %v2382_v27 }
0x1783   : > { %v2413_v36 = vmul.f32 %v2410_v0, %v2410_v0 }
0x1785   : > { %v2415_v56 = vmul.f32 %v2413_v36, %v2410_v0 }
0x1787   : > { %v2417_v25 = vmul.f32 0.044715, %v2415_v56 }
0x1789   : > { %v2419_v16 = vadd.f32 %v2417_v25, %v2410_v0 }
0x178b   : > { %v2421_v31 = vmul.f32 0.7978846, %v2419_v16 }
0x178d   : > { %3002 = vtanh.f32 %v2421_v31 }
0x1793   : > { %v3003_v57 = vpop.eup %3002 }
0x1794   : > { %v2425_v59 = vadd.f32 1.0, %v3003_v57 }
0x1796   : > { %v2427_v60 = vmul.f32 0.5, %v2425_v59 }
0x1798   : > { %v2429_v26 = vmul.f32 %v2427_v60, %v2410_v0 }
0x179a   : > { %v2434_v4 = vmul.f32 %v2769_v23, %v2429_v26 }
0x179c   : > { %2779 = vmatmul.msk.f32.gmra.mxu2 %vm673_vm12, %v2434_v4 }
0x1803   : > { %v2466_v29 = vpop.f32.mrf.mxu2 }
0x1804   : > { %v2472_v54 = vadd.f32 %v2466_v29, %v3924_v41 }
0x1806   : > { %v2475_v30 = vadd.f32 %v2474_v28, %v2472_v54 }
0x1808   : > { %v2477_v8 = vsel %vm258_vm0, %v2475_v30, 0.0 }
0x1809   : > { %2478 = vadd.xlane.f32.xlu2 %v2477_v8 }
0x181f   : > { %v2469_v61 = vpop.f32.mrf.mxu2 }
0x1820   : > { %v2473_v47 = vadd.f32 %v2469_v61, %v3929_v10  ;;  %v2530_v10 = vld [vmem:[%s4055_s3 + $0x138] sm:$0xff] }
0x1821   : > { %2551 = vmatpush.msra.mxu0 %v2530_v10 }
0x1822   : > { %v2476_v43 = vadd.f32 %v2474_v28, %v2473_v47 }
0x1823   : > { %2552 = vmatpush.msra.mxu0 %v2529_v2 }
0x1824   : > { %v2480_v35 = vsel %vm258_vm0, %v2476_v43, 0.0 }
0x1825   : > { %2481 = vadd.xlane.f32.xlu1 %v2480_v35  ;;  %2553 = vmatpush.msra.mxu0 %v2528_v45 }
0x1827   : > { %2554 = vmatpush.msra.mxu0 %v2527_v46 }
0x187c   : > { %v2479_v19 = vpop.xlane.xlu2 %2478 }
0x187d   : > { %v2483_v44 = vmul.f32 %v2479_v19, %v3197_v12 }
0x187f   : > { %v2485_v6 = vsub.f32 %v2475_v30, %v2483_v44 }
0x1881   : > { %v2487_v33 = vmul.f32 %v2485_v6, %v2485_v6 }
0x1883   : > { %v2489_v38 = vsel %vm258_vm0, %v2487_v33, 0.0 }
0x1884   : > { %2490 = vadd.xlane.f32.xlu0 %v2489_v38 }
0x1898   : > { %v2482_v41 = vpop.xlane.xlu1 %2481 }
0x1899   : > { %v2484_v24 = vmul.f32 %v2482_v41, %v3197_v12 }
0x189b   : > { %v2486_v39 = vsub.f32 %v2476_v43, %v2484_v24 }
0x189d   : > { %v2488_v42 = vmul.f32 %v2486_v39, %v2486_v39 }
0x189f   : > { %v2492_v18 = vsel %vm258_vm0, %v2488_v42, 0.0 }
0x18a0   : > { %2493 = vadd.xlane.f32.xlu2 %v2492_v18 }
0x18f7   : > { %v2491_v22 = vpop.xlane.xlu0 %2490 }
0x18f8   : > { %v2495_v32 = vmul.f32 %v2491_v22, %v3197_v12 }
0x18fa   : > { %v2497_v50 = vadd.f32 1e-05, %v2495_v32 }
0x18fc   : > { %3004 = vrsqrt.f32 %v2497_v50  ;;  %vm2505_vm3 = vweird.f32 %v2497_v50 }
0x1902   : > { %v3005_v51 = vpop.eup %3004 }
0x1903   : > { %v2500_v52 = vmul.f32 %v3005_v51, %v2497_v50  ;;  %vm2506_vm12 = vweird.f32 %v3005_v51 }
0x1904   : > { %vm2507_vm5 = vmor %vm2505_vm3, %vm2506_vm12 }
0x1905   : > { %v2501_v55 = vmul.f32 %v3005_v51, %v2500_v52 }
0x1907   : > { %v2502_v58 = vmul.f32 0.5, %v2501_v55 }
0x1909   : > { %v2503_v48 = vsub.f32 1.5, %v2502_v58 }
0x190b   : > { %v2504_v62 = vmul.f32 %v3005_v51, %v2503_v48 }
0x190d   : > { %v2508_v37 = vsel %vm2507_vm5, %v3005_v51, %v2504_v62 }
0x190e   : > { %v2519_v27 = vmul.f32 %v2508_v37, %v2485_v6 }
0x1910   : > { %v2522_v34 = vmul.f32 %v2521_v40, %v2519_v27 }
0x1912   : > { %v2525_v3 = vadd.f32 %v2524_v49, %v2522_v34 }
0x1913   : > { %v2494_v5 = vpop.xlane.xlu2 %2493 }
0x1914   : > { %v2496_v15 = vmul.f32 %v2494_v5, %v3197_v12  ;;  %2780 = vmatmul.msk.f32.vlgmr.msra.gmra.mxu0 %vm258_vm0, %v2525_v3  ;;  %v2891_v12 = vld [vmem:[%s4055_s3 + $0x5d] ss:$0 sm:$0xff] }
0x1916   : > { %v2498_v7 = vadd.f32 1e-05, %v2496_v15 }
0x1918   : > { %3006 = vrsqrt.f32 %v2498_v7  ;;  %vm2515_vm7 = vweird.f32 %v2498_v7 }
0x191e   : > { %v3007_v63 = vpop.eup %3006 }
0x191f   : > { %v2510_v9 = vmul.f32 %v3007_v63, %v2498_v7  ;;  %vm2516_vm6 = vweird.f32 %v3007_v63 }
0x1920   : > { %vm2517_vm8 = vmor %vm2515_vm7, %vm2516_vm6 }
0x1921   : > { %v2511_v14 = vmul.f32 %v3007_v63, %v2510_v9 }
0x1923   : > { %v2512_v11 = vmul.f32 0.5, %v2511_v14 }
0x1925   : > { %v2513_v13 = vsub.f32 1.5, %v2512_v11 }
0x1927   : > { %v2514_v21 = vmul.f32 %v3007_v63, %v2513_v13 }
0x1929   : > { %v2518_v17 = vsel %vm2517_vm8, %v3007_v63, %v2514_v21 }
0x192a   : > { %v2520_v20 = vmul.f32 %v2518_v17, %v2486_v39 }
0x192c   : > { %v2523_v0 = vmul.f32 %v2521_v40, %v2520_v20 }
0x192e   : > { %v2526_v36 = vadd.f32 %v2524_v49, %v2523_v0 }
0x1930   : > { %2781 = vmatmul.msk.f32.gmra.mxu0 %vm258_vm0, %v2526_v36 }
0x1991   : > { %v2556_v56 = vpop.f32.mrf.mxu0 }
0x1992   : > { %v2557_v25 = vadd.f32 %v2891_v12, %v2556_v56 }
0x1994   : > { %2562 = vst [vmem:[%s241_s23] sm:$0xff] %v2557_v25 }
0x19ad   : > { %v2559_v16 = vpop.f32.mrf.mxu0 }
0x19ae   : > { %v2560_v31 = vadd.f32 %v2891_v12, %v2559_v16 }
0x19b0   : > { %2563 = vst [vmem:[%s241_s23 + $0x8] sm:$0xff] %v2560_v31 }
0x19b1   : > { %3042 = shalt.err (!%p3039_p3)
}
0x19b2   : > { %s3095_s14 = smov 128  }
0x19b3   : > { %2789 = dma.vmem_to_hbm [thread:$0]  (%p3164_p5), %s2578_s25, 256, %s2580_s30, %s2565_s6, %s3095_s14, %s3095_s14, %s4085_s7  }
0x19b4 PF: > { %p2795_p4 = scmp.ge.s32.totalorder %s3077_s21, 2  ;;  %s2594_s23 = sand.u32 1, %s3065_s18  }
0x19b5   : > { %s2595_s8 = scalar_lea.sflag [#allocation4], %s2594_s23 }
0x19b6   : > { %p2792_p7 = pnand %p2795_p4, %p3168_p6 }
0x19b8   : > { %p2793_p8 = pneg %p2792_p7 }
0x19ba   : > { %3060 = dma.done.wait (%p2793_p8), %s2595_s8, 256  }
0x19bb   : > { %3062 = vsyncadd (%p2793_p8), %s2595_s8, 4294967040  ;;  %p15_p9 = scmp.ge.s32.totalorder %s3151_s24, 4   ;;  %s4088_s18 = smov %s3069_s19 }
0x19bc   : > { %s4089_s19 = smov %s3073_s20  ;;  %s4090_s20 = smov %s3162_s27 }
0x19bd   : > { %s4091_s21 = smov %s3151_s24  ;;  %17 = sbr.rel (!%p15_p9) target bundleno = 3 (0x3), region = 83 }
0x19c2   :  { %2601 = vsyncpa [#allocation4], 1 }
0x19c3   :  { %2603 = vsyncpa [#allocation4 + $0x1], 1 }

</bundles_post_ra>
